<compile_context>
chip_gen: v5e
topology: v5e:2x2
jax: 0.10.0
libtpu: 0.0.40
codegen_flags: <defaults>
</compile_context>

<pallas_src>
import functools

import jax
import jax.numpy as jnp
from jax import lax
from jax.experimental import pallas as pl
from jax.experimental.pallas import tpu as pltpu


# ----------------------------- in-kernel helpers -----------------------------

def _layernorm(t, g, b, eps=1e-5):
    """PyTorch-style LayerNorm over the last dim (f32 math)."""
    mu = jnp.mean(t, axis=-1, keepdims=True)
    var = jnp.mean(jnp.square(t - mu), axis=-1, keepdims=True)
    return (t - mu) * lax.rsqrt(var + eps) * g + b


def _gelu_erf(x):
    """Exact (erf-based) GELU matching torch.nn.GELU() default.

    erf via Abramowitz & Stegun 7.1.26 (|err| < 1.5e-7): only exp / mul / add /
    div, all of which lower to plain VPU/EUP ops on every TPU generation.
    """
    p = 0.3275911
    a1, a2, a3, a4, a5 = (0.254829592, -0.284496736, 1.421413741,
                          -1.453152027, 1.061405429)
    z = x * 0.7071067811865476                      # x / sqrt(2)
    az = jnp.abs(z)
    sgn = jnp.where(z >= 0.0, 1.0, -1.0)
    t = 1.0 / (1.0 + p * az)
    poly = ((((a5 * t + a4) * t + a3) * t + a2) * t + a1) * t
    erf_z = sgn * (1.0 - poly * jnp.exp(-az * az))
    return 0.5 * x * (1.0 + erf_z)


# ------------------------------ fused kernel ---------------------------------

def _encoder_kernel(*refs, heads, reduction, H, W):
    if reduction > 1:
        (x_ref, g1_ref, b1_ref, wq_ref,
         sel_ref, wsr_ref, bsr_ref, gsr_ref, bsr_ln_ref,
         wk_ref, wv_ref, wo_ref, bo_ref,
         w1_ref, bf1_ref, w2_ref, bf2_ref, o_ref) = refs
    else:
        (x_ref, g1_ref, b1_ref, wq_ref,
         wk_ref, wv_ref, wo_ref, bo_ref,
         w1_ref, bf1_ref, w2_ref, bf2_ref, o_ref) = refs

    N, C = x_ref.shape
    d = C // heads
    f32 = jnp.float32

    x = x_ref[...].astype(f32)                      # (N, C)
    g1 = g1_ref[...].astype(f32)                    # shared encoder LayerNorm
    b1 = b1_ref[...].astype(f32)

    xn = _layernorm(x, g1, b1)                      # x_norm = self.norm(x)

    # ---------------------------------- SRA ----------------------------------
    # q projection; the softmax scale is pre-folded into wq in the wrapper.
    q = jnp.dot(xn, wq_ref[...], preferred_element_type=f32)             # (N, C)

    if reduction > 1:
        # Conv2d(dim, dim, k=R, stride=R) + LayerNorm, fused:
        # conv == sum over the R*R kernel taps of (token-gather) @ W_tap,
        # where the gather is a tiny one-hot selection matmul (MXU-friendly,
        # no strided loads, no host-side patch transpose / extra HBM copy).
        red = None
        for t in range(reduction * reduction):
            tap = jnp.dot(sel_ref[t], xn, preferred_element_type=f32)    # (Nk, C)
            contrib = jnp.dot(tap, wsr_ref[t], preferred_element_type=f32)
            red = contrib if red is None else red + contrib
        red = red + bsr_ref[...].astype(f32)
        kv_in = _layernorm(red, gsr_ref[...].astype(f32),
                           bsr_ln_ref[...].astype(f32))                  # (Nk, C)
    else:
        kv_in = xn                                                       # (N, C)

    # Separate k / v projections (to_kv weight pre-split; no kv slicing).
    k = jnp.dot(kv_in, wk_ref[...], preferred_element_type=f32)          # (Nk, C)
    v = jnp.dot(kv_in, wv_ref[...], preferred_element_type=f32)          # (Nk, C)

    # Per-head attention; heads stay packed along the channel (lane) dim and
    # QK^T contracts the last axes directly (no transpose materialized).
    outs = []
    for hh in range(heads):
        sl = slice(hh * d, (hh + 1) * d)
        s = lax.dot_general(q[:, sl], k[:, sl], (((1,), (1,)), ((), ())),
                            preferred_element_type=f32)                  # (N, Nk)
        s = s - jnp.max(s, axis=-1, keepdims=True)
        p = jnp.exp(s)
        # EUP reciprocal (approx=True trades a few softmax bits for VALU slack).
        p = p * pl.reciprocal(jnp.sum(p, axis=-1, keepdims=True), approx=False)
        outs.append(jnp.dot(p, v[:, sl], preferred_element_type=f32))    # (N, d)
    attn = jnp.concatenate(outs, axis=-1)                                # (N, C)

    sra = (jnp.dot(attn, wo_ref[...], preferred_element_type=f32)
           + bo_ref[...].astype(f32))
    y = x + sra                                                          # residual 1

    # ---------------------------------- FFN ----------------------------------
    yn = _layernorm(y, g1, b1)                      # the SAME self.norm, reused
    h1 = (jnp.dot(yn, w1_ref[...], preferred_element_type=f32)
          + bf1_ref[...].astype(f32))
    h1 = _gelu_erf(h1)
    ff = (jnp.dot(h1, w2_ref[...], preferred_element_type=f32)
          + bf2_ref[...].astype(f32))

    o_ref[...] = (y + ff).astype(o_ref.dtype)       # residual 2


# ------------------------------- host wrapper ---------------------------------

def _ws(shape):
    """Full-array weight block, identical at every grid step (DMA'd once)."""
    return pl.BlockSpec(shape, lambda b, _n=len(shape): (0,) * _n)


def _tap_selectors(H, W, R, dtype):
    """One-hot row selectors for each of the R*R conv taps: (R*R, Nk, N)."""
    Hr, Wr = H // R, W // R
    N, Nk = H * W, Hr * Wr
    hr = jnp.arange(Hr)
    wr = jnp.arange(Wr)
    sels = []
    for i in range(R):
        for j in range(R):
            rows = ((hr[:, None] * R + i) * W + (wr[None, :] * R + j)).reshape(Nk)
            sels.append(jax.nn.one_hot(rows, N, dtype=dtype))
    return jnp.stack(sels, axis=0)


def encoder_forward(x, H, W, params, heads, reduction):
    """Fused PVT Encoder forward: one pallas_call, grid over batch (parallel)."""
    B, N, C = x.shape
    assert N == H * W and C % heads == 0
    hid = params["w_fc1"].shape[1]
    R = reduction
    dt = x.dtype
    scale = (C // heads) ** (-0.5)

    row = lambda a: a.reshape(1, -1).astype(dt)

    # Fold the softmax scale into the q projection (exact for power-of-two d).
    wq_scaled = (params["wq"] * scale).astype(dt)
    # Split to_kv so k and v come straight out of their own matmul.
    wk = params["wkv"][:, :C].astype(dt)
    wv = params["wkv"][:, C:].astype(dt)

    inputs = [x, row(params["g1"]), row(params["b1"]), wq_scaled]
    in_specs = [pl.BlockSpec((None, N, C), lambda b: (b, 0, 0)),
                _ws((1, C)), _ws((1, C)), _ws((C, C))]

    if R > 1:
        assert H % R == 0 and W % R == 0
        Hr, Wr = H // R, W // R
        Nk = Hr * Wr
        # TODO(synk): for large N (PVT stage 1) replace the one-hot selection
        # matmul gather with a BlockSpec / strided-DMA gather and tile N with a
        # second grid axis; the O(N*Nk*C)-per-tap selection only makes sense in
        # this small-N, fully-fused regime.
        sel = _tap_selectors(H, W, R, dt)                                # (R*R, Nk, N)
        wsr = jnp.transpose(params["w_sr"], (2, 3, 1, 0)).reshape(R * R, C, C).astype(dt)
        inputs += [sel, wsr, row(params["b_sr"]),
                   row(params["g_ln"]), row(params["b_ln"])]
        in_specs += [_ws((R * R, Nk, N)), _ws((R * R, C, C)),
                     _ws((1, C)), _ws((1, C)), _ws((1, C))]

    inputs += [wk, wv, params["wo"].astype(dt), row(params["bo"]),
               params["w_fc1"].astype(dt), row(params["b_fc1"]),
               params["w_fc2"].astype(dt), row(params["b_fc2"])]
    in_specs += [_ws((C, C)), _ws((C, C)), _ws((C, C)), _ws((1, C)),
                 _ws((C, hid)), _ws((1, hid)), _ws((hid, C)), _ws((1, C))]

    kernel = functools.partial(_encoder_kernel,
                               heads=heads, reduction=R, H=H, W=W)
    return pl.pallas_call(
        kernel,
        out_shape=jax.ShapeDtypeStruct((B, N, C), dt),
        grid=(B,),
        in_specs=in_specs,
        out_specs=pl.BlockSpec((None, N, C), lambda b: (b, 0, 0)),
        compiler_params=pltpu.CompilerParams(
            dimension_semantics=("parallel",)),      # B>=2 -> both v7x TCs busy
    )(*inputs)


# ----------------------------- pure-JAX reference -----------------------------

def encoder_reference(x, H, W, params, heads, reduction):
    B, N, C = x.shape
    d = C // heads
    scale = d ** (-0.5)

    def ln(t, g, b):
        mu = t.mean(-1, keepdims=True)
        var = ((t - mu) ** 2).mean(-1, keepdims=True)
        return (t - mu) / jnp.sqrt(var + 1e-5) * g + b

    xn = ln(x, params["g1"], params["b1"])

    # --- SRA(xn) ---
    q = (xn @ params["wq"]).reshape(B, N, heads, d).transpose(0, 2, 1, 3)
    if reduction > 1:
        R = reduction
        Hr, Wr = H // R, W // R
        x_ = xn.reshape(B, H, W, C).transpose(0, 3, 1, 2)               # NCHW
        red = lax.conv_general_dilated(
            x_, params["w_sr"], window_strides=(R, R), padding="VALID",
            dimension_numbers=("NCHW", "OIHW", "NCHW"))
        red = red + params["b_sr"][None, :, None, None]
        red = red.reshape(B, C, Hr * Wr).transpose(0, 2, 1)             # b (h w) c
        red = ln(red, params["g_ln"], params["b_ln"])
        kv_in = red
    else:
        kv_in = xn
    kv = kv_in @ params["wkv"]
    k, v = kv[..., :C], kv[..., C:]
    Nk = kv_in.shape[1]
    k = k.reshape(B, Nk, heads, d).transpose(0, 2, 1, 3)
    v = v.reshape(B, Nk, heads, d).transpose(0, 2, 1, 3)
    attn = (q @ jnp.swapaxes(k, -1, -2)) * scale
    attn = jax.nn.softmax(attn, axis=-1)
    sra = (attn @ v).transpose(0, 2, 1, 3).reshape(B, N, C)
    sra = sra @ params["wo"] + params["bo"]

    y = x + sra
    yn = ln(y, params["g1"], params["b1"])
    h1 = yn @ params["w_fc1"] + params["b_fc1"]
    h1 = jax.nn.gelu(h1, approximate=False)         # torch nn.GELU() default
    ff = h1 @ params["w_fc2"] + params["b_fc2"]
    return y + ff


# ------------------------------------ main ------------------------------------

if __name__ == "__main__":
    B, H, W = 2, 8, 8
    C, heads, R, mlp_ratio = 32, 2, 2, 4
    N = H * W
    hid = C * mlp_ratio

    keys = jax.random.split(jax.random.PRNGKey(0), 16)
    params = {
        "g1":   1.0 + 0.1 * jax.random.normal(keys[0], (C,), jnp.float32),
        "b1":   0.1 * jax.random.normal(keys[1], (C,), jnp.float32),
        "wq":   jax.random.normal(keys[2], (C, C), jnp.float32) * 0.05,
        "wkv":  jax.random.normal(keys[3], (C, 2 * C), jnp.float32) * 0.05,
        "w_sr": jax.random.normal(keys[4], (C, C, R, R), jnp.float32) * 0.05,  # torch OIHW
        "b_sr": 0.05 * jax.random.normal(keys[5], (C,), jnp.float32),
        "g_ln": 1.0 + 0.1 * jax.random.normal(keys[6], (C,), jnp.float32),
        "b_ln": 0.1 * jax.random.normal(keys[7], (C,), jnp.float32),
        "wo":   jax.random.normal(keys[8], (C, C), jnp.float32) * 0.05,
        "bo":   0.1 * jax.random.normal(keys[9], (C,), jnp.float32),
        "w_fc1": jax.random.normal(keys[10], (C, hid), jnp.float32) * 0.05,
        "b_fc1": 0.05 * jax.random.normal(keys[11], (hid,), jnp.float32),
        "w_fc2": jax.random.normal(keys[12], (hid, C), jnp.float32) * 0.05,
        "b_fc2": 0.05 * jax.random.normal(keys[13], (C,), jnp.float32),
    }
    x = jax.random.normal(keys[14], (B, N, C), jnp.float32)

    out = encoder_forward(x, H, W, params, heads, R)
    out = jax.block_until_ready(out)

    ref = encoder_reference(x, H, W, params, heads, R)
    assert out.shape == (B, N, C)
    err = float(jnp.abs(out - ref).max())
    assert jnp.allclose(out, ref, atol=1e-4, rtol=1e-4), err

    print("KERNEL_OK")
</pallas_src>

<mosaic_0001>
module attributes {stable_mosaic.version = 11 : i64} {
  func.func @_encoder_kernel(%arg0: i32, %arg1: memref<1x64x32xf32, #tpu.memory_space<vmem>>, %arg2: memref<1x32xf32, #tpu.memory_space<vmem>>, %arg3: memref<1x32xf32, #tpu.memory_space<vmem>>, %arg4: memref<32x32xf32, #tpu.memory_space<vmem>>, %arg5: memref<4x16x64xf32, #tpu.memory_space<vmem>>, %arg6: memref<4x32x32xf32, #tpu.memory_space<vmem>>, %arg7: memref<1x32xf32, #tpu.memory_space<vmem>>, %arg8: memref<1x32xf32, #tpu.memory_space<vmem>>, %arg9: memref<1x32xf32, #tpu.memory_space<vmem>>, %arg10: memref<32x32xf32, #tpu.memory_space<vmem>>, %arg11: memref<32x32xf32, #tpu.memory_space<vmem>>, %arg12: memref<32x32xf32, #tpu.memory_space<vmem>>, %arg13: memref<1x32xf32, #tpu.memory_space<vmem>>, %arg14: memref<32x128xf32, #tpu.memory_space<vmem>>, %arg15: memref<1x128xf32, #tpu.memory_space<vmem>>, %arg16: memref<128x32xf32, #tpu.memory_space<vmem>>, %arg17: memref<1x32xf32, #tpu.memory_space<vmem>>, %arg18: memref<1x64x32xf32, #tpu.memory_space<vmem>>) attributes {dimension_semantics = [#tpu.dimension_semantics<parallel>], iteration_bounds = array<i64: 2>, scalar_prefetch = 0 : i64, scratch_operands = 0 : i64, tpu.core_type = #tpu.core_type<tc>, window_params = [{transform_indices = @transform_0, window_bounds = array<i64: 1, 64, 32>}, {pipeline_mode = #tpu.pipeline_mode<synchronous>, transform_indices = @transform_1, window_bounds = array<i64: 1, 32>}, {pipeline_mode = #tpu.pipeline_mode<synchronous>, transform_indices = @transform_2, window_bounds = array<i64: 1, 32>}, {pipeline_mode = #tpu.pipeline_mode<synchronous>, transform_indices = @transform_3, window_bounds = array<i64: 32, 32>}, {pipeline_mode = #tpu.pipeline_mode<synchronous>, transform_indices = @transform_4, window_bounds = array<i64: 4, 16, 64>}, {pipeline_mode = #tpu.pipeline_mode<synchronous>, transform_indices = @transform_5, window_bounds = array<i64: 4, 32, 32>}, {pipeline_mode = #tpu.pipeline_mode<synchronous>, transform_indices = @transform_6, window_bounds = array<i64: 1, 32>}, {pipeline_mode = #tpu.pipeline_mode<synchronous>, transform_indices = @transform_7, window_bounds = array<i64: 1, 32>}, {pipeline_mode = #tpu.pipeline_mode<synchronous>, transform_indices = @transform_8, window_bounds = array<i64: 1, 32>}, {pipeline_mode = #tpu.pipeline_mode<synchronous>, transform_indices = @transform_9, window_bounds = array<i64: 32, 32>}, {pipeline_mode = #tpu.pipeline_mode<synchronous>, transform_indices = @transform_10, window_bounds = array<i64: 32, 32>}, {pipeline_mode = #tpu.pipeline_mode<synchronous>, transform_indices = @transform_11, window_bounds = array<i64: 32, 32>}, {pipeline_mode = #tpu.pipeline_mode<synchronous>, transform_indices = @transform_12, window_bounds = array<i64: 1, 32>}, {pipeline_mode = #tpu.pipeline_mode<synchronous>, transform_indices = @transform_13, window_bounds = array<i64: 32, 128>}, {pipeline_mode = #tpu.pipeline_mode<synchronous>, transform_indices = @transform_14, window_bounds = array<i64: 1, 128>}, {pipeline_mode = #tpu.pipeline_mode<synchronous>, transform_indices = @transform_15, window_bounds = array<i64: 128, 32>}, {pipeline_mode = #tpu.pipeline_mode<synchronous>, transform_indices = @transform_16, window_bounds = array<i64: 1, 32>}, {transform_indices = @transform_17, window_bounds = array<i64: 1, 64, 32>}]} {
    %c0 = arith.constant 0 : index
    %c0_0 = arith.constant 0 : index
    %c0_1 = arith.constant 0 : index
    %0 = vector.load %arg1[%c0, %c0_0, %c0_1] : memref<1x64x32xf32, #tpu.memory_space<vmem>>, vector<1x64x32xf32>
    %1 = vector.shape_cast %0 : vector<1x64x32xf32> to vector<64x32xf32>
    %c0_2 = arith.constant 0 : index
    %c0_3 = arith.constant 0 : index
    %2 = vector.load %arg2[%c0_2, %c0_3] : memref<1x32xf32, #tpu.memory_space<vmem>>, vector<1x32xf32>
    %c0_4 = arith.constant 0 : index
    %c0_5 = arith.constant 0 : index
    %3 = vector.load %arg3[%c0_4, %c0_5] : memref<1x32xf32, #tpu.memory_space<vmem>>, vector<1x32xf32>
    %cst = arith.constant dense<0.000000e+00> : vector<64xf32>
    %4 = vector.multi_reduction <add>, %1, %cst [1] : vector<64x32xf32> to vector<64xf32>
    %5 = vector.shape_cast %4 : vector<64xf32> to vector<64x1xf32>
    %cst_6 = arith.constant 3.200000e+01 : f32
    %6 = vector.broadcast %cst_6 : f32 to vector<64x1xf32>
    %7 = arith.divf %5, %6 : vector<64x1xf32>
    %8 = vector.broadcast %7 : vector<64x1xf32> to vector<64x32xf32>
    %9 = arith.subf %1, %8 : vector<64x32xf32>
    %10 = arith.mulf %9, %9 : vector<64x32xf32>
    %cst_7 = arith.constant dense<0.000000e+00> : vector<64xf32>
    %11 = vector.multi_reduction <add>, %10, %cst_7 [1] : vector<64x32xf32> to vector<64xf32>
    %12 = vector.shape_cast %11 : vector<64xf32> to vector<64x1xf32>
    %cst_8 = arith.constant 3.200000e+01 : f32
    %13 = vector.broadcast %cst_8 : f32 to vector<64x1xf32>
    %14 = arith.divf %12, %13 : vector<64x1xf32>
    %15 = vector.broadcast %7 : vector<64x1xf32> to vector<64x32xf32>
    %16 = arith.subf %1, %15 : vector<64x32xf32>
    %cst_9 = arith.constant 9.99999974E-6 : f32
    %17 = vector.broadcast %cst_9 : f32 to vector<64x1xf32>
    %18 = arith.addf %14, %17 : vector<64x1xf32>
    %19 = math.rsqrt %18 : vector<64x1xf32>
    %20 = vector.broadcast %19 : vector<64x1xf32> to vector<64x32xf32>
    %21 = arith.mulf %16, %20 : vector<64x32xf32>
    %22 = vector.broadcast %2 : vector<1x32xf32> to vector<64x32xf32>
    %23 = arith.mulf %21, %22 : vector<64x32xf32>
    %24 = vector.broadcast %3 : vector<1x32xf32> to vector<64x32xf32>
    %25 = arith.addf %23, %24 : vector<64x32xf32>
    %c0_10 = arith.constant 0 : index
    %c0_11 = arith.constant 0 : index
    %26 = vector.load %arg4[%c0_10, %c0_11] : memref<32x32xf32, #tpu.memory_space<vmem>>, vector<32x32xf32>
    %cst_12 = arith.constant dense<0.000000e+00> : vector<64x32xf32>
    %27 = tpu.matmul %25, %26, %cst_12 {dimension_numbers = #tpu.dot_dimension_numbers<[1], [0], [0], [1], [0, 0, 1, 1], [], []>} : vector<64x32xf32>, vector<32x32xf32>, vector<64x32xf32> -> vector<64x32xf32>
    %c0_13 = arith.constant 0 : index
    %c0_14 = arith.constant 0 : index
    %c0_15 = arith.constant 0 : index
    %28 = vector.load %arg5[%c0_13, %c0_14, %c0_15] : memref<4x16x64xf32, #tpu.memory_space<vmem>>, vector<1x16x64xf32>
    %29 = vector.shape_cast %28 : vector<1x16x64xf32> to vector<16x64xf32>
    %cst_16 = arith.constant dense<0.000000e+00> : vector<16x32xf32>
    %30 = tpu.matmul %29, %25, %cst_16 {dimension_numbers = #tpu.dot_dimension_numbers<[1], [0], [0], [1], [0, 0, 1, 1], [], []>} : vector<16x64xf32>, vector<64x32xf32>, vector<16x32xf32> -> vector<16x32xf32>
    %c0_17 = arith.constant 0 : index
    %c0_18 = arith.constant 0 : index
    %c0_19 = arith.constant 0 : index
    %31 = vector.load %arg6[%c0_17, %c0_18, %c0_19] : memref<4x32x32xf32, #tpu.memory_space<vmem>>, vector<1x32x32xf32>
    %32 = vector.shape_cast %31 : vector<1x32x32xf32> to vector<32x32xf32>
    %cst_20 = arith.constant dense<0.000000e+00> : vector<16x32xf32>
    %33 = tpu.matmul %30, %32, %cst_20 {dimension_numbers = #tpu.dot_dimension_numbers<[1], [0], [0], [1], [0, 0, 1, 1], [], []>} : vector<16x32xf32>, vector<32x32xf32>, vector<16x32xf32> -> vector<16x32xf32>
    %c1 = arith.constant 1 : index
    %c0_21 = arith.constant 0 : index
    %c0_22 = arith.constant 0 : index
    %34 = vector.load %arg5[%c1, %c0_21, %c0_22] : memref<4x16x64xf32, #tpu.memory_space<vmem>>, vector<1x16x64xf32>
    %35 = vector.shape_cast %34 : vector<1x16x64xf32> to vector<16x64xf32>
    %cst_23 = arith.constant dense<0.000000e+00> : vector<16x32xf32>
    %36 = tpu.matmul %35, %25, %cst_23 {dimension_numbers = #tpu.dot_dimension_numbers<[1], [0], [0], [1], [0, 0, 1, 1], [], []>} : vector<16x64xf32>, vector<64x32xf32>, vector<16x32xf32> -> vector<16x32xf32>
    %c1_24 = arith.constant 1 : index
    %c0_25 = arith.constant 0 : index
    %c0_26 = arith.constant 0 : index
    %37 = vector.load %arg6[%c1_24, %c0_25, %c0_26] : memref<4x32x32xf32, #tpu.memory_space<vmem>>, vector<1x32x32xf32>
    %38 = vector.shape_cast %37 : vector<1x32x32xf32> to vector<32x32xf32>
    %cst_27 = arith.constant dense<0.000000e+00> : vector<16x32xf32>
    %39 = tpu.matmul %36, %38, %cst_27 {dimension_numbers = #tpu.dot_dimension_numbers<[1], [0], [0], [1], [0, 0, 1, 1], [], []>} : vector<16x32xf32>, vector<32x32xf32>, vector<16x32xf32> -> vector<16x32xf32>
    %40 = arith.addf %33, %39 : vector<16x32xf32>
    %c2 = arith.constant 2 : index
    %c0_28 = arith.constant 0 : index
    %c0_29 = arith.constant 0 : index
    %41 = vector.load %arg5[%c2, %c0_28, %c0_29] : memref<4x16x64xf32, #tpu.memory_space<vmem>>, vector<1x16x64xf32>
    %42 = vector.shape_cast %41 : vector<1x16x64xf32> to vector<16x64xf32>
    %cst_30 = arith.constant dense<0.000000e+00> : vector<16x32xf32>
    %43 = tpu.matmul %42, %25, %cst_30 {dimension_numbers = #tpu.dot_dimension_numbers<[1], [0], [0], [1], [0, 0, 1, 1], [], []>} : vector<16x64xf32>, vector<64x32xf32>, vector<16x32xf32> -> vector<16x32xf32>
    %c2_31 = arith.constant 2 : index
    %c0_32 = arith.constant 0 : index
    %c0_33 = arith.constant 0 : index
    %44 = vector.load %arg6[%c2_31, %c0_32, %c0_33] : memref<4x32x32xf32, #tpu.memory_space<vmem>>, vector<1x32x32xf32>
    %45 = vector.shape_cast %44 : vector<1x32x32xf32> to vector<32x32xf32>
    %cst_34 = arith.constant dense<0.000000e+00> : vector<16x32xf32>
    %46 = tpu.matmul %43, %45, %cst_34 {dimension_numbers = #tpu.dot_dimension_numbers<[1], [0], [0], [1], [0, 0, 1, 1], [], []>} : vector<16x32xf32>, vector<32x32xf32>, vector<16x32xf32> -> vector<16x32xf32>
    %47 = arith.addf %40, %46 : vector<16x32xf32>
    %c3 = arith.constant 3 : index
    %c0_35 = arith.constant 0 : index
    %c0_36 = arith.constant 0 : index
    %48 = vector.load %arg5[%c3, %c0_35, %c0_36] : memref<4x16x64xf32, #tpu.memory_space<vmem>>, vector<1x16x64xf32>
    %49 = vector.shape_cast %48 : vector<1x16x64xf32> to vector<16x64xf32>
    %cst_37 = arith.constant dense<0.000000e+00> : vector<16x32xf32>
    %50 = tpu.matmul %49, %25, %cst_37 {dimension_numbers = #tpu.dot_dimension_numbers<[1], [0], [0], [1], [0, 0, 1, 1], [], []>} : vector<16x64xf32>, vector<64x32xf32>, vector<16x32xf32> -> vector<16x32xf32>
    %c3_38 = arith.constant 3 : index
    %c0_39 = arith.constant 0 : index
    %c0_40 = arith.constant 0 : index
    %51 = vector.load %arg6[%c3_38, %c0_39, %c0_40] : memref<4x32x32xf32, #tpu.memory_space<vmem>>, vector<1x32x32xf32>
    %52 = vector.shape_cast %51 : vector<1x32x32xf32> to vector<32x32xf32>
    %cst_41 = arith.constant dense<0.000000e+00> : vector<16x32xf32>
    %53 = tpu.matmul %50, %52, %cst_41 {dimension_numbers = #tpu.dot_dimension_numbers<[1], [0], [0], [1], [0, 0, 1, 1], [], []>} : vector<16x32xf32>, vector<32x32xf32>, vector<16x32xf32> -> vector<16x32xf32>
    %54 = arith.addf %47, %53 : vector<16x32xf32>
    %c0_42 = arith.constant 0 : index
    %c0_43 = arith.constant 0 : index
    %55 = vector.load %arg7[%c0_42, %c0_43] : memref<1x32xf32, #tpu.memory_space<vmem>>, vector<1x32xf32>
    %56 = vector.broadcast %55 : vector<1x32xf32> to vector<16x32xf32>
    %57 = arith.addf %54, %56 : vector<16x32xf32>
    %c0_44 = arith.constant 0 : index
    %c0_45 = arith.constant 0 : index
    %58 = vector.load %arg8[%c0_44, %c0_45] : memref<1x32xf32, #tpu.memory_space<vmem>>, vector<1x32xf32>
    %c0_46 = arith.constant 0 : index
    %c0_47 = arith.constant 0 : index
    %59 = vector.load %arg9[%c0_46, %c0_47] : memref<1x32xf32, #tpu.memory_space<vmem>>, vector<1x32xf32>
    %cst_48 = arith.constant dense<0.000000e+00> : vector<16xf32>
    %60 = vector.multi_reduction <add>, %57, %cst_48 [1] : vector<16x32xf32> to vector<16xf32>
    %61 = vector.shape_cast %60 : vector<16xf32> to vector<16x1xf32>
    %cst_49 = arith.constant 3.200000e+01 : f32
    %62 = vector.broadcast %cst_49 : f32 to vector<16x1xf32>
    %63 = arith.divf %61, %62 : vector<16x1xf32>
    %64 = vector.broadcast %63 : vector<16x1xf32> to vector<16x32xf32>
    %65 = arith.subf %57, %64 : vector<16x32xf32>
    %66 = arith.mulf %65, %65 : vector<16x32xf32>
    %cst_50 = arith.constant dense<0.000000e+00> : vector<16xf32>
    %67 = vector.multi_reduction <add>, %66, %cst_50 [1] : vector<16x32xf32> to vector<16xf32>
    %68 = vector.shape_cast %67 : vector<16xf32> to vector<16x1xf32>
    %cst_51 = arith.constant 3.200000e+01 : f32
    %69 = vector.broadcast %cst_51 : f32 to vector<16x1xf32>
    %70 = arith.divf %68, %69 : vector<16x1xf32>
    %71 = vector.broadcast %63 : vector<16x1xf32> to vector<16x32xf32>
    %72 = arith.subf %57, %71 : vector<16x32xf32>
    %cst_52 = arith.constant 9.99999974E-6 : f32
    %73 = vector.broadcast %cst_52 : f32 to vector<16x1xf32>
    %74 = arith.addf %70, %73 : vector<16x1xf32>
    %75 = math.rsqrt %74 : vector<16x1xf32>
    %76 = vector.broadcast %75 : vector<16x1xf32> to vector<16x32xf32>
    %77 = arith.mulf %72, %76 : vector<16x32xf32>
    %78 = vector.broadcast %58 : vector<1x32xf32> to vector<16x32xf32>
    %79 = arith.mulf %77, %78 : vector<16x32xf32>
    %80 = vector.broadcast %59 : vector<1x32xf32> to vector<16x32xf32>
    %81 = arith.addf %79, %80 : vector<16x32xf32>
    %c0_53 = arith.constant 0 : index
    %c0_54 = arith.constant 0 : index
    %82 = vector.load %arg10[%c0_53, %c0_54] : memref<32x32xf32, #tpu.memory_space<vmem>>, vector<32x32xf32>
    %cst_55 = arith.constant dense<0.000000e+00> : vector<16x32xf32>
    %83 = tpu.matmul %81, %82, %cst_55 {dimension_numbers = #tpu.dot_dimension_numbers<[1], [0], [0], [1], [0, 0, 1, 1], [], []>} : vector<16x32xf32>, vector<32x32xf32>, vector<16x32xf32> -> vector<16x32xf32>
    %c0_56 = arith.constant 0 : index
    %c0_57 = arith.constant 0 : index
    %84 = vector.load %arg11[%c0_56, %c0_57] : memref<32x32xf32, #tpu.memory_space<vmem>>, vector<32x32xf32>
    %cst_58 = arith.constant dense<0.000000e+00> : vector<16x32xf32>
    %85 = tpu.matmul %81, %84, %cst_58 {dimension_numbers = #tpu.dot_dimension_numbers<[1], [0], [0], [1], [0, 0, 1, 1], [], []>} : vector<16x32xf32>, vector<32x32xf32>, vector<16x32xf32> -> vector<16x32xf32>
    %86 = vector.extract_strided_slice %27 {offsets = [0, 0], sizes = [64, 16], strides = [1, 1]} : vector<64x32xf32> to vector<64x16xf32>
    %87 = vector.extract_strided_slice %83 {offsets = [0, 0], sizes = [16, 16], strides = [1, 1]} : vector<16x32xf32> to vector<16x16xf32>
    %cst_59 = arith.constant dense<0.000000e+00> : vector<64x16xf32>
    %88 = tpu.matmul %86, %87, %cst_59 {dimension_numbers = #tpu.dot_dimension_numbers<[1], [1], [0], [0], [0, 0, 1, 0], [], []>} : vector<64x16xf32>, vector<16x16xf32>, vector<64x16xf32> -> vector<64x16xf32>
    %cst_60 = arith.constant dense<0xFF800000> : vector<64xf32>
    %89 = vector.multi_reduction <maximumf>, %88, %cst_60 [1] : vector<64x16xf32> to vector<64xf32>
    %90 = vector.shape_cast %89 : vector<64xf32> to vector<64x1xf32>
    %91 = vector.broadcast %90 : vector<64x1xf32> to vector<64x16xf32>
    %92 = arith.subf %88, %91 : vector<64x16xf32>
    %93 = math.exp %92 : vector<64x16xf32>
    %cst_61 = arith.constant dense<0.000000e+00> : vector<64xf32>
    %94 = vector.multi_reduction <add>, %93, %cst_61 [1] : vector<64x16xf32> to vector<64xf32>
    %95 = vector.shape_cast %94 : vector<64xf32> to vector<64x1xf32>
    %96 = tpu.reciprocal %95 : vector<64x1xf32> -> vector<64x1xf32>
    %97 = vector.broadcast %96 : vector<64x1xf32> to vector<64x16xf32>
    %98 = arith.mulf %93, %97 : vector<64x16xf32>
    %99 = vector.extract_strided_slice %85 {offsets = [0, 0], sizes = [16, 16], strides = [1, 1]} : vector<16x32xf32> to vector<16x16xf32>
    %cst_62 = arith.constant dense<0.000000e+00> : vector<64x16xf32>
    %100 = tpu.matmul %98, %99, %cst_62 {dimension_numbers = #tpu.dot_dimension_numbers<[1], [0], [0], [1], [0, 0, 1, 1], [], []>} : vector<64x16xf32>, vector<16x16xf32>, vector<64x16xf32> -> vector<64x16xf32>
    %101 = vector.extract_strided_slice %27 {offsets = [0, 16], sizes = [64, 16], strides = [1, 1]} : vector<64x32xf32> to vector<64x16xf32>
    %102 = vector.extract_strided_slice %83 {offsets = [0, 16], sizes = [16, 16], strides = [1, 1]} : vector<16x32xf32> to vector<16x16xf32>
    %cst_63 = arith.constant dense<0.000000e+00> : vector<64x16xf32>
    %103 = tpu.matmul %101, %102, %cst_63 {dimension_numbers = #tpu.dot_dimension_numbers<[1], [1], [0], [0], [0, 0, 1, 0], [], []>} : vector<64x16xf32>, vector<16x16xf32>, vector<64x16xf32> -> vector<64x16xf32>
    %cst_64 = arith.constant dense<0xFF800000> : vector<64xf32>
    %104 = vector.multi_reduction <maximumf>, %103, %cst_64 [1] : vector<64x16xf32> to vector<64xf32>
    %105 = vector.shape_cast %104 : vector<64xf32> to vector<64x1xf32>
    %106 = vector.broadcast %105 : vector<64x1xf32> to vector<64x16xf32>
    %107 = arith.subf %103, %106 : vector<64x16xf32>
    %108 = math.exp %107 : vector<64x16xf32>
    %cst_65 = arith.constant dense<0.000000e+00> : vector<64xf32>
    %109 = vector.multi_reduction <add>, %108, %cst_65 [1] : vector<64x16xf32> to vector<64xf32>
    %110 = vector.shape_cast %109 : vector<64xf32> to vector<64x1xf32>
    %111 = tpu.reciprocal %110 : vector<64x1xf32> -> vector<64x1xf32>
    %112 = vector.broadcast %111 : vector<64x1xf32> to vector<64x16xf32>
    %113 = arith.mulf %108, %112 : vector<64x16xf32>
    %114 = vector.extract_strided_slice %85 {offsets = [0, 16], sizes = [16, 16], strides = [1, 1]} : vector<16x32xf32> to vector<16x16xf32>
    %cst_66 = arith.constant dense<0.000000e+00> : vector<64x16xf32>
    %115 = tpu.matmul %113, %114, %cst_66 {dimension_numbers = #tpu.dot_dimension_numbers<[1], [0], [0], [1], [0, 0, 1, 1], [], []>} : vector<64x16xf32>, vector<16x16xf32>, vector<64x16xf32> -> vector<64x16xf32>
    %116 = tpu.concatenate %100, %115 in 1 : vector<64x16xf32>, vector<64x16xf32> -> vector<64x32xf32>
    %c0_67 = arith.constant 0 : index
    %c0_68 = arith.constant 0 : index
    %117 = vector.load %arg12[%c0_67, %c0_68] : memref<32x32xf32, #tpu.memory_space<vmem>>, vector<32x32xf32>
    %cst_69 = arith.constant dense<0.000000e+00> : vector<64x32xf32>
    %118 = tpu.matmul %116, %117, %cst_69 {dimension_numbers = #tpu.dot_dimension_numbers<[1], [0], [0], [1], [0, 0, 1, 1], [], []>} : vector<64x32xf32>, vector<32x32xf32>, vector<64x32xf32> -> vector<64x32xf32>
    %c0_70 = arith.constant 0 : index
    %c0_71 = arith.constant 0 : index
    %119 = vector.load %arg13[%c0_70, %c0_71] : memref<1x32xf32, #tpu.memory_space<vmem>>, vector<1x32xf32>
    %120 = vector.broadcast %119 : vector<1x32xf32> to vector<64x32xf32>
    %121 = arith.addf %118, %120 : vector<64x32xf32>
    %122 = arith.addf %1, %121 : vector<64x32xf32>
    %cst_72 = arith.constant dense<0.000000e+00> : vector<64xf32>
    %123 = vector.multi_reduction <add>, %122, %cst_72 [1] : vector<64x32xf32> to vector<64xf32>
    %124 = vector.shape_cast %123 : vector<64xf32> to vector<64x1xf32>
    %cst_73 = arith.constant 3.200000e+01 : f32
    %125 = vector.broadcast %cst_73 : f32 to vector<64x1xf32>
    %126 = arith.divf %124, %125 : vector<64x1xf32>
    %127 = vector.broadcast %126 : vector<64x1xf32> to vector<64x32xf32>
    %128 = arith.subf %122, %127 : vector<64x32xf32>
    %129 = arith.mulf %128, %128 : vector<64x32xf32>
    %cst_74 = arith.constant dense<0.000000e+00> : vector<64xf32>
    %130 = vector.multi_reduction <add>, %129, %cst_74 [1] : vector<64x32xf32> to vector<64xf32>
    %131 = vector.shape_cast %130 : vector<64xf32> to vector<64x1xf32>
    %cst_75 = arith.constant 3.200000e+01 : f32
    %132 = vector.broadcast %cst_75 : f32 to vector<64x1xf32>
    %133 = arith.divf %131, %132 : vector<64x1xf32>
    %134 = vector.broadcast %126 : vector<64x1xf32> to vector<64x32xf32>
    %135 = arith.subf %122, %134 : vector<64x32xf32>
    %cst_76 = arith.constant 9.99999974E-6 : f32
    %136 = vector.broadcast %cst_76 : f32 to vector<64x1xf32>
    %137 = arith.addf %133, %136 : vector<64x1xf32>
    %138 = math.rsqrt %137 : vector<64x1xf32>
    %139 = vector.broadcast %138 : vector<64x1xf32> to vector<64x32xf32>
    %140 = arith.mulf %135, %139 : vector<64x32xf32>
    %141 = vector.broadcast %2 : vector<1x32xf32> to vector<64x32xf32>
    %142 = arith.mulf %140, %141 : vector<64x32xf32>
    %143 = vector.broadcast %3 : vector<1x32xf32> to vector<64x32xf32>
    %144 = arith.addf %142, %143 : vector<64x32xf32>
    %c0_77 = arith.constant 0 : index
    %c0_78 = arith.constant 0 : index
    %145 = vector.load %arg14[%c0_77, %c0_78] : memref<32x128xf32, #tpu.memory_space<vmem>>, vector<32x128xf32>
    %cst_79 = arith.constant dense<0.000000e+00> : vector<64x128xf32>
    %146 = tpu.matmul %144, %145, %cst_79 {dimension_numbers = #tpu.dot_dimension_numbers<[1], [0], [0], [1], [0, 0, 1, 1], [], []>} : vector<64x32xf32>, vector<32x128xf32>, vector<64x128xf32> -> vector<64x128xf32>
    %c0_80 = arith.constant 0 : index
    %c0_81 = arith.constant 0 : index
    %147 = vector.load %arg15[%c0_80, %c0_81] : memref<1x128xf32, #tpu.memory_space<vmem>>, vector<1x128xf32>
    %148 = vector.broadcast %147 : vector<1x128xf32> to vector<64x128xf32>
    %149 = arith.addf %146, %148 : vector<64x128xf32>
    %cst_82 = arith.constant 0.707106769 : f32
    %150 = vector.broadcast %cst_82 : f32 to vector<64x128xf32>
    %151 = arith.mulf %149, %150 : vector<64x128xf32>
    %152 = math.absf %151 : vector<64x128xf32>
    %cst_83 = arith.constant 0.000000e+00 : f32
    %153 = vector.broadcast %cst_83 : f32 to vector<64x128xf32>
    %154 = arith.cmpf oge, %151, %153 : vector<64x128xf32>
    %cst_84 = arith.constant 1.000000e+00 : f32
    %cst_85 = arith.constant -1.000000e+00 : f32
    %155 = vector.broadcast %cst_84 : f32 to vector<64x128xf32>
    %156 = vector.broadcast %cst_85 : f32 to vector<64x128xf32>
    %157 = arith.select %154, %155, %156 : vector<64x128xi1>, vector<64x128xf32>
    %cst_86 = arith.constant 0.327591091 : f32
    %158 = vector.broadcast %cst_86 : f32 to vector<64x128xf32>
    %159 = arith.mulf %158, %152 : vector<64x128xf32>
    %cst_87 = arith.constant 1.000000e+00 : f32
    %160 = vector.broadcast %cst_87 : f32 to vector<64x128xf32>
    %161 = arith.addf %160, %159 : vector<64x128xf32>
    %cst_88 = arith.constant 1.000000e+00 : f32
    %162 = vector.broadcast %cst_88 : f32 to vector<64x128xf32>
    %163 = arith.divf %162, %161 : vector<64x128xf32>
    %cst_89 = arith.constant 1.06140542 : f32
    %164 = vector.broadcast %cst_89 : f32 to vector<64x128xf32>
    %165 = arith.mulf %164, %163 : vector<64x128xf32>
    %cst_90 = arith.constant -1.45315206 : f32
    %166 = vector.broadcast %cst_90 : f32 to vector<64x128xf32>
    %167 = arith.addf %165, %166 : vector<64x128xf32>
    %168 = arith.mulf %167, %163 : vector<64x128xf32>
    %cst_91 = arith.constant 1.42141378 : f32
    %169 = vector.broadcast %cst_91 : f32 to vector<64x128xf32>
    %170 = arith.addf %168, %169 : vector<64x128xf32>
    %171 = arith.mulf %170, %163 : vector<64x128xf32>
    %cst_92 = arith.constant -0.284496725 : f32
    %172 = vector.broadcast %cst_92 : f32 to vector<64x128xf32>
    %173 = arith.addf %171, %172 : vector<64x128xf32>
    %174 = arith.mulf %173, %163 : vector<64x128xf32>
    %cst_93 = arith.constant 0.254829586 : f32
    %175 = vector.broadcast %cst_93 : f32 to vector<64x128xf32>
    %176 = arith.addf %174, %175 : vector<64x128xf32>
    %177 = arith.mulf %176, %163 : vector<64x128xf32>
    %cst_94 = arith.constant 0.000000e+00 : f32
    %178 = vector.broadcast %cst_94 : f32 to vector<64x128xf32>
    %179 = arith.subf %178, %152 : vector<64x128xf32>
    %180 = arith.mulf %179, %152 : vector<64x128xf32>
    %181 = math.exp %180 : vector<64x128xf32>
    %182 = arith.mulf %177, %181 : vector<64x128xf32>
    %cst_95 = arith.constant 1.000000e+00 : f32
    %183 = vector.broadcast %cst_95 : f32 to vector<64x128xf32>
    %184 = arith.subf %183, %182 : vector<64x128xf32>
    %185 = arith.mulf %157, %184 : vector<64x128xf32>
    %cst_96 = arith.constant 5.000000e-01 : f32
    %186 = vector.broadcast %cst_96 : f32 to vector<64x128xf32>
    %187 = arith.mulf %186, %149 : vector<64x128xf32>
    %cst_97 = arith.constant 1.000000e+00 : f32
    %188 = vector.broadcast %cst_97 : f32 to vector<64x128xf32>
    %189 = arith.addf %188, %185 : vector<64x128xf32>
    %190 = arith.mulf %187, %189 : vector<64x128xf32>
    %c0_98 = arith.constant 0 : index
    %c0_99 = arith.constant 0 : index
    %191 = vector.load %arg16[%c0_98, %c0_99] : memref<128x32xf32, #tpu.memory_space<vmem>>, vector<128x32xf32>
    %cst_100 = arith.constant dense<0.000000e+00> : vector<64x32xf32>
    %192 = tpu.matmul %190, %191, %cst_100 {dimension_numbers = #tpu.dot_dimension_numbers<[1], [0], [0], [1], [0, 0, 1, 1], [], []>} : vector<64x128xf32>, vector<128x32xf32>, vector<64x32xf32> -> vector<64x32xf32>
    %c0_101 = arith.constant 0 : index
    %c0_102 = arith.constant 0 : index
    %193 = vector.load %arg17[%c0_101, %c0_102] : memref<1x32xf32, #tpu.memory_space<vmem>>, vector<1x32xf32>
    %194 = vector.broadcast %193 : vector<1x32xf32> to vector<64x32xf32>
    %195 = arith.addf %192, %194 : vector<64x32xf32>
    %196 = arith.addf %122, %195 : vector<64x32xf32>
    %c0_103 = arith.constant 0 : index
    %c0_104 = arith.constant 0 : index
    %c0_105 = arith.constant 0 : index
    %197 = vector.load %arg18[%c0_103, %c0_104, %c0_105] : memref<1x64x32xf32, #tpu.memory_space<vmem>>, vector<1x64x32xf32>
    %198 = vector.shape_cast %197 : vector<1x64x32xf32> to vector<64x32xf32>
    %199 = vector.shape_cast %196 : vector<64x32xf32> to vector<1x64x32xf32>
    tpu.vector_store %arg18[%c0_103, %c0_104, %c0_105], %199 {strides = array<i32>} : memref<1x64x32xf32, #tpu.memory_space<vmem>>, vector<1x64x32xf32>,
    return
  }
  func.func @transform_0(%arg0: i32) -> (i32, i32, i32) {
    %c0_i32 = arith.constant 0 : i32
    %c0_i32_0 = arith.constant 0 : i32
    %c0_i32_1 = arith.constant 0 : i32
    return %arg0, %c0_i32, %c0_i32_0 : i32, i32, i32
  }
  func.func @transform_1(%arg0: i32) -> (i32, i32) {
    %c0_i32 = arith.constant 0 : i32
    %c0_i32_0 = arith.constant 0 : i32
    %c0_i32_1 = arith.constant 0 : i32
    return %c0_i32, %c0_i32_0 : i32, i32
  }
  func.func @transform_2(%arg0: i32) -> (i32, i32) {
    %c0_i32 = arith.constant 0 : i32
    %c0_i32_0 = arith.constant 0 : i32
    %c0_i32_1 = arith.constant 0 : i32
    return %c0_i32, %c0_i32_0 : i32, i32
  }
  func.func @transform_3(%arg0: i32) -> (i32, i32) {
    %c0_i32 = arith.constant 0 : i32
    %c0_i32_0 = arith.constant 0 : i32
    %c0_i32_1 = arith.constant 0 : i32
    return %c0_i32, %c0_i32_0 : i32, i32
  }
  func.func @transform_4(%arg0: i32) -> (i32, i32, i32) {
    %c0_i32 = arith.constant 0 : i32
    %c0_i32_0 = arith.constant 0 : i32
    %c0_i32_1 = arith.constant 0 : i32
    %c0_i32_2 = arith.constant 0 : i32
    return %c0_i32, %c0_i32_0, %c0_i32_1 : i32, i32, i32
  }
  func.func @transform_5(%arg0: i32) -> (i32, i32, i32) {
    %c0_i32 = arith.constant 0 : i32
    %c0_i32_0 = arith.constant 0 : i32
    %c0_i32_1 = arith.constant 0 : i32
    %c0_i32_2 = arith.constant 0 : i32
    return %c0_i32, %c0_i32_0, %c0_i32_1 : i32, i32, i32
  }
  func.func @transform_6(%arg0: i32) -> (i32, i32) {
    %c0_i32 = arith.constant 0 : i32
    %c0_i32_0 = arith.constant 0 : i32
    %c0_i32_1 = arith.constant 0 : i32
    return %c0_i32, %c0_i32_0 : i32, i32
  }
  func.func @transform_7(%arg0: i32) -> (i32, i32) {
    %c0_i32 = arith.constant 0 : i32
    %c0_i32_0 = arith.constant 0 : i32
    %c0_i32_1 = arith.constant 0 : i32
    return %c0_i32, %c0_i32_0 : i32, i32
  }
  func.func @transform_8(%arg0: i32) -> (i32, i32) {
    %c0_i32 = arith.constant 0 : i32
    %c0_i32_0 = arith.constant 0 : i32
    %c0_i32_1 = arith.constant 0 : i32
    return %c0_i32, %c0_i32_0 : i32, i32
  }
  func.func @transform_9(%arg0: i32) -> (i32, i32) {
    %c0_i32 = arith.constant 0 : i32
    %c0_i32_0 = arith.constant 0 : i32
    %c0_i32_1 = arith.constant 0 : i32
    return %c0_i32, %c0_i32_0 : i32, i32
  }
  func.func @transform_10(%arg0: i32) -> (i32, i32) {
    %c0_i32 = arith.constant 0 : i32
    %c0_i32_0 = arith.constant 0 : i32
    %c0_i32_1 = arith.constant 0 : i32
    return %c0_i32, %c0_i32_0 : i32, i32
  }
  func.func @transform_11(%arg0: i32) -> (i32, i32) {
    %c0_i32 = arith.constant 0 : i32
    %c0_i32_0 = arith.constant 0 : i32
    %c0_i32_1 = arith.constant 0 : i32
    return %c0_i32, %c0_i32_0 : i32, i32
  }
  func.func @transform_12(%arg0: i32) -> (i32, i32) {
    %c0_i32 = arith.constant 0 : i32
    %c0_i32_0 = arith.constant 0 : i32
    %c0_i32_1 = arith.constant 0 : i32
    return %c0_i32, %c0_i32_0 : i32, i32
  }
  func.func @transform_13(%arg0: i32) -> (i32, i32) {
    %c0_i32 = arith.constant 0 : i32
    %c0_i32_0 = arith.constant 0 : i32
    %c0_i32_1 = arith.constant 0 : i32
    return %c0_i32, %c0_i32_0 : i32, i32
  }
  func.func @transform_14(%arg0: i32) -> (i32, i32) {
    %c0_i32 = arith.constant 0 : i32
    %c0_i32_0 = arith.constant 0 : i32
    %c0_i32_1 = arith.constant 0 : i32
    return %c0_i32, %c0_i32_0 : i32, i32
  }
  func.func @transform_15(%arg0: i32) -> (i32, i32) {
    %c0_i32 = arith.constant 0 : i32
    %c0_i32_0 = arith.constant 0 : i32
    %c0_i32_1 = arith.constant 0 : i32
    return %c0_i32, %c0_i32_0 : i32, i32
  }
  func.func @transform_16(%arg0: i32) -> (i32, i32) {
    %c0_i32 = arith.constant 0 : i32
    %c0_i32_0 = arith.constant 0 : i32
    %c0_i32_1 = arith.constant 0 : i32
    return %c0_i32, %c0_i32_0 : i32, i32
  }
  func.func @transform_17(%arg0: i32) -> (i32, i32, i32) {
    %c0_i32 = arith.constant 0 : i32
    %c0_i32_0 = arith.constant 0 : i32
    %c0_i32_1 = arith.constant 0 : i32
    return %arg0, %c0_i32, %c0_i32_0 : i32, i32, i32
  }
}

</mosaic_0001>

<bundles_post_ra>
// kernel: tpu_custom_call.1
= control target key start
LH: loop header
LB: loop body
LE: loop exit
PB: predicated region body
PF: predicated region fallthrough
CT: control target
= control target key end

     0   :  { %s4576_s0 = inlined_call_operand.vmem [shape: f32[2,64,32], index: 0, kind: input, shape index: {}]   ;;  %s4577_s1 = inlined_call_operand.hbm [shape: f32[1,32], index: 1, kind: input, shape index: {}]   ;;  %s4578_s2 = inlined_call_operand.hbm [shape: f32[1,32], index: 2, kind: input, shape index: {}]   ;;  %s4579_s3 = inlined_call_operand.vmem [shape: f32[32,32], index: 3, kind: input, shape index: {}]   ;;  %s4580_s4 = inlined_call_operand.vmem [shape: f32[4,16,64], index: 4, kind: input, shape index: {}]   ;;  %s4581_s5 = inlined_call_operand.vmem [shape: f32[4,32,32], index: 5, kind: input, shape index: {}]   ;;  %s4582_s6 = inlined_call_operand.vmem [shape: f32[1,32], index: 6, kind: input, shape index: {}]   ;;  %s4583_s7 = inlined_call_operand.vmem [shape: f32[1,32], index: 7, kind: input, shape index: {}]   ;;  %s4584_s8 = inlined_call_operand.vmem [shape: f32[1,32], index: 8, kind: input, shape index: {}]   ;;  %s4585_s9 = inlined_call_operand.vmem [shape: f32[32,32], index: 9, kind: input, shape index: {}]   ;;  %s4586_s10 = inlined_call_operand.vmem [shape: f32[32,32], index: 10, kind: input, shape index: {}]   ;;  %s4587_s11 = inlined_call_operand.vmem [shape: f32[32,32], index: 11, kind: input, shape index: {}]   ;;  %s4588_s12 = inlined_call_operand.vmem [shape: f32[1,32], index: 12, kind: input, shape index: {}]   ;;  %s4589_s13 = inlined_call_operand.hbm [shape: f32[32,128], index: 13, kind: input, shape index: {}]   ;;  %s4590_s14 = inlined_call_operand.vmem [shape: f32[1,128], index: 14, kind: input, shape index: {}]   ;;  %s4591_s15 = inlined_call_operand.vmem [shape: f32[128,32], index: 15, kind: input, shape index: {}]   ;;  %s4592_s16 = inlined_call_operand.vmem [shape: f32[1,32], index: 16, kind: input, shape index: {}]   ;;  %s4593_s17 = inlined_call_operand.vmem [shape: f32[2,64,32], index: 17, kind: output, shape index: {}]  }
   0x1   :  { %4594 = sst [smem:[#allocation9_spill]] %s4576_s0 }
   0x2   :  { %4595 = sst [smem:[#allocation10_spill]] %s4577_s1 }
   0x3   :  { %4596 = sst [smem:[#allocation11_spill]] %s4578_s2 }
   0x4   :  { %22 = vsyncpa [#allocation3], 0 }
   0x5   :  { %23 = vsyncpa [#allocation5], 0  ;;  %s3347_s24 = smov 0  }
   0x6 LB: > { %s4597_s2 = sld [smem:[#allocation11_spill]]  ;;  %s3356_s28 = sadd.s32 4294967295, %s3246_s24   ;;  %s3246_s24 = sphi %s3347_s24, %s29_s24  }
   0x7   : > { %p2815_p0 = scmp.ge.s32.totalorder %s3246_s24, 1  ;;  %p422_p1 = scmp.lt.s32.totalorder %s3246_s24, 3 }
   0x8   : > { %p2962_p2 = scmp.eq.s32.totalorder %s3356_s28, 0  ;;  %s3248_s0 = smov [#allocation4]  }
   0x9   : > { %p3361_p3 = pnand %p2815_p0, %p422_p1  ;;  %s448_s30 = sshll.u32 %s3248_s0, 4  ;;  %s449_s30 = int_to_ptr.vmem [resolvable:$true] %s448_s30 }
   0xa   : > { %s4599_s1 = sld [smem:[#allocation10_spill]]  ;;  %s487_s23 = sshll.u32 %s4589_s13, 4  ;;  %s488_s23 = int_to_ptr.hbm [resolvable:$true] %s487_s23 }
   0xb   : > { %p2952_p4 = pneg %p3361_p3  ;;  %s3249_s25 = smov [#allocation2]  }
   0xc   : > { %s446_s27 = sshll.u32 %s4597_s2, 4  ;;  %s436_s26 = sshll.u32 %s3249_s25, 4  ;;  %s447_s27 = int_to_ptr.hbm [resolvable:$true] %s446_s27  ;;  %s437_s26 = int_to_ptr.vmem [resolvable:$true] %s436_s26 }
   0xd   : > { %p2953_p5 = pnand %p2962_p2, %p2952_p4  ;;  %s3250_s0 = smov [#allocation6]  }
   0xe   : > { %s489_s2 = sshll.u32 %s3250_s0, 4  ;;  %s3251_s18 = smov 128   ;;  %s490_s2 = int_to_ptr.vmem [resolvable:$true] %s489_s2 }
   0xf   : > { %2958 = dma.hbm_to_vmem [thread:$0]  (!%p2953_p5), %s447_s27, 16, %s449_s30, [#allocation5]  }
  0x10   : > { %s434_s20 = sshll.u32 %s4599_s1, 4  ;;  %s3252_s19 = smov 8   ;;  %s435_s20 = int_to_ptr.hbm [resolvable:$true] %s434_s20 }
  0x11   : > { %2955 = dma.hbm_to_vmem [thread:$0]  (!%p2953_p5), %s435_s20, 16, %s437_s26, [#allocation3]  }
  0x12   : > { %2961 = dma.hbm_to_vmem [thread:$0]  (!%p2953_p5), %s488_s23, 512, %s490_s2, [#allocation5], %s3251_s18, %s3251_s18, %s3252_s19  }
  0x13   : > { %522 = sbr.rel (%p3361_p3) target bundleno = 2789 (0xae5), region = 88 }
  0x18   : > { %3237 = dma.done.wait (%p2962_p2), [#allocation3], 16  }
  0x19   : > { %3239 = vsyncadd (%p2962_p2), [#allocation3], 4294967280 }
  0x1a   : > { %3241 = dma.done.wait (%p2962_p2), [#allocation5], 528  }
  0x1b   : > { %3243 = vsyncadd (%p2962_p2), [#allocation5], 4294966768  ;;  %p585_p6 = scmp.lt.s32.totalorder %s3356_s28, 1  ;;  %s4600_s30 = sld [smem:[#allocation9_spill]]  ;;  %vm605_vm0 = vcmask 261120   ;;  %v3253_v16 = vmov 32.0  }
  0x1c   : > { %2998 = vrcp.f32 %v3253_v16  ;;  %v814_v63 = vld [vmem:[%s4579_s3 + $0x18] sm:$0xff]  ;;  %s3254_s29 = smov 112  }
  0x1d   : > { %s4612_s28 = smov (!%p585_p6, %s3356_s28), 1  ;;  %851 = vmatpush.msra.mxu0 %v814_v63 }
  0x1e   : > { %s2928_s2 = sshll.u32 %s4612_s28, 6 }
  0x1f   : > { %s4547_s0 = scalar_lea.vmem %s4593_s17, %s2928_s2 }
  0x21   : > { %s3395_s1 = scalar_lea.vmem %s4600_s30, %s2928_s2 }
  0x22   : > { %v602_v0 = vld [vmem:[%s3395_s1 + $0x38] sm:$0xff]  ;;  %v597_v1 = vld [vmem:[%s3395_s1 + $0x10] sm:$0xff]  ;;  %v595_v2 = vld [vmem:[%s3395_s1] sm:$0xff]  ;;  %v2999_v17 = vpop.eup %2998 }
  0x23   : > { %v627_v3 = vsel %vm605_vm0, %v602_v0, 0.0  ;;  %v612_v4 = vsel %vm605_vm0, %v597_v1, 0.0  ;;  %v606_v5 = vsel %vm605_vm0, %v595_v2, 0.0  ;;  %v601_v6 = vld [vmem:[%s3395_s1 + $0x30] sm:$0xff]  ;;  %v598_v7 = vld [vmem:[%s3395_s1 + $0x18] sm:$0xff]  ;;  %v596_v8 = vld [vmem:[%s3395_s1 + $0x8] sm:$0xff]  ;;  %vm635_vm1 = vweird.f32 %v2999_v17 }
  0x24   : > { %628 = vadd.xlane.f32.xlu2 %v627_v3  ;;  %613 = vadd.xlane.f32.xlu1 %v612_v4  ;;  %v624_v9 = vsel %vm605_vm0, %v601_v6, 0.0  ;;  %v615_v10 = vsel %vm605_vm0, %v598_v7, 0.0  ;;  %v609_v11 = vsel %vm605_vm0, %v596_v8, 0.0  ;;  %v599_v12 = vld [vmem:[%s3395_s1 + $0x20] sm:$0xff]  ;;  %v600_v13 = vld [vmem:[%s3395_s1 + $0x28] sm:$0xff]  ;;  %v631_v18 = vmul.f32 32.0, %v2999_v17 }
  0x25   : > { %607 = vadd.xlane.f32.xlu0 %v606_v5  ;;  %v618_v14 = vsel %vm605_vm0, %v599_v12, 0.0  ;;  %v621_v15 = vsel %vm605_vm0, %v600_v13, 0.0  ;;  %v811_v3 = vld [vmem:[%s4579_s3] sm:$0xff] }
  0x26   : > { %v632_v19 = vsub.f32 1.0, %v631_v18 }
  0x28   : > { %v633_v20 = vmul.f32 %v2999_v17, %v632_v19 }
  0x2a   : > { %v634_v21 = vadd.f32 %v2999_v17, %v633_v20 }
  0x2c   : > { %625 = vadd.xlane.f32.xlu2 %v624_v9  ;;  %616 = vadd.xlane.f32.xlu1 %v615_v10  ;;  %v3413_v22 = vsel %vm635_vm1, %v2999_v17, %v634_v21 }
  0x2d   : > { %610 = vadd.xlane.f32.xlu0 %v609_v11 }
  0x34   : > { %619 = vadd.xlane.f32.xlu1 %v618_v14 }
  0x35   : > { %622 = vadd.xlane.f32.xlu0 %v621_v15 }
  0x97   : > { %v629_v23 = vpop.xlane.xlu2 %628  ;;  %v614_v24 = vpop.xlane.xlu1 %613 }
  0x98   : > { %v639_v25 = vmul.f32 %v3413_v22, %v614_v24  ;;  %v608_v26 = vpop.xlane.xlu0 %607  ;;  %v644_v39 = vmul.f32 %v3413_v22, %v629_v23 }
  0x99   : > { %v637_v27 = vmul.f32 %v3413_v22, %v608_v26 }
  0x9a   : > { %v3417_v28 = vsub.f32 %v597_v1, %v639_v25  ;;  %v3441_v46 = vsub.f32 %v602_v0, %v644_v39  ;;  %v813_v0 = vld [vmem:[%s4579_s3 + $0x10] sm:$0xff]  ;;  %v812_v1 = vld [vmem:[%s4579_s3 + $0x8] sm:$0xff] }
  0x9b   : > { %v3419_v29 = vsub.f32 %v595_v2, %v637_v27  ;;  %852 = vmatpush.msra.mxu0 %v813_v0 }
  0x9c   : > { %v655_v30 = vmul.f32 %v3417_v28, %v3417_v28  ;;  %v660_v55 = vmul.f32 %v3441_v46, %v3441_v46 }
  0x9d   : > { %v653_v31 = vmul.f32 %v3419_v29, %v3419_v29  ;;  %853 = vmatpush.msra.mxu0 %v812_v1 }
  0x9e   : > { %v667_v32 = vsel %vm605_vm0, %v655_v30, 0.0  ;;  %v682_v58 = vsel %vm605_vm0, %v660_v55, 0.0 }
  0x9f   : > { %v626_v33 = vpop.xlane.xlu2 %625  ;;  %668 = vadd.xlane.f32.xlu1 %v667_v32  ;;  %v617_v34 = vpop.xlane.xlu1 %616  ;;  %v661_v35 = vsel %vm605_vm0, %v653_v31, 0.0  ;;  %854 = vmatpush.msra.mxu0 %v811_v3 }
  0xa0   : > { %v643_v36 = vmul.f32 %v3413_v22, %v626_v33  ;;  %v640_v37 = vmul.f32 %v3413_v22, %v617_v34  ;;  %662 = vadd.xlane.f32.xlu2 %v661_v35  ;;  %v611_v38 = vpop.xlane.xlu0 %610 }
  0xa1   : > { %v638_v40 = vmul.f32 %v3413_v22, %v611_v38 }
  0xa2   : > { %v3431_v41 = vsub.f32 %v601_v6, %v643_v36  ;;  %v3433_v42 = vsub.f32 %v598_v7, %v640_v37 }
  0xa3   : > { %v3435_v43 = vsub.f32 %v596_v8, %v638_v40 }
  0xa4   : > { %v659_v44 = vmul.f32 %v3431_v41, %v3431_v41  ;;  %v656_v45 = vmul.f32 %v3433_v42, %v3433_v42 }
  0xa5   : > { %v654_v47 = vmul.f32 %v3435_v43, %v3435_v43 }
  0xa6   : > { %v679_v48 = vsel %vm605_vm0, %v659_v44, 0.0  ;;  %v670_v49 = vsel %vm605_vm0, %v656_v45, 0.0  ;;  %v3508_v45 = vld [vmem:[#allocation2] ss:$0 sm:$0xff] }
  0xa7   : > { %680 = vadd.xlane.f32.xlu1 %v679_v48  ;;  %v664_v50 = vsel %vm605_vm0, %v654_v47, 0.0  ;;  %v620_v51 = vpop.xlane.xlu1 %619 }
  0xa8   : > { %671 = vadd.xlane.f32.xlu2 %v670_v49  ;;  %665 = vadd.xlane.f32.xlu0 %v664_v50  ;;  %v623_v52 = vpop.xlane.xlu0 %622  ;;  %v641_v54 = vmul.f32 %v3413_v22, %v620_v51  ;;  %v3512_v50 = vld [vmem:[#allocation4] ss:$0 sm:$0xff] }
  0xa9   : > { %v642_v53 = vmul.f32 %v3413_v22, %v623_v52 }
  0xaa   : > { %v3454_v57 = vsub.f32 %v599_v12, %v641_v54 }
  0xab   : > { %v3452_v56 = vsub.f32 %v600_v13, %v642_v53 }
  0xac   : > { %v657_v61 = vmul.f32 %v3454_v57, %v3454_v57 }
  0xad   : > { %v658_v59 = vmul.f32 %v3452_v56, %v3452_v56 }
  0xae   : > { %v673_v62 = vsel %vm605_vm0, %v657_v61, 0.0 }
  0xaf   : > { %v676_v60 = vsel %vm605_vm0, %v658_v59, 0.0 }
  0xb0   : > { %683 = vadd.xlane.f32.xlu0 %v682_v58  ;;  %677 = vadd.xlane.f32.xlu2 %v676_v60 }
  0xb8   : > { %674 = vadd.xlane.f32.xlu0 %v673_v62 }
 0x112   : > { %v669_v2 = vpop.xlane.xlu1 %668 }
 0x113   : > { %v687_v4 = vmul.f32 %v669_v2, %v3413_v22  ;;  %v663_v5 = vpop.xlane.xlu2 %662 }
 0x114   : > { %v685_v6 = vmul.f32 %v663_v5, %v3413_v22 }
 0x115   : > { %v3477_v7 = vadd.f32 1e-05, %v687_v4 }
 0x116   : > { %v693_v8 = vadd.f32 1e-05, %v685_v6 }
 0x117   : > { %3000 = vrsqrt.f32 %v3477_v7  ;;  %vm727_vm5 = vweird.f32 %v3477_v7 }
 0x118   : > { %3002 = vrsqrt.f32 %v693_v8  ;;  %vm707_vm3 = vweird.f32 %v693_v8 }
 0x11a   : > { %v681_v9 = vpop.xlane.xlu1 %680 }
 0x11b   : > { %v691_v10 = vmul.f32 %v681_v9, %v3413_v22  ;;  %v672_v11 = vpop.xlane.xlu2 %671  ;;  %v666_v12 = vpop.xlane.xlu0 %665 }
 0x11c   : > { %v688_v13 = vmul.f32 %v672_v11, %v3413_v22  ;;  %v686_v14 = vmul.f32 %v666_v12, %v3413_v22 }
 0x11d   : > { %v3483_v15 = vpop.eup %3000  ;;  %v3485_v16 = vadd.f32 1e-05, %v691_v10 }
 0x11e   : > { %v3003_v17 = vpop.eup %3002  ;;  %v3487_v18 = vadd.f32 1e-05, %v688_v13  ;;  %v694_v19 = vadd.f32 1e-05, %v686_v14  ;;  %v722_v20 = vmul.f32 %v3483_v15, %v3477_v7  ;;  %vm728_vm6 = vweird.f32 %v3483_v15 }
 0x11f   : > { %v702_v21 = vmul.f32 %v3003_v17, %v693_v8  ;;  %3004 = vrsqrt.f32 %v3485_v16  ;;  %vm708_vm2 = vweird.f32 %v3003_v17  ;;  %vm3527_vm8 = vmor %vm727_vm5, %vm728_vm6  ;;  %vm767_vm10 = vweird.f32 %v3485_v16 }
 0x120   : > { %3006 = vrsqrt.f32 %v3487_v18  ;;  %v723_v24 = vmul.f32 %v3483_v15, %v722_v20  ;;  %vm709_vm4 = vmor %vm707_vm3, %vm708_vm2  ;;  %vm717_vm9 = vweird.f32 %v694_v19  ;;  %vm737_vm1 = vweird.f32 %v3487_v18 }
 0x121   : > { %v703_v23 = vmul.f32 %v3003_v17, %v702_v21  ;;  %3008 = vrsqrt.f32 %v694_v19 }
 0x122   : > { %v724_v38 = vmul.f32 0.5, %v723_v24 }
 0x123   : > { %v704_v25 = vmul.f32 0.5, %v703_v23  ;;  %v678_v26 = vpop.xlane.xlu2 %677  ;;  %v684_v27 = vpop.xlane.xlu0 %683 }
 0x124   : > { %v690_v30 = vmul.f32 %v678_v26, %v3413_v22  ;;  %v692_v31 = vmul.f32 %v684_v27, %v3413_v22  ;;  %v725_v53 = vsub.f32 1.5, %v724_v38 }
 0x125   : > { %v3496_v32 = vpop.eup %3004  ;;  %v705_v33 = vsub.f32 1.5, %v704_v25 }
 0x126   : > { %v3498_v34 = vpop.eup %3006  ;;  %v762_v35 = vmul.f32 %v3496_v32, %v3485_v16  ;;  %v3502_v36 = vadd.f32 1e-05, %v690_v30  ;;  %v3506_v44 = vadd.f32 1e-05, %v692_v31  ;;  %v726_v1 = vmul.f32 %v3483_v15, %v725_v53 }
 0x127   : > { %v3009_v37 = vpop.eup %3008  ;;  %v706_v39 = vmul.f32 %v3003_v17, %v705_v33  ;;  %v732_v40 = vmul.f32 %v3498_v34, %v3487_v18  ;;  %vm768_vm11 = vweird.f32 %v3496_v32  ;;  %vm738_vm2 = vweird.f32 %v3498_v34 }
 0x128   : > { %v763_v47 = vmul.f32 %v3496_v32, %v762_v35  ;;  %v712_v48 = vmul.f32 %v3009_v37, %v694_v19  ;;  %3010 = vrsqrt.f32 %v3502_v36  ;;  %vm718_vm7 = vweird.f32 %v3009_v37  ;;  %vm3543_vm13 = vmor %vm767_vm10, %vm768_vm11 }
 0x129   : > { %v710_v49 = vsel %vm709_vm4, %v3003_v17, %v706_v39  ;;  %v733_v55 = vmul.f32 %v3498_v34, %v732_v40  ;;  %3012 = vrsqrt.f32 %v3506_v44  ;;  %vm719_vm12 = vmor %vm717_vm9, %vm718_vm7  ;;  %v730_v11 = vsel %vm3527_vm8, %v3483_v15, %v726_v1  ;;  %v2845_v1 = vld [vmem:[%s4581_s5 + $0x38] sm:$0xff] }
 0x12a   : > { %v781_v51 = vmul.f32 %v710_v49, %v3419_v29  ;;  %v713_v52 = vmul.f32 %v3009_v37, %v712_v48  ;;  %v764_v54 = vmul.f32 0.5, %v763_v47  ;;  %vm757_vm14 = vweird.f32 %v3502_v36  ;;  %vm3564_vm5 = vmor %vm737_vm1, %vm738_vm2 }
 0x12b   : > { %v675_v58 = vpop.xlane.xlu0 %674  ;;  %v734_v3 = vmul.f32 0.5, %v733_v55  ;;  %vm777_vm6 = vweird.f32 %v3506_v44  ;;  %vm882_vm11 = vcmask 523264  }
 0x12c   : > { %v792_v59 = vmul.f32 %v3508_v45, %v781_v51  ;;  %v714_v60 = vmul.f32 0.5, %v713_v52  ;;  %v689_v61 = vmul.f32 %v675_v58, %v3413_v22  ;;  %v765_v2 = vsub.f32 1.5, %v764_v54 }
 0x12d   : > { %v735_v13 = vsub.f32 1.5, %v734_v3  ;;  %v2843_v3 = vld [vmem:[%s4581_s5 + $0x28] sm:$0xff] }
 0x12e   : > { %v3522_v62 = vadd.f32 %v3512_v50, %v792_v59  ;;  %v715_v29 = vsub.f32 1.5, %v714_v60  ;;  %v3524_v63 = vadd.f32 1e-05, %v689_v61  ;;  %v3011_v0 = vpop.eup %3010  ;;  %v766_v12 = vmul.f32 %v3496_v32, %v765_v2  ;;  %v2850_v61 = vld [vmem:[%s4580_s4 + $0x20] sm:$0xff]  ;;  %v2844_v2 = vld [vmem:[%s4581_s5 + $0x30] sm:$0xff] }
 0x12f   : > { %v752_v6 = vmul.f32 %v3011_v0, %v3502_v36  ;;  %v3013_v7 = vpop.eup %3012  ;;  %vm758_vm15 = vweird.f32 %v3011_v0  ;;  %v736_v25 = vmul.f32 %v3498_v34, %v735_v13  ;;  %v2857_v13 = vld [vmem:[%s4581_s5 + $0x58] sm:$0xff] }
 0x130   : > { %v716_v5 = vmul.f32 %v3009_v37, %v715_v29  ;;  %2828 = vmatmul.msk.f32.vlgmr.msra.gmra.mxu0 %vm605_vm0, %v3522_v62  ;;  %3014 = vrsqrt.f32 %v3524_v63  ;;  %v772_v10 = vmul.f32 %v3013_v7, %v3506_v44  ;;  %v770_v24 = vsel %vm3543_vm13, %v3496_v32, %v766_v12  ;;  %vm3559_vm3 = vmor %vm757_vm14, %vm758_vm15  ;;  %v2851_v29 = vld [vmem:[%s4580_s4 + $0x28] sm:$0xff] }
 0x131   : > { %v753_v9 = vmul.f32 %v3011_v0, %v752_v6  ;;  %vm778_vm4 = vweird.f32 %v3013_v7  ;;  %v740_v38 = vsel %vm3564_vm5, %v3498_v34, %v736_v25  ;;  %vm747_vm8 = vweird.f32 %v3524_v63  ;;  %v915_v6 = vld [vmem:[%s4581_s5 + $0x18] sm:$0xff] }
 0x132   : > { %v720_v8 = vsel %vm719_vm12, %v3009_v37, %v716_v5  ;;  %v773_v19 = vmul.f32 %v3013_v7, %v772_v10  ;;  %v787_v37 = vmul.f32 %v770_v24, %v3431_v41  ;;  %vm779_vm7 = vmor %vm777_vm6, %vm778_vm4  ;;  %v784_v51 = vmul.f32 %v740_v38, %v3433_v42  ;;  %v2842_v5 = vld [vmem:[%s4581_s5 + $0x20] sm:$0xff] }
 0x133   : > { %v782_v14 = vmul.f32 %v720_v8, %v3435_v43  ;;  %v754_v17 = vmul.f32 0.5, %v753_v9  ;;  %v783_v43 = vmul.f32 %v730_v11, %v3417_v28  ;;  %v913_v8 = vld [vmem:[%s4581_s5 + $0x8] sm:$0xff]  ;;  %v912_v10 = vld [vmem:[%s4581_s5] sm:$0xff] }
 0x134   : > { %v774_v21 = vmul.f32 0.5, %v773_v19  ;;  %v798_v41 = vmul.f32 %v3508_v45, %v787_v37  ;;  %v795_v55 = vmul.f32 %v3508_v45, %v784_v51  ;;  %v2854_v19 = vld [vmem:[%s4581_s5 + $0x40] sm:$0xff] }
 0x135   : > { %v793_v20 = vmul.f32 %v3508_v45, %v782_v14  ;;  %v755_v15 = vsub.f32 1.5, %v754_v17  ;;  %v794_v36 = vmul.f32 %v3508_v45, %v783_v43  ;;  %v2856_v14 = vld [vmem:[%s4581_s5 + $0x50] sm:$0xff]  ;;  %v2855_v17 = vld [vmem:[%s4581_s5 + $0x48] sm:$0xff] }
 0x136   : > { %v3015_v23 = vpop.eup %3014  ;;  %v775_v30 = vsub.f32 1.5, %v774_v21  ;;  %v3594_v54 = vadd.f32 %v3512_v50, %v798_v41 }
 0x137   : > { %v3557_v26 = vadd.f32 %v3512_v50, %v793_v20  ;;  %v756_v18 = vmul.f32 %v3011_v0, %v755_v15  ;;  %v742_v31 = vmul.f32 %v3015_v23, %v3524_v63  ;;  %vm748_vm9 = vweird.f32 %v3015_v23  ;;  %v880_v63 = vld [vmem:[%s4580_s4] sm:$0xff] }
 0x138   : > { %v776_v33 = vmul.f32 %v3013_v7, %v775_v30  ;;  %v3582_v44 = vadd.f32 %v3512_v50, %v794_v36  ;;  %vm749_vm10 = vmor %vm747_vm8, %vm748_vm9  ;;  %v2860_v30 = vld [vmem:[%s4580_s4 + $0x30] sm:$0xff] }
 0x139   : > { %2829 = vmatmul.msk.f32.gmra.mxu0 %vm605_vm0, %v3557_v26  ;;  %v760_v32 = vsel %vm3559_vm3, %v3011_v0, %v756_v18  ;;  %v743_v35 = vmul.f32 %v3015_v23, %v742_v31  ;;  %v881_v0 = vld [vmem:[%s4580_s4 + $0x8] sm:$0xff]  ;;  %v2866_v31 = vld [vmem:[%s4581_s5 + $0x70] sm:$0xff]  ;;  %vm1269_vm3 = vcmask 130048  }
 0x13a   : > { %v780_v39 = vsel %vm779_vm7, %v3013_v7, %v776_v33  ;;  %v786_v47 = vmul.f32 %v760_v32, %v3452_v56  ;;  %v914_v7 = vld [vmem:[%s4581_s5 + $0x10] sm:$0xff]  ;;  %v2865_v32 = vld [vmem:[%s4581_s5 + $0x68] sm:$0xff]  ;;  %v2864_v33 = vld [vmem:[%s4581_s5 + $0x60] sm:$0xff] }
 0x13b   : > { %v744_v40 = vmul.f32 0.5, %v743_v35  ;;  %v788_v48 = vmul.f32 %v780_v39, %v3441_v46 }
 0x13c   : > { %v797_v53 = vmul.f32 %v3508_v45, %v786_v47 }
 0x13d   : > { %v745_v49 = vsub.f32 1.5, %v744_v40  ;;  %v799_v52 = vmul.f32 %v3508_v45, %v788_v48 }
 0x13e   : > { %v3603_v58 = vadd.f32 %v3512_v50, %v797_v53 }
 0x13f   : > { %v746_v34 = vmul.f32 %v3015_v23, %v745_v49  ;;  %v3589_v56 = vadd.f32 %v3512_v50, %v799_v52 }
 0x141   : > { %2830 = vmatmul.msk.f32.gmra.mxu0 %vm605_vm0, %v3582_v44  ;;  %v750_v46 = vsel %vm749_vm10, %v3015_v23, %v746_v34  ;;  %933 = vmatpush.msra.mxu2 %v3589_v56 }
 0x142   : > { %v785_v42 = vmul.f32 %v750_v46, %v3454_v57  ;;  %897 = vmatpush.msrb.mxu0 %v3589_v56  ;;  %2930 = vmatpush.msra.mxu3 %v3589_v56  ;;  %v3611_v57 = vadd.f32 %v3512_v50, %v795_v55 }
 0x143   : > { %1028 = vmatpush.msra.mxu1 %v3589_v56  ;;  %934 = vmatpush.msra.mxu2 %v3594_v54 }
 0x144   : > { %v796_v59 = vmul.f32 %v3508_v45, %v785_v42  ;;  %898 = vmatpush.msrb.mxu0 %v3594_v54  ;;  %2931 = vmatpush.msra.mxu3 %v3594_v54  ;;  %v2838_v45 = vld [vmem:[%s4580_s4 + $0x10] sm:$0xff] }
 0x145   : > { %1029 = vmatpush.msra.mxu1 %v3594_v54  ;;  %935 = vmatpush.msra.mxu2 %v3603_v58 }
 0x146   : > { %v3614_v60 = vadd.f32 %v3512_v50, %v796_v59  ;;  %899 = vmatpush.msrb.mxu0 %v3603_v58  ;;  %2932 = vmatpush.msra.mxu3 %v3603_v58  ;;  %v2839_v50 = vld [vmem:[%s4580_s4 + $0x18] sm:$0xff] }
 0x147   : > { %1030 = vmatpush.msra.mxu1 %v3603_v58 }
 0x148   : > { %936 = vmatpush.msra.mxu2 %v3614_v60  ;;  %900 = vmatpush.msrb.mxu0 %v3614_v60 }
 0x149   : > { %2831 = vmatmul.msk.f32.gmra.mxu0 %vm605_vm0, %v3611_v57  ;;  %2933 = vmatpush.msra.mxu3 %v3614_v60 }
 0x14a   : > { %1031 = vmatpush.msra.mxu1 %v3614_v60  ;;  %937 = vmatpush.msra.mxu2 %v3611_v57 }
 0x14b   : > { %901 = vmatpush.msrb.mxu0 %v3611_v57  ;;  %2934 = vmatpush.msra.mxu3 %v3611_v57 }
 0x14c   : > { %1032 = vmatpush.msra.mxu1 %v3611_v57  ;;  %938 = vmatpush.msra.mxu2 %v3582_v44 }
 0x14d   : > { %902 = vmatpush.msrb.mxu0 %v3582_v44  ;;  %2935 = vmatpush.msra.mxu3 %v3582_v44 }
 0x14e   : > { %1033 = vmatpush.msra.mxu1 %v3582_v44  ;;  %939 = vmatpush.msra.mxu2 %v3557_v26 }
 0x14f   : > { %903 = vmatpush.msrb.mxu0 %v3557_v26  ;;  %2936 = vmatpush.msra.mxu3 %v3557_v26 }
 0x150   : > { %1034 = vmatpush.msra.mxu1 %v3557_v26  ;;  %940 = vmatpush.msra.mxu2 %v3522_v62 }
 0x151   : > { %2832 = vmatmul.msk.f32.gmra.mxu0 %vm605_vm0, %v3614_v60  ;;  %2937 = vmatpush.msra.mxu3 %v3522_v62 }
 0x152   : > { %904 = vmatpush.msrb.mxu0 %v3522_v62  ;;  %1035 = vmatpush.msra.mxu1 %v3522_v62 }
 0x153   : > { %2840 = vmatmul.msk.f32.vlgmr.msra.gmra.mxu2 %vm882_vm11, %v2838_v45  ;;  %2841 = vmatmul.msk.f32.vlgmr.msra.gmra.mxu3 %vm882_vm11, %v2839_v50 }
 0x154   : > { %2852 = vmatmul.msk.f32.vlgmr.msra.gmra.mxu1 %vm882_vm11, %v2850_v61  ;;  %971 = vmatpush.msrb.mxu3 %v2845_v1  ;;  %v1212_v1 = vld [vmem:[%s4585_s9 + $0x18] sm:$0xff] }
 0x155   : > { %1066 = vmatpush.msrb.mxu2 %v2857_v13 }
 0x156   : > { %972 = vmatpush.msrb.mxu3 %v2844_v2  ;;  %v1245_v2 = vld [vmem:[%s4586_s10 + $0x18] sm:$0xff] }
 0x157   : > { %1067 = vmatpush.msrb.mxu2 %v2856_v14 }
 0x158   : > { %973 = vmatpush.msrb.mxu3 %v2843_v3  ;;  %v1211_v3 = vld [vmem:[%s4585_s9 + $0x10] sm:$0xff] }
 0x159   : > { %2833 = vmatmul.msk.f32.gmra.mxu0 %vm605_vm0, %v3603_v58  ;;  %1068 = vmatpush.msrb.mxu2 %v2855_v17 }
 0x15a   : > { %974 = vmatpush.msrb.mxu3 %v2842_v5  ;;  %v1244_v5 = vld [vmem:[%s4586_s10 + $0x10] sm:$0xff] }
 0x15b   : > { %1069 = vmatpush.msrb.mxu2 %v2854_v19 }
 0x15c   : > { %2853 = vmatmul.msk.f32.gmra.mxu1 %vm882_vm11, %v2851_v29  ;;  %1000 = vmatpush.msra.mxu3 %v915_v6  ;;  %v1210_v6 = vld [vmem:[%s4585_s9 + $0x8] sm:$0xff] }
 0x15d   : > { %1231 = vmatpush.msra.mxu2 %v1212_v1 }
 0x15e   : > { %1001 = vmatpush.msra.mxu3 %v914_v7  ;;  %v1243_v7 = vld [vmem:[%s4586_s10 + $0x8] sm:$0xff] }
 0x15f   : > { %1232 = vmatpush.msra.mxu2 %v1211_v3 }
 0x160   : > { %1002 = vmatpush.msra.mxu3 %v913_v8  ;;  %v1209_v8 = vld [vmem:[%s4585_s9] sm:$0xff] }
 0x161   : > { %2834 = vmatmul.msk.f32.gmra.mxu0 %vm605_vm0, %v3594_v54  ;;  %1233 = vmatpush.msra.mxu2 %v1210_v6 }
 0x162   : > { %1003 = vmatpush.msra.mxu3 %v912_v10  ;;  %v1242_v10 = vld [vmem:[%s4586_s10] sm:$0xff] }
 0x163   : > { %1234 = vmatpush.msra.mxu2 %v1209_v8 }
 0x169   : > { %2835 = vmatmul.msk.f32.gmra.mxu0 %vm605_vm0, %v3589_v56 }
 0x171   : > { %2836 = vmatmul.msk.f32.vlgmr.msrb.gmra.mxu0 %vm882_vm11, %v880_v63 }
 0x179   : > { %2837 = vmatmul.msk.f32.gmra.mxu0 %vm882_vm11, %v881_v0 }
 0x1ad   : > { %v3683_v4 = vpop.f32.mrf.mxu0 }
 0x1b6   : > { %v3697_v9 = vpop.f32.mrf.mxu0 }
 0x1be   : > { %v3702_v11 = vpop.f32.mrf.mxu0 }
 0x1c6   : > { %v3704_v12 = vpop.f32.mrf.mxu0 }
 0x1ce   : > { %v3712_v16 = vpop.f32.mrf.mxu0 }
 0x1d1   : > { %v1037_v20 = vpop.f32.mrf.mxu1 }
 0x1d2   : > { %2858 = vmatmul.msk.f32.vlgmr.msrb.gmra.mxu2 %vm605_vm0, %v1037_v20 }
 0x1d6   : > { %v3721_v15 = vpop.f32.mrf.mxu0  ;;  %v942_v21 = vpop.f32.mrf.mxu2 }
 0x1d7   : > { %2846 = vmatmul.msk.f32.vlgmr.msrb.gmra.mxu3 %vm605_vm0, %v942_v21  ;;  %v945_v43 = vpop.f32.mrf.mxu3 }
 0x1d8   : > { %1096 = vmatpush.msrb.mxu3 %v3589_v56 }
 0x1d9   : > { %v1040_v23 = vpop.f32.mrf.mxu1 }
 0x1da   : > { %1097 = vmatpush.msrb.mxu3 %v3594_v54  ;;  %2859 = vmatmul.msk.f32.gmra.mxu2 %vm605_vm0, %v1040_v23 }
 0x1dc   : > { %1098 = vmatpush.msrb.mxu3 %v3603_v58 }
 0x1de   : > { %v3728_v24 = vpop.f32.mrf.mxu0  ;;  %1099 = vmatpush.msrb.mxu3 %v3614_v60 }
 0x1df   : > { %2847 = vmatmul.msk.f32.gmra.mxu3 %vm605_vm0, %v945_v43 }
 0x1e0   : > { %1100 = vmatpush.msrb.mxu3 %v3611_v57 }
 0x1e2   : > { %1101 = vmatpush.msrb.mxu3 %v3582_v44  ;;  %v2992_v44 = vld [vmem:[%s4582_s6] ss:$0 sm:$0xff] }
 0x1e4   : > { %1102 = vmatpush.msrb.mxu3 %v3557_v26  ;;  %v2861_v26 = vld [vmem:[%s4580_s4 + $0x38] sm:$0xff] }
 0x1e6   : > { %v3735_v25 = vpop.f32.mrf.mxu0  ;;  %1103 = vmatpush.msrb.mxu3 %v3522_v62  ;;  %v2867_v62 = vld [vmem:[%s4581_s5 + $0x78] sm:$0xff] }
 0x1e7   : > { %1134 = vmatpush.msrb.mxu1 %v2867_v62 }
 0x1e9   : > { %1135 = vmatpush.msrb.mxu1 %v2866_v31 }
 0x1eb   : > { %1136 = vmatpush.msrb.mxu1 %v2865_v32 }
 0x1ed   : > { %1137 = vmatpush.msrb.mxu1 %v2864_v33 }
 0x1ee   : > { %v906_v27 = vpop.f32.mrf.mxu0 }
 0x1ef   : > { %2848 = vmatmul.msk.f32.vlgmr.msra.gmra.mxu3 %vm605_vm0, %v906_v27 }
 0x1f0   : > { %1258 = vmatpush.msra.mxu3 %v1245_v2 }
 0x1f2   : > { %1259 = vmatpush.msra.mxu3 %v1244_v5 }
 0x1f4   : > { %1260 = vmatpush.msra.mxu3 %v1243_v7 }
 0x1f6   : > { %v909_v18 = vpop.f32.mrf.mxu0  ;;  %1261 = vmatpush.msra.mxu3 %v1242_v10 }
 0x1f7   : > { %2849 = vmatmul.msk.f32.gmra.mxu3 %vm605_vm0, %v909_v18 }
 0x1ff   : > { %2862 = vmatmul.msk.f32.vlgmr.msrb.gmra.mxu3 %vm882_vm11, %v2860_v30 }
 0x207   : > { %2863 = vmatmul.msk.f32.gmra.mxu3 %vm882_vm11, %v2861_v26 }
 0x255   : > { %v1071_v48 = vpop.f32.mrf.mxu2 }
 0x25a   : > { %v976_v28 = vpop.f32.mrf.mxu3 }
 0x25d   : > { %v1074_v34 = vpop.f32.mrf.mxu2 }
 0x262   : > { %v979_v35 = vpop.f32.mrf.mxu3 }
 0x272   : > { %v1005_v36 = vpop.f32.mrf.mxu3 }
 0x273   : > { %v1006_v37 = vadd.f32 %v1005_v36, %v976_v28  ;;  %v2993_v28 = vld [vmem:[%s4583_s7] ss:$0 sm:$0xff] }
 0x274   : > { %v2994_v36 = vld [vmem:[%s4584_s8] ss:$0 sm:$0xff] }
 0x275   : > { %v1077_v49 = vadd.f32 %v1071_v48, %v1006_v37 }
 0x27a   : > { %v1008_v38 = vpop.f32.mrf.mxu3 }
 0x27b   : > { %v1009_v39 = vadd.f32 %v1008_v38, %v979_v35 }
 0x27d   : > { %v1078_v56 = vadd.f32 %v1074_v34, %v1009_v39 }
 0x282   : > { %v1105_v40 = vpop.f32.mrf.mxu3 }
 0x283   : > { %2868 = vmatmul.msk.f32.vlgmr.msrb.gmra.mxu1 %vm605_vm0, %v1105_v40 }
 0x28a   : > { %v1108_v47 = vpop.f32.mrf.mxu3 }
 0x28b   : > { %2869 = vmatmul.msk.f32.gmra.mxu1 %vm605_vm0, %v1108_v47 }
 0x300   : > { %v1139_v41 = vpop.f32.mrf.mxu1 }
 0x301   : > { %v1145_v51 = vadd.f32 %v1139_v41, %v1077_v49 }
 0x303   : > { %v1151_v52 = vadd.f32 %v2992_v44, %v1145_v51 }
 0x305   : > { %v1155_v53 = vsel %vm605_vm0, %v1151_v52, 0.0 }
 0x306   : > { %1156 = vadd.xlane.f32.xlu1 %v1155_v53 }
 0x308   : > { %v1142_v46 = vpop.f32.mrf.mxu1 }
 0x309   : > { %v1146_v54 = vadd.f32 %v1142_v46, %v1078_v56 }
 0x30b   : > { %v1152_v55 = vadd.f32 %v2992_v44, %v1146_v54 }
 0x30d   : > { %v1158_v42 = vsel %vm605_vm0, %v1152_v55, 0.0 }
 0x30e   : > { %1159 = vadd.xlane.f32.xlu2 %v1158_v42 }
 0x379   : > { %v1157_v58 = vpop.xlane.xlu1 %1156 }
 0x37a   : > { %v1161_v59 = vmul.f32 %v1157_v58, %v3413_v22 }
 0x37c   : > { %v1163_v57 = vsub.f32 %v1151_v52, %v1161_v59 }
 0x37e   : > { %v1165_v60 = vmul.f32 %v1163_v57, %v1163_v57 }
 0x380   : > { %v1167_v45 = vsel %vm605_vm0, %v1165_v60, 0.0 }
 0x381   : > { %1168 = vadd.xlane.f32.xlu0 %v1167_v45  ;;  %v1160_v50 = vpop.xlane.xlu2 %1159 }
 0x382   : > { %v1162_v61 = vmul.f32 %v1160_v50, %v3413_v22 }
 0x384   : > { %v1164_v29 = vsub.f32 %v1152_v55, %v1162_v61 }
 0x386   : > { %v1166_v63 = vmul.f32 %v1164_v29, %v1164_v29 }
 0x388   : > { %v1170_v0 = vsel %vm605_vm0, %v1166_v63, 0.0 }
 0x389   : > { %1171 = vadd.xlane.f32.xlu1 %v1170_v0 }
 0x3a2   : > { %1598 = vrot.lane.b32.xlu1 %v3683_v4, %s3254_s29 }
 0x3aa   : > { %1606 = vrot.lane.b32.xlu1 %v3712_v16, %s3254_s29 }
 0x3b2   : > { %1612 = vrot.lane.b32.xlu1 %v3735_v25, %s3254_s29 }
 0x3f4   : > { %v1169_v13 = vpop.xlane.xlu0 %1168 }
 0x3f5   : > { %v1173_v14 = vmul.f32 %v1169_v13, %v3413_v22 }
 0x3f7   : > { %v1175_v17 = vadd.f32 1e-05, %v1173_v14 }
 0x3f9   : > { %3016 = vrsqrt.f32 %v1175_v17  ;;  %vm1183_vm13 = vweird.f32 %v1175_v17 }
 0x3fc   : > { %v1172_v19 = vpop.xlane.xlu1 %1171 }
 0x3fd   : > { %v1174_v20 = vmul.f32 %v1172_v19, %v3413_v22 }
 0x3ff   : > { %v3017_v21 = vpop.eup %3016  ;;  %v1176_v23 = vadd.f32 1e-05, %v1174_v20 }
 0x400   : > { %v1178_v43 = vmul.f32 %v3017_v21, %v1175_v17  ;;  %vm1184_vm12 = vweird.f32 %v3017_v21 }
 0x401   : > { %3018 = vrsqrt.f32 %v1176_v23  ;;  %vm1185_vm14 = vmor %vm1183_vm13, %vm1184_vm12  ;;  %vm1193_vm1 = vweird.f32 %v1176_v23 }
 0x402   : > { %v1179_v27 = vmul.f32 %v3017_v21, %v1178_v43 }
 0x404   : > { %v1180_v18 = vmul.f32 0.5, %v1179_v27 }
 0x406   : > { %v1181_v30 = vsub.f32 1.5, %v1180_v18 }
 0x407   : > { %v3019_v26 = vpop.eup %3018 }
 0x408   : > { %v1182_v62 = vmul.f32 %v3017_v21, %v1181_v30  ;;  %v1188_v31 = vmul.f32 %v3019_v26, %v1176_v23  ;;  %vm1194_vm15 = vweird.f32 %v3019_v26 }
 0x409   : > { %vm1195_vm2 = vmor %vm1193_vm1, %vm1194_vm15 }
 0x40a   : > { %v1186_v32 = vsel %vm1185_vm14, %v3017_v21, %v1182_v62  ;;  %v1189_v33 = vmul.f32 %v3019_v26, %v1188_v31 }
 0x40b   : > { %v1197_v35 = vmul.f32 %v1186_v32, %v1163_v57 }
 0x40c   : > { %v1190_v37 = vmul.f32 0.5, %v1189_v33 }
 0x40d   : > { %v1202_v38 = vmul.f32 %v2993_v28, %v1197_v35 }
 0x40e   : > { %v1191_v39 = vsub.f32 1.5, %v1190_v37 }
 0x40f   : > { %v1207_v40 = vadd.f32 %v2994_v36, %v1202_v38 }
 0x410   : > { %v1192_v47 = vmul.f32 %v3019_v26, %v1191_v39 }
 0x411   : > { %2870 = vmatmul.msk.f32.vlgmr.msra.gmra.mxu2 %vm605_vm0, %v1207_v40  ;;  %2872 = vmatmul.msk.f32.vlgmr.msra.gmra.mxu3 %vm605_vm0, %v1207_v40 }
 0x412   : > { %v1196_v48 = vsel %vm1195_vm2, %v3019_v26, %v1192_v47 }
 0x413   : > { %v1198_v49 = vmul.f32 %v1196_v48, %v1164_v29 }
 0x415   : > { %v1203_v44 = vmul.f32 %v2993_v28, %v1198_v49 }
 0x417   : > { %v1208_v41 = vadd.f32 %v2994_v36, %v1203_v44 }
 0x419   : > { %2871 = vmatmul.msk.f32.gmra.mxu2 %vm605_vm0, %v1208_v41  ;;  %2873 = vmatmul.msk.f32.gmra.mxu3 %vm605_vm0, %v1208_v41 }
 0x494   : > { %v1236_v51 = vpop.f32.mrf.mxu2  ;;  %v3813_v52 = vpop.f32.mrf.mxu3 }
 0x495   : > { %1614 = vrot.lane.b32.xlu0 %v1236_v51, %s3254_s29 }
 0x49c   : > { %v1239_v34 = vpop.f32.mrf.mxu2  ;;  %v3816_v53 = vpop.f32.mrf.mxu3 }
 0x49d   : > { %1602 = vrot.lane.b32.xlu0 %v3702_v11, %s3254_s29  ;;  %1571 = vmatpush.msrb.mxu2 %v3816_v53 }
 0x49e   : > { %1616 = vrot.lane.b32.xlu2 %v1239_v34, %s3254_s29  ;;  %2874 = vmatpush.xpose.msk.msra.mxu1 %vm1269_vm3, %v1239_v34 }
 0x49f   : > { %1572 = vmatpush.msrb.mxu2 %v3813_v52 }
 0x4a2   : > { %2875 = vmatpush.xpose.msk.msra.mxu1 %vm1269_vm3, %v1236_v51 }
 0x4a5   : > { %2876 = vmatmul.msk.f32.vlgmr.msra.gmra.mxu1 %vm1269_vm3, %v3683_v4  ;;  %1608 = vrot.lane.b32.xlu0 %v3721_v15, %s3254_s29 }
 0x4a6   : > { %1600 = vrot.lane.b32.xlu2 %v3697_v9, %s3254_s29 }
 0x4ad   : > { %2877 = vmatmul.msk.f32.gmra.mxu1 %vm1269_vm3, %v3697_v9  ;;  %v1599_v9 = vpop.permute.xlu1 %1598 }
 0x4ae   : > { %1604 = vrot.lane.b32.xlu2 %v3704_v12, %s3254_s29 }
 0x4b5   : > { %2878 = vmatmul.msk.f32.gmra.mxu1 %vm1269_vm3, %v3702_v11 }
 0x4b6   : > { %1610 = vrot.lane.b32.xlu2 %v3728_v24, %s3254_s29 }
 0x4bd   : > { %2879 = vmatmul.msk.f32.gmra.mxu1 %vm1269_vm3, %v3704_v12  ;;  %v1607_v12 = vpop.permute.xlu1 %1606 }
 0x4c5   : > { %2880 = vmatmul.msk.f32.gmra.mxu1 %vm1269_vm3, %v3712_v16  ;;  %v1613_v46 = vpop.permute.xlu1 %1612 }
 0x4cd   : > { %2881 = vmatmul.msk.f32.gmra.mxu1 %vm1269_vm3, %v3721_v15 }
 0x4d5   : > { %2882 = vmatmul.msk.f32.gmra.mxu1 %vm1269_vm3, %v3728_v24 }
 0x4dd   : > { %2883 = vmatmul.msk.f32.gmra.mxu1 %vm1269_vm3, %v3735_v25 }
 0x4f8   : > { %v1617_v4 = vpop.permute.xlu2 %1616 }
 0x4f9   : > { %2892 = vmatpush.xpose.msk.msra.mxu0 %vm1269_vm3, %v1617_v4  ;;  %2938 = vmatpush.xpose.msk.msrb.mxu3 %vm1269_vm3, %v1617_v4 }
 0x500   : > { %v1601_v16 = vpop.permute.xlu2 %1600 }
 0x507   : > { %v1615_v11 = vpop.permute.xlu0 %1614 }
 0x508   : > { %2893 = vmatpush.xpose.msk.msra.mxu0 %vm1269_vm3, %v1615_v11  ;;  %2939 = vmatpush.xpose.msk.msrb.mxu3 %vm1269_vm3, %v1615_v11  ;;  %v1605_v24 = vpop.permute.xlu2 %1604 }
 0x50b   : > { %2894 = vmatmul.msk.f32.vlgmr.msra.gmra.mxu0 %vm1269_vm3, %v1599_v9  ;;  %2898 = vmatmul.msk.f32.vlgmr.msrb.gmra.mxu3 %vm1269_vm3, %v1607_v12 }
 0x50f   : > { %v1603_v15 = vpop.permute.xlu0 %1602 }
 0x510   : > { %v1611_v56 = vpop.permute.xlu2 %1610 }
 0x513   : > { %2895 = vmatmul.msk.f32.gmra.mxu0 %vm1269_vm3, %v1601_v16 }
 0x517   : > { %v1609_v25 = vpop.permute.xlu0 %1608 }
 0x518   : > { %2899 = vmatmul.msk.f32.gmra.mxu3 %vm1269_vm3, %v1609_v25 }
 0x51b   : > { %2896 = vmatmul.msk.f32.gmra.mxu0 %vm1269_vm3, %v1603_v15 }
 0x520   : > { %2900 = vmatmul.msk.f32.gmra.mxu3 %vm1269_vm3, %v1611_v56 }
 0x522   : > { %v3861_v54 = vpop.f32.mrf.mxu1 }
 0x523   : > { %2897 = vmatmul.msk.f32.gmra.mxu0 %vm1269_vm3, %v1605_v24  ;;  %v1341_v2 = vsel %vm1269_vm3, %v3861_v54, -inf }
 0x528   : > { %2901 = vmatmul.msk.f32.gmra.mxu3 %vm1269_vm3, %v1613_v46 }
 0x52a   : > { %v3865_v57 = vpop.f32.mrf.mxu1 }
 0x52b   : > { %v1344_v3 = vsel %vm1269_vm3, %v3865_v57, -inf }
 0x532   : > { %v3874_v63 = vpop.f32.mrf.mxu1 }
 0x533   : > { %v1347_v8 = vsel %vm1269_vm3, %v3874_v63, -inf }
 0x53a   : > { %v3883_v7 = vpop.f32.mrf.mxu1 }
 0x53b   : > { %v1350_v17 = vsel %vm1269_vm3, %v3883_v7, -inf }
 0x542   : > { %v3890_v14 = vpop.f32.mrf.mxu1 }
 0x543   : > { %v1353_v20 = vsel %vm1269_vm3, %v3890_v14, -inf }
 0x54a   : > { %v3898_v21 = vpop.f32.mrf.mxu1 }
 0x54b   : > { %v1356_v23 = vsel %vm1269_vm3, %v3898_v21, -inf }
 0x552   : > { %v3902_v43 = vpop.f32.mrf.mxu1 }
 0x553   : > { %v1359_v27 = vsel %vm1269_vm3, %v3902_v43, -inf }
 0x55a   : > { %v3906_v18 = vpop.f32.mrf.mxu1 }
 0x55b   : > { %v1362_v30 = vsel %vm1269_vm3, %v3906_v18, -inf }
 0x588   : > { %v1655_v55 = vpop.f32.mrf.mxu0 }
 0x589   : > { %v1679_v42 = vsel %vm1269_vm3, %v1655_v55, -inf }
 0x58a   : > { %1680 = vmax.xlane.f32.xlu0 %v1679_v42  ;;  %v2985_v42 = vpack.i.bf16 %v3813_v52, %v3816_v53 }
 0x58e   : > { %v3867_v60 = vpop.f32.mrf.mxu3 }
 0x58f   : > { %v1691_v61 = vsel %vm1269_vm3, %v3867_v60, -inf }
 0x590   : > { %v1658_v58 = vpop.f32.mrf.mxu0 }
 0x591   : > { %v1682_v59 = vsel %vm1269_vm3, %v1658_v58, -inf }
 0x592   : > { %1683 = vmax.xlane.f32.xlu2 %v1682_v59 }
 0x598   : > { %v1661_v45 = vpop.f32.mrf.mxu0 }
 0x599   : > { %v1685_v50 = vsel %vm1269_vm3, %v1661_v45, -inf }
 0x59a   : > { %1686 = vmax.xlane.f32.xlu1 %v1685_v50  ;;  %1692 = vmax.xlane.f32.xlu2 %v1691_v61 }
 0x59b   : > { %v3872_v29 = vpop.f32.mrf.mxu3 }
 0x59c   : > { %v1694_v0 = vsel %vm1269_vm3, %v3872_v29, -inf }
 0x59d   : > { %1695 = vmax.xlane.f32.xlu0 %v1694_v0 }
 0x5a0   : > { %v1664_v1 = vpop.f32.mrf.mxu0 }
 0x5a1   : > { %v1688_v6 = vsel %vm1269_vm3, %v1664_v1, -inf }
 0x5a2   : > { %1342 = vmax.xlane.f32.xlu1 %v1341_v2  ;;  %1345 = vmax.xlane.f32.xlu2 %v1344_v3 }
 0x5a3   : > { %v1673_v5 = vpop.f32.mrf.mxu3 }
 0x5a4   : > { %v1697_v10 = vsel %vm1269_vm3, %v1673_v5, -inf }
 0x5a5   : > { %1689 = vmax.xlane.f32.xlu0 %v1688_v6 }
 0x5aa   : > { %1348 = vmax.xlane.f32.xlu2 %v1347_v8  ;;  %1698 = vmax.xlane.f32.xlu1 %v1697_v10 }
 0x5ab   : > { %v3888_v13 = vpop.f32.mrf.mxu3 }
 0x5ac   : > { %v1700_v19 = vsel %vm1269_vm3, %v3888_v13, -inf }
 0x5b2   : > { %1351 = vmax.xlane.f32.xlu2 %v1350_v17  ;;  %1701 = vmax.xlane.f32.xlu1 %v1700_v19 }
 0x5ba   : > { %1354 = vmax.xlane.f32.xlu2 %v1353_v20 }
 0x5c2   : > { %1357 = vmax.xlane.f32.xlu2 %v1356_v23 }
 0x5ca   : > { %1360 = vmax.xlane.f32.xlu2 %v1359_v27 }
 0x5d2   : > { %1363 = vmax.xlane.f32.xlu2 %v1362_v30 }
 0x5fd   : > { %v1681_v26 = vpop.xlane.xlu0 %1680 }
 0x5fe   : > { %v1703_v62 = vsub.f32 %v1655_v55, %v1681_v26 }
 0x600   : > { %v1711_v31 = vmul.f32 1.442695, %v1703_v62 }
 0x602   : > { %3020 = vpow2.f32 %v1711_v31 }
 0x605   : > { %v1684_v28 = vpop.xlane.xlu2 %1683 }
 0x606   : > { %v1704_v32 = vsub.f32 %v1658_v58, %v1684_v28 }
 0x608   : > { %v3910_v33 = vpop.eup %3020  ;;  %v1713_v35 = vmul.f32 1.442695, %v1704_v32 }
 0x609   : > { %v1727_v36 = vsel %vm1269_vm3, %v3910_v33, 0.0 }
 0x60a   : > { %3022 = vpow2.f32 %v1713_v35  ;;  %1728 = vadd.xlane.f32.xlu0 %v1727_v36 }
 0x60d   : > { %v1693_v37 = vpop.xlane.xlu2 %1692  ;;  %v1687_v38 = vpop.xlane.xlu1 %1686 }
 0x60e   : > { %v1705_v39 = vsub.f32 %v1661_v45, %v1687_v38  ;;  %v1707_v9 = vsub.f32 %v3867_v60, %v1693_v37 }
 0x610   : > { %v3914_v40 = vpop.eup %3022  ;;  %v1715_v47 = vmul.f32 1.442695, %v1705_v39  ;;  %v1696_v48 = vpop.xlane.xlu0 %1695  ;;  %v1719_v24 = vmul.f32 1.442695, %v1707_v9 }
 0x611   : > { %v1730_v49 = vsel %vm1269_vm3, %v3914_v40, 0.0  ;;  %v1708_v46 = vsub.f32 %v3872_v29, %v1696_v48 }
 0x612   : > { %1731 = vadd.xlane.f32.xlu0 %v1730_v49  ;;  %3024 = vpow2.f32 %v1715_v47 }
 0x613   : > { %v1721_v45 = vmul.f32 1.442695, %v1708_v46 }
 0x615   : > { %v1346_v44 = vpop.xlane.xlu2 %1345  ;;  %v3918_v41 = vpop.xlane.xlu1 %1342 }
 0x616   : > { %v1366_v53 = vsub.f32 %v3865_v57, %v1346_v44  ;;  %v1365_v62 = vsub.f32 %v3861_v54, %v3918_v41 }
 0x618   : > { %v1690_v51 = vpop.xlane.xlu0 %1689  ;;  %v3920_v34 = vpop.eup %3024  ;;  %v1373_v36 = vmul.f32 1.442695, %v1365_v62 }
 0x619   : > { %v1706_v4 = vsub.f32 %v1664_v1, %v1690_v51  ;;  %v1733_v11 = vsel %vm1269_vm3, %v3920_v34, 0.0 }
 0x61a   : > { %1734 = vadd.xlane.f32.xlu1 %v1733_v11 }
 0x61b   : > { %v1717_v12 = vmul.f32 1.442695, %v1706_v4 }
 0x61d   : > { %3026 = vpow2.f32 %v1717_v12  ;;  %v1349_v16 = vpop.xlane.xlu2 %1348  ;;  %v1699_v15 = vpop.xlane.xlu1 %1698 }
 0x61e   : > { %v1709_v25 = vsub.f32 %v1673_v5, %v1699_v15  ;;  %3028 = vpow2.f32 %v1719_v24  ;;  %v1375_v5 = vmul.f32 1.442695, %v1366_v53  ;;  %v1367_v57 = vsub.f32 %v3874_v63, %v1349_v16 }
 0x620   : > { %v1723_v56 = vmul.f32 1.442695, %v1709_v25 }
 0x622   : > { %3030 = vpow2.f32 %v1723_v56 }
 0x623   : > { %v3926_v55 = vpop.eup %3026  ;;  %3032 = vpow2.f32 %v1721_v45 }
 0x624   : > { %v1736_v58 = vsel %vm1269_vm3, %v3926_v55, 0.0  ;;  %v3934_v61 = vpop.eup %3028 }
 0x625   : > { %v1352_v59 = vpop.xlane.xlu2 %1351  ;;  %1737 = vadd.xlane.f32.xlu1 %v1736_v58  ;;  %v1702_v60 = vpop.xlane.xlu1 %1701  ;;  %v1739_v1 = vsel %vm1269_vm3, %v3934_v61, 0.0 }
 0x626   : > { %v1710_v50 = vsub.f32 %v3888_v13, %v1702_v60  ;;  %2986 = vrot.lane.b32.xlu0 %v2985_v42, %s3254_s29  ;;  %v1368_v30 = vsub.f32 %v3883_v7, %v1352_v59  ;;  %s3255_s29 = smov 16  }
 0x628   : > { %v1725_v29 = vmul.f32 1.442695, %v1710_v50  ;;  %v3936_v0 = vpop.eup %3030  ;;  %v1379_v28 = vmul.f32 1.442695, %v1368_v30 }
 0x629   : > { %v1745_v52 = vsel %vm1269_vm3, %v3936_v0, 0.0  ;;  %v3944_v6 = vpop.eup %3032 }
 0x62a   : > { %3034 = vpow2.f32 %v1725_v29  ;;  %1746 = vadd.xlane.f32.xlu2 %v1745_v52  ;;  %v1742_v17 = vsel %vm1269_vm3, %v3944_v6, 0.0 }
 0x62d   : > { %v1355_v2 = vpop.xlane.xlu2 %1354  ;;  %1740 = vadd.xlane.f32.xlu1 %v1739_v1 }
 0x62e   : > { %v1369_v3 = vsub.f32 %v3890_v14, %v1355_v2  ;;  %v1377_v14 = vmul.f32 1.442695, %v1367_v57 }
 0x630   : > { %v1381_v8 = vmul.f32 1.442695, %v1369_v3  ;;  %v3946_v10 = vpop.eup %3034 }
 0x631   : > { %v1748_v13 = vsel %vm1269_vm3, %v3946_v10, 0.0 }
 0x632   : > { %3036 = vpow2.f32 %v1381_v8  ;;  %1749 = vadd.xlane.f32.xlu2 %v1748_v13 }
 0x633   : > { %3038 = vpow2.f32 %v1375_v5 }
 0x634   : > { %3040 = vpow2.f32 %v1377_v14 }
 0x635   : > { %v1358_v19 = vpop.xlane.xlu2 %1357  ;;  %1743 = vadd.xlane.f32.xlu1 %v1742_v17 }
 0x636   : > { %v1370_v7 = vsub.f32 %v3898_v21, %v1358_v19 }
 0x638   : > { %v3953_v20 = vpop.eup %3036  ;;  %v1383_v38 = vmul.f32 1.442695, %v1370_v7 }
 0x639   : > { %v3955_v23 = vpop.eup %3038  ;;  %v1401_v27 = vsel %vm1269_vm3, %v3953_v20, 0.0 }
 0x63a   : > { %1402 = vadd.xlane.f32.xlu2 %v1401_v27  ;;  %v1392_v63 = vsel %vm1269_vm3, %v3955_v23, 0.0  ;;  %v3965_v35 = vpop.eup %3040 }
 0x63b   : > { %v1395_v37 = vsel %vm1269_vm3, %v3965_v35, 0.0 }
 0x63d   : > { %v1361_v26 = vpop.xlane.xlu2 %1360  ;;  %1393 = vadd.xlane.f32.xlu1 %v1392_v63 }
 0x63e   : > { %v1371_v31 = vsub.f32 %v3902_v43, %v1361_v26 }
 0x640   : > { %v1385_v32 = vmul.f32 1.442695, %v1371_v31 }
 0x642   : > { %3042 = vpow2.f32 %v1385_v32 }
 0x643   : > { %3044 = vpow2.f32 %v1379_v28 }
 0x644   : > { %3046 = vpow2.f32 %v1373_v36 }
 0x645   : > { %1396 = vadd.xlane.f32.xlu1 %v1395_v37  ;;  %v1364_v54 = vpop.xlane.xlu2 %1363  ;;  %3048 = vpow2.f32 %v1383_v38 }
 0x646   : > { %v1372_v48 = vsub.f32 %v3906_v18, %v1364_v54 }
 0x648   : > { %v3970_v39 = vpop.eup %3042  ;;  %v1387_v44 = vmul.f32 1.442695, %v1372_v48 }
 0x649   : > { %v3972_v47 = vpop.eup %3044  ;;  %v1407_v43 = vsel %vm1269_vm3, %v3970_v39, 0.0 }
 0x64a   : > { %1408 = vadd.xlane.f32.xlu2 %v1407_v43  ;;  %v3977_v49 = vpop.eup %3046  ;;  %v1398_v21 = vsel %vm1269_vm3, %v3972_v47, 0.0  ;;  %3050 = vpow2.f32 %v1387_v44 }
 0x64b   : > { %v1389_v41 = vsel %vm1269_vm3, %v3977_v49, 0.0  ;;  %v3983_v51 = vpop.eup %3048 }
 0x64c   : > { %v1404_v4 = vsel %vm1269_vm3, %v3983_v51, 0.0 }
 0x64d   : > { %1399 = vadd.xlane.f32.xlu1 %v1398_v21 }
 0x650   : > { %1390 = vadd.xlane.f32.xlu0 %v1389_v41  ;;  %v3987_v9 = vpop.eup %3050 }
 0x651   : > { %v1410_v18 = vsel %vm1269_vm3, %v3987_v9, 0.0 }
 0x655   : > { %1405 = vadd.xlane.f32.xlu1 %v1404_v4 }
 0x65d   : > { %1411 = vadd.xlane.f32.xlu1 %v1410_v18 }
 0x67d   : > { %v1729_v11 = vpop.xlane.xlu0 %1728 }
 0x67e   : > { %3052 = vrcp.f32 %v1729_v11  ;;  %v1762_v60 = vand.u32 2147483648, %v1729_v11  ;;  %vm1756_vm5 = vweird.f32 %v1729_v11  ;;  %v1760_v45 = vand.u32 2147483647, %v1729_v11 }
 0x680   : > { %v1763_v1 = vor.u32 1.1754944e-38, %v1762_v60  ;;  %vm1761_vm7 = vcmp.eq.f32.partialorder %v1760_v45, 8.507059e+37 }
 0x684   : > { %v3053_v12 = vpop.eup %3052 }
 0x685   : > { %v1732_v16 = vpop.xlane.xlu0 %1731  ;;  %v1752_v15 = vmul.f32 %v3053_v12, %v1729_v11  ;;  %vm1757_vm4 = vweird.f32 %v3053_v12 }
 0x686   : > { %3054 = vrcp.f32 %v1732_v16  ;;  %vm1758_vm6 = vmor %vm1756_vm5, %vm1757_vm4  ;;  %v1776_v17 = vand.u32 2147483648, %v1732_v16  ;;  %vm1770_vm9 = vweird.f32 %v1732_v16  ;;  %v1774_v27 = vand.u32 2147483647, %v1732_v16 }
 0x687   : > { %v1753_v24 = vsub.f32 1.0, %v1752_v15 }
 0x688   : > { %v1777_v62 = vor.u32 1.1754944e-38, %v1776_v17  ;;  %vm1775_vm11 = vcmp.eq.f32.partialorder %v1774_v27, 8.507059e+37 }
 0x689   : > { %v1754_v56 = vmul.f32 %v3053_v12, %v1753_v24 }
 0x68b   : > { %v1755_v58 = vadd.f32 %v3053_v12, %v1754_v56 }
 0x68c   : > { %v3055_v25 = vpop.eup %3054 }
 0x68d   : > { %v1766_v46 = vmul.f32 %v3055_v25, %v1732_v16  ;;  %v1735_v42 = vpop.xlane.xlu1 %1734  ;;  %v1759_v29 = vsel %vm1758_vm6, %v3053_v12, %v1755_v58  ;;  %vm1771_vm8 = vweird.f32 %v3055_v25 }
 0x68e   : > { %3056 = vrcp.f32 %v1735_v42  ;;  %v1764_v5 = vsel %vm1761_vm7, %v1763_v1, %v1759_v29  ;;  %vm1772_vm10 = vmor %vm1770_vm9, %vm1771_vm8  ;;  %v1790_v37 = vand.u32 2147483648, %v1735_v42  ;;  %vm1784_vm13 = vweird.f32 %v1735_v42 }
 0x68f   : > { %v1767_v59 = vsub.f32 1.0, %v1766_v46  ;;  %v1863_v14 = vmul.f32 %v3910_v33, %v1764_v5  ;;  %v1788_v38 = vand.u32 2147483647, %v1735_v42 }
 0x690   : > { %v1791_v21 = vor.u32 1.1754944e-38, %v1790_v37 }
 0x691   : > { %v1768_v52 = vmul.f32 %v3055_v25, %v1767_v59  ;;  %vm1789_vm15 = vcmp.eq.f32.partialorder %v1788_v38, 8.507059e+37 }
 0x693   : > { %v1769_v57 = vadd.f32 %v3055_v25, %v1768_v52 }
 0x694   : > { %v3057_v50 = vpop.eup %3056 }
 0x695   : > { %v1780_v53 = vmul.f32 %v3057_v50, %v1735_v42  ;;  %v1773_v63 = vsel %vm1772_vm10, %v3055_v25, %v1769_v57  ;;  %vm1785_vm12 = vweird.f32 %v3057_v50 }
 0x696   : > { %v1778_v32 = vsel %vm1775_vm11, %v1777_v62, %v1773_v63  ;;  %vm1786_vm14 = vmor %vm1784_vm13, %vm1785_vm12 }
 0x697   : > { %v1781_v13 = vsub.f32 1.0, %v1780_v53  ;;  %v1864_v33 = vmul.f32 %v3914_v40, %v1778_v32 }
 0x698   : > { %v2987_v2 = vpop.permute.xlu0 %2986  ;;  %v1738_v3 = vpop.xlane.xlu1 %1737 }
 0x699   : > { %v2988_v8 = vunpack.i.l.bf16 %v2987_v2  ;;  %3058 = vrcp.f32 %v1738_v3  ;;  %v2989_v19 = vunpack.i.h.bf16 %v2987_v2  ;;  %v1782_v30 = vmul.f32 %v3057_v50, %v1781_v13 }
 0x69a   : > { %v1804_v16 = vand.u32 2147483648, %v1738_v3  ;;  %vm1798_vm2 = vweird.f32 %v1738_v3  ;;  %v1802_v15 = vand.u32 2147483647, %v1738_v3 }
 0x69b   : > { %1917 = vmatpush.msra.mxu3 %v2988_v8  ;;  %v1783_v7 = vadd.f32 %v3057_v50, %v1782_v30 }
 0x69c   : > { %v1805_v46 = vor.u32 1.1754944e-38, %v1804_v16  ;;  %vm1803_vm5 = vcmp.eq.f32.partialorder %v1802_v15, 8.507059e+37 }
 0x69d   : > { %1918 = vmatpush.msra.mxu3 %v2989_v19  ;;  %v1787_v43 = vsel %vm1786_vm14, %v3057_v50, %v1783_v7  ;;  %v3995_v44 = vpop.xlane.xlu2 %1746 }
 0x69e   : > { %2902 = vmatmul.msk.f32.vlgmr.msra.gmra.mxu3 %vm1269_vm3, %v1863_v14  ;;  %v1792_v18 = vsel %vm1789_vm15, %v1791_v21, %v1787_v43  ;;  %vm1840_vm15 = vweird.f32 %v3995_v44 }
 0x69f   : > { %v3059_v26 = vpop.eup %3058  ;;  %v1865_v40 = vmul.f32 %v3920_v34, %v1792_v18 }
 0x6a0   : > { %v1794_v31 = vmul.f32 %v3059_v26, %v1738_v3  ;;  %v1741_v28 = vpop.xlane.xlu1 %1740  ;;  %vm1799_vm1 = vweird.f32 %v3059_v26 }
 0x6a1   : > { %3060 = vrcp.f32 %v1741_v28  ;;  %vm1800_vm4 = vmor %vm1798_vm2, %vm1799_vm1  ;;  %v1818_v34 = vand.u32 2147483648, %v1741_v28  ;;  %vm1812_vm7 = vweird.f32 %v1741_v28  ;;  %v1816_v52 = vand.u32 2147483647, %v1741_v28 }
 0x6a2   : > { %v1795_v36 = vsub.f32 1.0, %v1794_v31 }
 0x6a3   : > { %v1819_v3 = vor.u32 1.1754944e-38, %v1818_v34  ;;  %vm1817_vm9 = vcmp.eq.f32.partialorder %v1816_v52, 8.507059e+37 }
 0x6a4   : > { %v1796_v54 = vmul.f32 %v3059_v26, %v1795_v36 }
 0x6a5   : > { %v4000_v59 = vpop.xlane.xlu2 %1749 }
 0x6a6   : > { %2903 = vmatmul.msk.f32.gmra.mxu3 %vm1269_vm3, %v1864_v33  ;;  %v1797_v12 = vadd.f32 %v3059_v26, %v1796_v54  ;;  %v1844_v33 = vand.u32 2147483647, %v3995_v44  ;;  %v1860_v21 = vand.u32 2147483648, %v4000_v59 }
 0x6a7   : > { %v3061_v48 = vpop.eup %3060 }
 0x6a8   : > { %v1808_v41 = vmul.f32 %v3061_v48, %v1741_v28  ;;  %v1744_v4 = vpop.xlane.xlu1 %1743  ;;  %v1801_v25 = vsel %vm1800_vm4, %v3059_v26, %v1797_v12  ;;  %vm1813_vm6 = vweird.f32 %v3061_v48  ;;  %vm1845_vm2 = vcmp.eq.f32.partialorder %v1844_v33, 8.507059e+37 }
 0x6a9   : > { %3062 = vrcp.f32 %v1744_v4  ;;  %v1806_v58 = vsel %vm1803_vm5, %v1805_v46, %v1801_v25  ;;  %vm1814_vm8 = vmor %vm1812_vm7, %vm1813_vm6  ;;  %vm1826_vm11 = vweird.f32 %v1744_v4  ;;  %v1830_v14 = vand.u32 2147483647, %v1744_v4 }
 0x6aa   : > { %v1809_v11 = vsub.f32 1.0, %v1808_v41  ;;  %3064 = vrcp.f32 %v3995_v44  ;;  %v1866_v29 = vmul.f32 %v3926_v55, %v1806_v58  ;;  %v1832_v55 = vand.u32 2147483648, %v1744_v4 }
 0x6ab   : > { %3066 = vrcp.f32 %v4000_v59  ;;  %vm1831_vm13 = vcmp.eq.f32.partialorder %v1830_v14, 8.507059e+37  ;;  %vm1854_vm5 = vweird.f32 %v4000_v59  ;;  %v1861_v15 = vor.u32 1.1754944e-38, %v1860_v21 }
 0x6ac   : > { %v1810_v24 = vmul.f32 %v3061_v48, %v1809_v11  ;;  %v1833_v26 = vor.u32 1.1754944e-38, %v1832_v55 }
 0x6ae   : > { %2904 = vmatmul.msk.f32.gmra.mxu3 %vm1269_vm3, %v1865_v40  ;;  %v1811_v45 = vadd.f32 %v3061_v48, %v1810_v24  ;;  %v1858_v40 = vand.u32 2147483647, %v4000_v59 }
 0x6af   : > { %v3063_v56 = vpop.eup %3062 }
 0x6b0   : > { %v1822_v42 = vmul.f32 %v3063_v56, %v1744_v4  ;;  %v3065_v50 = vpop.eup %3064  ;;  %v1815_v2 = vsel %vm1814_vm8, %v3061_v48, %v1811_v45  ;;  %v4006_v5 = vpop.xlane.xlu1 %1393  ;;  %vm1827_vm10 = vweird.f32 %v3063_v56  ;;  %vm1859_vm8 = vcmp.eq.f32.partialorder %v1858_v40, 8.507059e+37 }
 0x6b1   : > { %v1836_v53 = vmul.f32 %v3065_v50, %v3995_v44  ;;  %v1820_v8 = vsel %vm1817_vm9, %v1819_v3, %v1815_v2  ;;  %v3067_v17 = vpop.eup %3066  ;;  %3068 = vrcp.f32 %v4006_v5  ;;  %vm1828_vm12 = vmor %vm1826_vm11, %vm1827_vm10  ;;  %vm1841_vm14 = vweird.f32 %v3065_v50 }
 0x6b2   : > { %v1823_v60 = vsub.f32 1.0, %v1822_v42  ;;  %v1867_v19 = vmul.f32 %v3934_v61, %v1820_v8  ;;  %v1850_v30 = vmul.f32 %v3067_v17, %v4000_v59  ;;  %v1846_v61 = vand.u32 2147483648, %v3995_v44  ;;  %vm1842_vm1 = vmor %vm1840_vm15, %vm1841_vm14 }
 0x6b3   : > { %v1837_v13 = vsub.f32 1.0, %v1836_v53  ;;  %vm1855_vm4 = vweird.f32 %v3067_v17 }
 0x6b4   : > { %v1824_v1 = vmul.f32 %v3063_v56, %v1823_v60  ;;  %v1851_v28 = vsub.f32 1.0, %v1850_v30  ;;  %v1847_v48 = vor.u32 1.1754944e-38, %v1846_v61  ;;  %vm1856_vm6 = vmor %vm1854_vm5, %vm1855_vm4 }
 0x6b5   : > { %v1838_v27 = vmul.f32 %v3065_v50, %v1837_v13  ;;  %v1436_v13 = vand.u32 2147483647, %v4006_v5 }
 0x6b6   : > { %2905 = vmatmul.msk.f32.gmra.mxu3 %vm1269_vm3, %v1866_v29  ;;  %v1825_v57 = vadd.f32 %v3063_v56, %v1824_v1  ;;  %v1852_v38 = vmul.f32 %v3067_v17, %v1851_v28  ;;  %v1438_v1 = vand.u32 2147483648, %v4006_v5 }
 0x6b7   : > { %v1839_v32 = vadd.f32 %v3065_v50, %v1838_v27  ;;  %v4014_v36 = vpop.eup %3068  ;;  %vm1437_vm15 = vcmp.eq.f32.partialorder %v1436_v13, 8.507059e+37 }
 0x6b8   : > { %v1829_v63 = vsel %vm1828_vm12, %v3063_v56, %v1825_v57  ;;  %v4012_v62 = vpop.xlane.xlu1 %1396  ;;  %v1428_v54 = vmul.f32 %v4014_v36, %v4006_v5  ;;  %vm1433_vm11 = vweird.f32 %v4014_v36  ;;  %v1439_v55 = vor.u32 1.1754944e-38, %v1438_v1 }
 0x6b9   : > { %v1834_v31 = vsel %vm1831_vm13, %v1833_v26, %v1829_v63  ;;  %v1843_v43 = vsel %vm1842_vm1, %v3065_v50, %v1839_v32  ;;  %v4038_v50 = vpop.xlane.xlu2 %1402  ;;  %vm1432_vm13 = vweird.f32 %v4006_v5  ;;  %v1452_v30 = vand.u32 2147483648, %v4012_v62 }
 0x6ba   : > { %v1868_v37 = vmul.f32 %v3944_v6, %v1834_v31  ;;  %v1848_v41 = vsel %vm1845_vm2, %v1847_v48, %v1843_v43  ;;  %v1429_v18 = vsub.f32 1.0, %v1428_v54  ;;  %v1853_v6 = vadd.f32 %v3067_v17, %v1852_v38  ;;  %vm1434_vm14 = vmor %vm1432_vm13, %vm1433_vm11 }
 0x6bb   : > { %v1869_v16 = vmul.f32 %v3936_v0, %v1848_v41  ;;  %vm1446_vm2 = vweird.f32 %v4012_v62  ;;  %v1450_v26 = vand.u32 2147483647, %v4012_v62  ;;  %vm1474_vm11 = vweird.f32 %v4038_v50 }
 0x6bc   : > { %v1430_v25 = vmul.f32 %v4014_v36, %v1429_v18  ;;  %v1857_v46 = vsel %vm1856_vm6, %v3067_v17, %v1853_v6 }
 0x6bd   : > { %v1862_v59 = vsel %vm1859_vm8, %v1861_v15, %v1857_v46  ;;  %vm1451_vm5 = vcmp.eq.f32.partialorder %v1450_v26, 8.507059e+37 }
 0x6be   : > { %2906 = vmatmul.msk.f32.gmra.mxu3 %vm1269_vm3, %v1867_v19  ;;  %v1431_v52 = vadd.f32 %v4014_v36, %v1430_v25  ;;  %v1870_v3 = vmul.f32 %v3946_v10, %v1862_v59 }
 0x6c0   : > { %v4025_v44 = vpop.xlane.xlu1 %1399  ;;  %v1435_v10 = vsel %vm1434_vm14, %v4014_v36, %v1431_v52  ;;  %v1453_v36 = vor.u32 1.1754944e-38, %v1452_v30 }
 0x6c1   : > { %v1464_v54 = vand.u32 2147483647, %v4025_v44 }
 0x6c3   : > { %v1391_v7 = vpop.xlane.xlu0 %1390 }
 0x6c4   : > { %3070 = vrcp.f32 %v1391_v7  ;;  %v1424_v56 = vand.u32 2147483648, %v1391_v7  ;;  %v1422_v60 = vand.u32 2147483647, %v1391_v7  ;;  %vm1418_vm9 = vweird.f32 %v1391_v7 }
 0x6c5   : > { %3072 = vrcp.f32 %v4012_v62 }
 0x6c6   : > { %2907 = vmatmul.msk.f32.gmra.mxu3 %vm1269_vm3, %v1868_v37  ;;  %3074 = vrcp.f32 %v4025_v44  ;;  %v1425_v45 = vor.u32 1.1754944e-38, %v1424_v56  ;;  %vm1423_vm12 = vcmp.eq.f32.partialorder %v1422_v60, 8.507059e+37  ;;  %v4066_v37 = vpop.xlane.xlu2 %1408 }
 0x6c7   : > { %3076 = vrcp.f32 %v4038_v50  ;;  %v1508_v1 = vand.u32 2147483648, %v4066_v37 }
 0x6c8   : > { %v4054_v5 = vpop.xlane.xlu1 %1405 }
 0x6c9   : > { %3078 = vrcp.f32 %v4054_v5  ;;  %v1494_v60 = vand.u32 2147483648, %v4054_v5  ;;  %v1509_v13 = vor.u32 1.1754944e-38, %v1508_v1 }
 0x6ca   : > { %v3071_v4 = vpop.eup %3070  ;;  %3080 = vrcp.f32 %v4066_v37 }
 0x6cb   : > { %v1414_v11 = vmul.f32 %v3071_v4, %v1391_v7  ;;  %v4027_v12 = vpop.eup %3072  ;;  %vm1419_vm7 = vweird.f32 %v3071_v4 }
 0x6cc   : > { %v1442_v42 = vmul.f32 %v4027_v12, %v4012_v62  ;;  %vm1420_vm10 = vmor %vm1418_vm9, %vm1419_vm7  ;;  %v3075_v53 = vpop.eup %3074  ;;  %vm1447_vm1 = vweird.f32 %v4027_v12  ;;  %v1466_v62 = vand.u32 2147483648, %v4025_v44  ;;  %vm1460_vm7 = vweird.f32 %v4025_v44 }
 0x6cd   : > { %v1415_v24 = vsub.f32 1.0, %v1414_v11  ;;  %v1456_v17 = vmul.f32 %v3075_v53, %v4025_v44  ;;  %v3077_v27 = vpop.eup %3076  ;;  %vm1448_vm4 = vmor %vm1446_vm2, %vm1447_vm1  ;;  %vm1461_vm6 = vweird.f32 %v3075_v53  ;;  %vm1465_vm9 = vcmp.eq.f32.partialorder %v1464_v54, 8.507059e+37 }
 0x6ce   : > { %2908 = vmatmul.msk.f32.gmra.mxu3 %vm1269_vm3, %v1869_v16  ;;  %v1443_v34 = vsub.f32 1.0, %v1442_v42  ;;  %v1470_v31 = vmul.f32 %v3077_v27, %v4038_v50  ;;  %vm1462_vm8 = vmor %vm1460_vm7, %vm1461_vm6  ;;  %v1467_v41 = vor.u32 1.1754944e-38, %v1466_v62  ;;  %v1478_v16 = vand.u32 2147483647, %v4038_v50 }
 0x6cf   : > { %v1416_v58 = vmul.f32 %v3071_v4, %v1415_v24  ;;  %v1457_v19 = vsub.f32 1.0, %v1456_v17 }
 0x6d0   : > { %v1444_v57 = vmul.f32 %v4027_v12, %v1443_v34  ;;  %v1471_v7 = vsub.f32 1.0, %v1470_v31  ;;  %v1412_v6 = vpop.xlane.xlu1 %1411  ;;  %vm1479_vm13 = vcmp.eq.f32.partialorder %v1478_v16, 8.507059e+37  ;;  %v1495_v34 = vor.u32 1.1754944e-38, %v1494_v60 }
 0x6d1   : > { %v1417_v0 = vadd.f32 %v3071_v4, %v1416_v58  ;;  %v1458_v28 = vmul.f32 %v3075_v53, %v1457_v19  ;;  %3082 = vrcp.f32 %v1412_v6 }
 0x6d2   : > { %v1445_v14 = vadd.f32 %v4027_v12, %v1444_v57  ;;  %v1472_v43 = vmul.f32 %v3077_v27, %v1471_v7  ;;  %v1984_v7 = vld [vmem:[%s4587_s11] sm:$0xff] }
 0x6d3   : > { %v1421_v29 = vsel %vm1420_vm10, %v3071_v4, %v1417_v0  ;;  %v1459_v33 = vadd.f32 %v3075_v53, %v1458_v28  ;;  %vm1475_vm10 = vweird.f32 %v3077_v27  ;;  %v1492_v0 = vand.u32 2147483647, %v4054_v5 }
 0x6d4   : > { %v1426_v2 = vsel %vm1423_vm12, %v1425_v45, %v1421_v29  ;;  %v1449_v32 = vsel %vm1448_vm4, %v4027_v12, %v1445_v14  ;;  %v1473_v11 = vadd.f32 %v3077_v27, %v1472_v43  ;;  %vm1476_vm12 = vmor %vm1474_vm11, %vm1475_vm10 }
 0x6d5   : > { %v1525_v8 = vmul.f32 %v3977_v49, %v1426_v2  ;;  %v1440_v49 = vsel %vm1437_vm15, %v1439_v55, %v1435_v10  ;;  %v1454_v61 = vsel %vm1451_vm5, %v1453_v36, %v1449_v32  ;;  %v1463_v21 = vsel %vm1462_vm8, %v3075_v53, %v1459_v33  ;;  %v1986_v36 = vld [vmem:[%s4587_s11 + $0x10] sm:$0xff] }
 0x6d6   : > { %2909 = vmatmul.msk.f32.gmra.mxu3 %vm1269_vm3, %v1870_v3  ;;  %v1526_v63 = vmul.f32 %v3955_v23, %v1440_v49  ;;  %v3079_v23 = vpop.eup %3078  ;;  %v1527_v38 = vmul.f32 %v3965_v35, %v1454_v61  ;;  %v1468_v4 = vsel %vm1465_vm9, %v1467_v41, %v1463_v21  ;;  %v1480_v35 = vand.u32 2147483648, %v4038_v50  ;;  %v1985_v61 = vld [vmem:[%s4587_s11 + $0x8] sm:$0xff] }
 0x6d7   : > { %2884 = vmatmul.msk.f32.vlgmr.msrb.gmra.mxu2 %vm1269_vm3, %v1525_v8  ;;  %v1484_v48 = vmul.f32 %v3079_v23, %v4054_v5  ;;  %v3081_v12 = vpop.eup %3080  ;;  %v1528_v44 = vmul.f32 %v3972_v47, %v1468_v4  ;;  %v1477_v24 = vsel %vm1476_vm12, %v3077_v27, %v1473_v11  ;;  %vm1489_vm14 = vweird.f32 %v3079_v23 }
 0x6d8   : > { %v1498_v40 = vmul.f32 %v3081_v12, %v4066_v37  ;;  %v1481_v25 = vor.u32 1.1754944e-38, %v1480_v35  ;;  %v3083_v58 = vpop.eup %3082  ;;  %vm1488_vm15 = vweird.f32 %v4054_v5  ;;  %vm1493_vm2 = vcmp.eq.f32.partialorder %v1492_v0, 8.507059e+37 }
 0x6d9   : > { %v1485_v18 = vsub.f32 1.0, %v1484_v48  ;;  %vm1490_vm1 = vmor %vm1488_vm15, %vm1489_vm14  ;;  %v1512_v45 = vmul.f32 %v3083_v58, %v1412_v6  ;;  %vm1503_vm4 = vweird.f32 %v3081_v12  ;;  %vm1502_vm5 = vweird.f32 %v4066_v37 }
 0x6da   : > { %v1482_v56 = vsel %vm1479_vm13, %v1481_v25, %v1477_v24  ;;  %v1499_v46 = vsub.f32 1.0, %v1498_v40  ;;  %v1506_v2 = vand.u32 2147483647, %v4066_v37  ;;  %vm1504_vm6 = vmor %vm1502_vm5, %vm1503_vm4  ;;  %vm1517_vm8 = vweird.f32 %v3083_v58 }
 0x6db   : > { %v1486_v15 = vmul.f32 %v3079_v23, %v1485_v18  ;;  %v1529_v47 = vmul.f32 %v3953_v20, %v1482_v56  ;;  %v1513_v52 = vsub.f32 1.0, %v1512_v45  ;;  %v1522_v10 = vand.u32 2147483648, %v1412_v6 }
 0x6dc   : > { %v1500_v59 = vmul.f32 %v3081_v12, %v1499_v46  ;;  %vm1507_vm7 = vcmp.eq.f32.partialorder %v1506_v2, 8.507059e+37  ;;  %vm1516_vm9 = vweird.f32 %v1412_v6  ;;  %v1520_v49 = vand.u32 2147483647, %v1412_v6 }
 0x6dd   : > { %v1487_v42 = vadd.f32 %v3079_v23, %v1486_v15  ;;  %v1514_v3 = vmul.f32 %v3083_v58, %v1513_v52  ;;  %vm1518_vm10 = vmor %vm1516_vm9, %vm1517_vm8  ;;  %v1523_v19 = vor.u32 1.1754944e-38, %v1522_v10 }
 0x6de   : > { %v1501_v53 = vadd.f32 %v3081_v12, %v1500_v59  ;;  %vm1521_vm11 = vcmp.eq.f32.partialorder %v1520_v49, 8.507059e+37 }
 0x6df   : > { %2885 = vmatmul.msk.f32.gmra.mxu2 %vm1269_vm3, %v1526_v63  ;;  %v1491_v50 = vsel %vm1490_vm1, %v3079_v23, %v1487_v42  ;;  %v1515_v17 = vadd.f32 %v3083_v58, %v1514_v3  ;;  %v2995_v42 = vld [vmem:[%s4588_s12] ss:$0 sm:$0xff] }
 0x6e0   : > { %v1496_v29 = vsel %vm1493_vm2, %v1495_v34, %v1491_v50  ;;  %v1505_v8 = vsel %vm1504_vm6, %v3081_v12, %v1501_v53  ;;  %v3133_v34 = vld [vmem:[%s3395_s1 + $0x8] sm:$0xff] }
 0x6e1   : > { %v1530_v20 = vmul.f32 %v3983_v51, %v1496_v29  ;;  %v1510_v57 = vsel %vm1507_vm7, %v1509_v13, %v1505_v8  ;;  %v1519_v51 = vsel %vm1518_vm10, %v3083_v58, %v1515_v17 }
 0x6e2   : > { %v1531_v55 = vmul.f32 %v3970_v39, %v1510_v57  ;;  %v1524_v5 = vsel %vm1521_vm11, %v1523_v19, %v1519_v51  ;;  %v3135_v57 = vld [vmem:[%s3395_s1 + $0x18] sm:$0xff]  ;;  %v3136_v51 = vld [vmem:[%s3395_s1 + $0x20] sm:$0xff] }
 0x6e3   : > { %v1532_v14 = vmul.f32 %v3987_v9, %v1524_v5  ;;  %v1987_v9 = vld [vmem:[%s4587_s11 + $0x18] sm:$0xff] }
 0x6e4   : > { %2028 = vmatpush.msrb.mxu1 %v1987_v9 }
 0x6e6   : > { %2029 = vmatpush.msrb.mxu1 %v1986_v36 }
 0x6e7   : > { %2886 = vmatmul.msk.f32.gmra.mxu2 %vm1269_vm3, %v1527_v38 }
 0x6e8   : > { %2030 = vmatpush.msrb.mxu1 %v1985_v61 }
 0x6ea   : > { %2031 = vmatpush.msrb.mxu1 %v1984_v7 }
 0x6ef   : > { %2887 = vmatmul.msk.f32.gmra.mxu2 %vm1269_vm3, %v1528_v44 }
 0x6f7   : > { %2888 = vmatmul.msk.f32.gmra.mxu2 %vm1269_vm3, %v1529_v47  ;;  %v3132_v47 = vld [vmem:[%s3395_s1] sm:$0xff] }
 0x6ff   : > { %2889 = vmatmul.msk.f32.gmra.mxu2 %vm1269_vm3, %v1530_v20  ;;  %v3134_v20 = vld [vmem:[%s3395_s1 + $0x10] sm:$0xff] }
 0x707   : > { %2890 = vmatmul.msk.f32.gmra.mxu2 %vm1269_vm3, %v1531_v55 }
 0x70f   : > { %2891 = vmatmul.msk.f32.gmra.mxu2 %vm1269_vm3, %v1532_v14 }
 0x721   : > { %v1920_v27 = vpop.f32.mrf.mxu3 }
 0x722   : > { %1952 = vrot.lane.b32.xlu0 %v1920_v27, %s3255_s29 }
 0x729   : > { %v1923_v30 = vpop.f32.mrf.mxu3 }
 0x72a   : > { %1954 = vrot.lane.b32.xlu2 %v1923_v30, %s3255_s29  ;;  %v3137_v30 = vld [vmem:[%s3395_s1 + $0x28] sm:$0xff] }
 0x731   : > { %v1926_v63 = vpop.f32.mrf.mxu3 }
 0x732   : > { %1956 = vrot.lane.b32.xlu1 %v1926_v63, %s3255_s29 }
 0x739   : > { %v1929_v39 = vpop.f32.mrf.mxu3 }
 0x73a   : > { %1958 = vrot.lane.b32.xlu0 %v1929_v39, %s3255_s29 }
 0x741   : > { %v1932_v26 = vpop.f32.mrf.mxu3 }
 0x742   : > { %1960 = vrot.lane.b32.xlu0 %v1932_v26, %s3255_s29 }
 0x749   : > { %v1935_v31 = vpop.f32.mrf.mxu3 }
 0x74a   : > { %1962 = vrot.lane.b32.xlu2 %v1935_v31, %s3255_s29 }
 0x751   : > { %v1938_v28 = vpop.f32.mrf.mxu3 }
 0x752   : > { %1964 = vrot.lane.b32.xlu1 %v1938_v28, %s3255_s29  ;;  %v3138_v28 = vld [vmem:[%s3395_s1 + $0x30] sm:$0xff] }
 0x759   : > { %v1941_v32 = vpop.f32.mrf.mxu3 }
 0x75a   : > { %1966 = vrot.lane.b32.xlu0 %v1941_v32, %s3255_s29  ;;  %v1574_v37 = vpop.f32.mrf.mxu2 }
 0x762   : > { %v1577_v33 = vpop.f32.mrf.mxu2 }
 0x76a   : > { %v1580_v38 = vpop.f32.mrf.mxu2 }
 0x772   : > { %v1583_v48 = vpop.f32.mrf.mxu2 }
 0x77a   : > { %v1586_v6 = vpop.f32.mrf.mxu2 }
 0x782   : > { %v1589_v35 = vpop.f32.mrf.mxu2 }
 0x784   : > { %v1955_v54 = vpop.permute.xlu2 %1954 }
 0x785   : > { %v1977_v43 = vsel %vm1269_vm3, %v1577_v33, %v1955_v54 }
 0x78a   : > { %v1592_v40 = vpop.f32.mrf.mxu2 }
 0x792   : > { %v1595_v25 = vpop.f32.mrf.mxu2 }
 0x794   : > { %v1953_v23 = vpop.permute.xlu0 %1952 }
 0x795   : > { %v1976_v62 = vsel %vm1269_vm3, %v1574_v37, %v1953_v23 }
 0x796   : > { %2910 = vmatmul.msk.f32.vlgmr.msrb.gmra.mxu1 %vm605_vm0, %v1976_v62 }
 0x79e   : > { %2911 = vmatmul.msk.f32.gmra.mxu1 %vm605_vm0, %v1977_v43  ;;  %v3139_v43 = vld [vmem:[%s3395_s1 + $0x38] sm:$0xff] }
 0x7a4   : > { %v1957_v21 = vpop.permute.xlu1 %1956  ;;  %v1963_v44 = vpop.permute.xlu2 %1962 }
 0x7a5   : > { %v1978_v41 = vsel %vm1269_vm3, %v1580_v38, %v1957_v21  ;;  %v1981_v16 = vsel %vm1269_vm3, %v1589_v35, %v1963_v44 }
 0x7a6   : > { %2912 = vmatmul.msk.f32.gmra.mxu1 %vm605_vm0, %v1978_v41 }
 0x7ac   : > { %v1959_v4 = vpop.permute.xlu0 %1958 }
 0x7ad   : > { %v1979_v18 = vsel %vm1269_vm3, %v1583_v48, %v1959_v4 }
 0x7ae   : > { %2913 = vmatmul.msk.f32.gmra.mxu1 %vm605_vm0, %v1979_v18 }
 0x7b4   : > { %v1961_v11 = vpop.permute.xlu0 %1960 }
 0x7b5   : > { %v1980_v12 = vsel %vm1269_vm3, %v1586_v6, %v1961_v11 }
 0x7b6   : > { %2914 = vmatmul.msk.f32.gmra.mxu1 %vm605_vm0, %v1980_v12 }
 0x7be   : > { %2915 = vmatmul.msk.f32.gmra.mxu1 %vm605_vm0, %v1981_v16 }
 0x7c4   : > { %v1965_v15 = vpop.permute.xlu1 %1964 }
 0x7c5   : > { %v1982_v24 = vsel %vm1269_vm3, %v1592_v40, %v1965_v15 }
 0x7c6   : > { %2916 = vmatmul.msk.f32.gmra.mxu1 %vm605_vm0, %v1982_v24 }
 0x7cc   : > { %v1967_v56 = vpop.permute.xlu0 %1966 }
 0x7cd   : > { %v1983_v46 = vsel %vm1269_vm3, %v1595_v25, %v1967_v56 }
 0x7ce   : > { %2917 = vmatmul.msk.f32.gmra.mxu1 %vm605_vm0, %v1983_v46 }
 0x813   : > { %v2033_v58 = vpop.f32.mrf.mxu1 }
 0x814   : > { %v2034_v60 = vadd.f32 %v2995_v42, %v2033_v58 }
 0x816   : > { %v4127_v0 = vadd.f32 %v3132_v47, %v2034_v60 }
 0x818   : > { %v2065_v59 = vsel %vm605_vm0, %v4127_v0, 0.0 }
 0x819   : > { %2066 = vadd.xlane.f32.xlu2 %v2065_v59 }
 0x81b   : > { %v2036_v45 = vpop.f32.mrf.mxu1 }
 0x81c   : > { %v2037_v50 = vadd.f32 %v2995_v42, %v2036_v45 }
 0x81e   : > { %v4132_v29 = vadd.f32 %v3133_v34, %v2037_v50 }
 0x820   : > { %v2068_v52 = vsel %vm605_vm0, %v4132_v29, 0.0 }
 0x821   : > { %2069 = vadd.xlane.f32.xlu1 %v2068_v52 }
 0x823   : > { %v2039_v53 = vpop.f32.mrf.mxu1 }
 0x824   : > { %v2040_v1 = vadd.f32 %v2995_v42, %v2039_v53 }
 0x826   : > { %v4137_v2 = vadd.f32 %v3134_v20, %v2040_v1 }
 0x828   : > { %v2071_v3 = vsel %vm605_vm0, %v4137_v2, 0.0 }
 0x829   : > { %2072 = vadd.xlane.f32.xlu0 %v2071_v3 }
 0x82b   : > { %v2042_v8 = vpop.f32.mrf.mxu1 }
 0x82c   : > { %v2043_v13 = vadd.f32 %v2995_v42, %v2042_v8  ;;  %v2260_v8 = vld [vmem:[#allocation6 + $0x18] sm:$0xff] }
 0x82d   : > { %2301 = vmatpush.msra.mxu2 %v2260_v8 }
 0x82e   : > { %v4142_v17 = vadd.f32 %v3135_v57, %v2043_v13  ;;  %v2259_v13 = vld [vmem:[#allocation6 + $0x10] sm:$0xff]  ;;  %v2258_v57 = vld [vmem:[#allocation6 + $0x8] sm:$0xff] }
 0x82f   : > { %2302 = vmatpush.msra.mxu2 %v2259_v13 }
 0x830   : > { %v2074_v10 = vsel %vm605_vm0, %v4142_v17, 0.0 }
 0x831   : > { %2075 = vadd.xlane.f32.xlu2 %v2074_v10  ;;  %2303 = vmatpush.msra.mxu2 %v2258_v57 }
 0x833   : > { %v2045_v55 = vpop.f32.mrf.mxu1 }
 0x834   : > { %v2046_v49 = vadd.f32 %v2995_v42, %v2045_v55  ;;  %v2257_v55 = vld [vmem:[#allocation6] sm:$0xff] }
 0x835   : > { %2304 = vmatpush.msra.mxu2 %v2257_v55 }
 0x836   : > { %v4147_v19 = vadd.f32 %v3136_v51, %v2046_v49 }
 0x838   : > { %v2077_v5 = vsel %vm605_vm0, %v4147_v19, 0.0 }
 0x839   : > { %2078 = vadd.xlane.f32.xlu1 %v2077_v5 }
 0x83b   : > { %v2048_v14 = vpop.f32.mrf.mxu1 }
 0x83c   : > { %v2049_v27 = vadd.f32 %v2995_v42, %v2048_v14 }
 0x83e   : > { %v4152_v63 = vadd.f32 %v3137_v30, %v2049_v27 }
 0x840   : > { %v2080_v39 = vsel %vm605_vm0, %v4152_v63, 0.0 }
 0x841   : > { %2081 = vadd.xlane.f32.xlu0 %v2080_v39 }
 0x843   : > { %v2051_v26 = vpop.f32.mrf.mxu1 }
 0x844   : > { %v2052_v31 = vadd.f32 %v2995_v42, %v2051_v26 }
 0x846   : > { %v4157_v9 = vadd.f32 %v3138_v28, %v2052_v31 }
 0x848   : > { %v2083_v32 = vsel %vm605_vm0, %v4157_v9, 0.0 }
 0x849   : > { %2084 = vadd.xlane.f32.xlu1 %v2083_v32 }
 0x84b   : > { %v2054_v37 = vpop.f32.mrf.mxu1 }
 0x84c   : > { %v2055_v23 = vadd.f32 %v2995_v42, %v2054_v37 }
 0x84e   : > { %v4170_v48 = vadd.f32 %v3139_v43, %v2055_v23 }
 0x850   : > { %v2086_v4 = vsel %vm605_vm0, %v4170_v48, 0.0 }
 0x88c   : > { %v2067_v36 = vpop.xlane.xlu2 %2066 }
 0x88d   : > { %v2089_v61 = vmul.f32 %v2067_v36, %v3413_v22 }
 0x88f   : > { %v4163_v7 = vsub.f32 %v4127_v0, %v2089_v61 }
 0x891   : > { %v2105_v33 = vmul.f32 %v4163_v7, %v4163_v7 }
 0x893   : > { %v2113_v62 = vsel %vm605_vm0, %v2105_v33, 0.0 }
 0x894   : > { %2114 = vadd.xlane.f32.xlu2 %v2113_v62  ;;  %v2070_v38 = vpop.xlane.xlu1 %2069 }
 0x895   : > { %v2090_v54 = vmul.f32 %v2070_v38, %v3413_v22 }
 0x897   : > { %v4173_v21 = vsub.f32 %v4132_v29, %v2090_v54 }
 0x899   : > { %v2106_v41 = vmul.f32 %v4173_v21, %v4173_v21 }
 0x89b   : > { %v2116_v18 = vsel %vm605_vm0, %v2106_v41, 0.0 }
 0x89c   : > { %v2073_v6 = vpop.xlane.xlu0 %2072  ;;  %2087 = vadd.xlane.f32.xlu2 %v2086_v4  ;;  %2117 = vadd.xlane.f32.xlu0 %v2116_v18 }
 0x89d   : > { %v2091_v11 = vmul.f32 %v2073_v6, %v3413_v22 }
 0x89f   : > { %v4182_v12 = vsub.f32 %v4137_v2, %v2091_v11 }
 0x8a1   : > { %v2107_v35 = vmul.f32 %v4182_v12, %v4182_v12 }
 0x8a3   : > { %v2119_v44 = vsel %vm605_vm0, %v2107_v35, 0.0 }
 0x8a4   : > { %v2076_v16 = vpop.xlane.xlu2 %2075  ;;  %2120 = vadd.xlane.f32.xlu1 %v2119_v44  ;;  %v4226_v44 = vld [vmem:[#allocation2] ss:$0 sm:$0xff] }
 0x8a5   : > { %v2092_v40 = vmul.f32 %v2076_v16, %v3413_v22 }
 0x8a7   : > { %v4189_v15 = vsub.f32 %v4142_v17, %v2092_v40 }
 0x8a9   : > { %v2108_v24 = vmul.f32 %v4189_v15, %v4189_v15 }
 0x8ab   : > { %v2122_v25 = vsel %vm605_vm0, %v2108_v24, 0.0 }
 0x8ac   : > { %2123 = vadd.xlane.f32.xlu0 %v2122_v25  ;;  %v2079_v56 = vpop.xlane.xlu1 %2078 }
 0x8ad   : > { %v2093_v46 = vmul.f32 %v2079_v56, %v3413_v22 }
 0x8af   : > { %v4196_v42 = vsub.f32 %v4147_v19, %v2093_v46  ;;  %v4230_v46 = vld [vmem:[#allocation4] ss:$0 sm:$0xff] }
 0x8b1   : > { %v2109_v58 = vmul.f32 %v4196_v42, %v4196_v42 }
 0x8b3   : > { %v2125_v60 = vsel %vm605_vm0, %v2109_v58, 0.0 }
 0x8b4   : > { %v2082_v47 = vpop.xlane.xlu0 %2081  ;;  %2126 = vadd.xlane.f32.xlu2 %v2125_v60 }
 0x8b5   : > { %v2094_v59 = vmul.f32 %v2082_v47, %v3413_v22 }
 0x8b7   : > { %v4203_v45 = vsub.f32 %v4152_v63, %v2094_v59 }
 0x8b9   : > { %v2110_v50 = vmul.f32 %v4203_v45, %v4203_v45 }
 0x8bb   : > { %v2128_v34 = vsel %vm605_vm0, %v2110_v50, 0.0 }
 0x8bc   : > { %2129 = vadd.xlane.f32.xlu1 %v2128_v34  ;;  %v2085_v52 = vpop.xlane.xlu1 %2084 }
 0x8bd   : > { %v2095_v53 = vmul.f32 %v2085_v52, %v3413_v22 }
 0x8bf   : > { %v4210_v1 = vsub.f32 %v4157_v9, %v2095_v53 }
 0x8c1   : > { %v2111_v20 = vmul.f32 %v4210_v1, %v4210_v1 }
 0x8c3   : > { %v2131_v3 = vsel %vm605_vm0, %v2111_v20, 0.0 }
 0x8c4   : > { %2132 = vadd.xlane.f32.xlu0 %v2131_v3 }
 0x907   : > { %v2115_v10 = vpop.xlane.xlu2 %2114 }
 0x908   : > { %v2137_v49 = vmul.f32 %v2115_v10, %v3413_v22 }
 0x90a   : > { %v2145_v51 = vadd.f32 1e-05, %v2137_v49 }
 0x90c   : > { %3084 = vrsqrt.f32 %v2145_v51  ;;  %vm2159_vm12 = vweird.f32 %v2145_v51 }
 0x90f   : > { %v2088_v5 = vpop.xlane.xlu2 %2087  ;;  %v2118_v14 = vpop.xlane.xlu0 %2117 }
 0x910   : > { %v2096_v27 = vmul.f32 %v2088_v5, %v3413_v22  ;;  %v2138_v30 = vmul.f32 %v2118_v14, %v3413_v22 }
 0x912   : > { %v3085_v39 = vpop.eup %3084  ;;  %v4219_v26 = vsub.f32 %v4170_v48, %v2096_v27  ;;  %v2146_v31 = vadd.f32 1e-05, %v2138_v30 }
 0x913   : > { %v2154_v28 = vmul.f32 %v3085_v39, %v2145_v51  ;;  %vm2160_vm3 = vweird.f32 %v3085_v39 }
 0x914   : > { %3086 = vrsqrt.f32 %v2146_v31  ;;  %v2112_v32 = vmul.f32 %v4219_v26, %v4219_v26  ;;  %vm2161_vm13 = vmor %vm2159_vm12, %vm2160_vm3  ;;  %vm2169_vm15 = vweird.f32 %v2146_v31 }
 0x915   : > { %v2155_v36 = vmul.f32 %v3085_v39, %v2154_v28 }
 0x916   : > { %v2134_v61 = vsel %vm605_vm0, %v2112_v32, 0.0 }
 0x917   : > { %v2156_v37 = vmul.f32 0.5, %v2155_v36  ;;  %2135 = vadd.xlane.f32.xlu2 %v2134_v61  ;;  %v2121_v33 = vpop.xlane.xlu1 %2120 }
 0x918   : > { %v2139_v23 = vmul.f32 %v2121_v33, %v3413_v22 }
 0x919   : > { %v2157_v62 = vsub.f32 1.5, %v2156_v37 }
 0x91a   : > { %v3087_v38 = vpop.eup %3086  ;;  %v2147_v54 = vadd.f32 1e-05, %v2139_v23 }
 0x91b   : > { %v2158_v43 = vmul.f32 %v3085_v39, %v2157_v62  ;;  %v2164_v41 = vmul.f32 %v3087_v38, %v2146_v31  ;;  %vm2170_vm14 = vweird.f32 %v3087_v38 }
 0x91c   : > { %3088 = vrsqrt.f32 %v2147_v54  ;;  %vm2171_vm1 = vmor %vm2169_vm15, %vm2170_vm14  ;;  %vm2179_vm4 = vweird.f32 %v2147_v54 }
 0x91d   : > { %v2162_v4 = vsel %vm2161_vm13, %v3085_v39, %v2158_v43  ;;  %v2165_v18 = vmul.f32 %v3087_v38, %v2164_v41 }
 0x91e   : > { %v2233_v6 = vmul.f32 %v2162_v4, %v4163_v7 }
 0x91f   : > { %v2166_v11 = vmul.f32 0.5, %v2165_v18  ;;  %v2124_v35 = vpop.xlane.xlu0 %2123 }
 0x920   : > { %v2241_v16 = vmul.f32 %v4226_v44, %v2233_v6  ;;  %v2140_v40 = vmul.f32 %v2124_v35, %v3413_v22 }
 0x921   : > { %v2167_v24 = vsub.f32 1.5, %v2166_v11 }
 0x922   : > { %v3089_v25 = vpop.eup %3088  ;;  %v2148_v56 = vadd.f32 1e-05, %v2140_v40  ;;  %v2249_v58 = vadd.f32 %v4230_v46, %v2241_v16 }
 0x923   : > { %v2168_v60 = vmul.f32 %v3087_v38, %v2167_v24  ;;  %v2174_v47 = vmul.f32 %v3089_v25, %v2147_v54  ;;  %vm2180_vm2 = vweird.f32 %v3089_v25 }
 0x924   : > { %3090 = vrsqrt.f32 %v2148_v56  ;;  %2918 = vmatmul.msk.f32.vlgmr.msra.gmra.mxu2 %vm605_vm0, %v2249_v58  ;;  %vm2181_vm5 = vmor %vm2179_vm4, %vm2180_vm2  ;;  %vm2189_vm7 = vweird.f32 %v2148_v56 }
 0x925   : > { %v2172_v7 = vsel %vm2171_vm1, %v3087_v38, %v2168_v60  ;;  %v2175_v59 = vmul.f32 %v3089_v25, %v2174_v47 }
 0x926   : > { %v2234_v50 = vmul.f32 %v2172_v7, %v4173_v21 }
 0x927   : > { %v2176_v34 = vmul.f32 0.5, %v2175_v59  ;;  %v2127_v52 = vpop.xlane.xlu2 %2126 }
 0x928   : > { %v2141_v53 = vmul.f32 %v2127_v52, %v3413_v22  ;;  %v2242_v20 = vmul.f32 %v4226_v44, %v2234_v50 }
 0x929   : > { %v2177_v3 = vsub.f32 1.5, %v2176_v34 }
 0x92a   : > { %v3091_v8 = vpop.eup %3090  ;;  %v2149_v13 = vadd.f32 1e-05, %v2141_v53  ;;  %v2250_v57 = vadd.f32 %v4230_v46, %v2242_v20 }
 0x92b   : > { %v2178_v10 = vmul.f32 %v3089_v25, %v2177_v3  ;;  %v2184_v55 = vmul.f32 %v3091_v8, %v2148_v56  ;;  %vm2190_vm6 = vweird.f32 %v3091_v8 }
 0x92c   : > { %3092 = vrsqrt.f32 %v2149_v13  ;;  %2919 = vmatmul.msk.f32.gmra.mxu2 %vm605_vm0, %v2250_v57  ;;  %vm2191_vm8 = vmor %vm2189_vm7, %vm2190_vm6  ;;  %vm2199_vm10 = vweird.f32 %v2149_v13 }
 0x92d   : > { %v2182_v21 = vsel %vm2181_vm5, %v3089_v25, %v2178_v10  ;;  %v2185_v49 = vmul.f32 %v3091_v8, %v2184_v55 }
 0x92e   : > { %v2235_v51 = vmul.f32 %v2182_v21, %v4182_v12 }
 0x92f   : > { %v2186_v5 = vmul.f32 0.5, %v2185_v49  ;;  %v2130_v14 = vpop.xlane.xlu1 %2129 }
 0x930   : > { %v2142_v27 = vmul.f32 %v2130_v14, %v3413_v22  ;;  %v2243_v30 = vmul.f32 %v4226_v44, %v2235_v51 }
 0x931   : > { %v2187_v39 = vsub.f32 1.5, %v2186_v5 }
 0x932   : > { %v3093_v31 = vpop.eup %3092  ;;  %v2150_v28 = vadd.f32 1e-05, %v2142_v27  ;;  %v2251_v32 = vadd.f32 %v4230_v46, %v2243_v30 }
 0x933   : > { %v2188_v36 = vmul.f32 %v3091_v8, %v2187_v39  ;;  %v2194_v61 = vmul.f32 %v3093_v31, %v2149_v13  ;;  %vm2200_vm9 = vweird.f32 %v3093_v31 }
 0x934   : > { %3094 = vrsqrt.f32 %v2150_v28  ;;  %2920 = vmatmul.msk.f32.gmra.mxu2 %vm605_vm0, %v2251_v32  ;;  %vm2201_vm11 = vmor %vm2199_vm10, %vm2200_vm9  ;;  %vm2209_vm12 = vweird.f32 %v2150_v28  ;;  %v2664_v32 = vld [vmem:[%s4591_s15 + $0x70] sm:$0xff] }
 0x935   : > { %v2192_v12 = vsel %vm2191_vm8, %v3091_v8, %v2188_v36  ;;  %v2195_v37 = vmul.f32 %v3093_v31, %v2194_v61 }
 0x936   : > { %v2236_v33 = vmul.f32 %v2192_v12, %v4189_v15 }
 0x937   : > { %v2196_v23 = vmul.f32 0.5, %v2195_v37  ;;  %v2133_v62 = vpop.xlane.xlu0 %2132  ;;  %v2661_v37 = vld [vmem:[%s4591_s15 + $0x58] sm:$0xff] }
 0x938   : > { %v2143_v38 = vmul.f32 %v2133_v62, %v3413_v22  ;;  %v2244_v54 = vmul.f32 %v4226_v44, %v2236_v33 }
 0x939   : > { %v2197_v43 = vsub.f32 1.5, %v2196_v23  ;;  %v2660_v23 = vld [vmem:[%s4591_s15 + $0x50] sm:$0xff] }
 0x93a   : > { %v3095_v41 = vpop.eup %3094  ;;  %v2151_v4 = vadd.f32 1e-05, %v2143_v38  ;;  %v2252_v18 = vadd.f32 %v4230_v46, %v2244_v54 }
 0x93b   : > { %v2198_v6 = vmul.f32 %v3093_v31, %v2197_v43  ;;  %v2204_v11 = vmul.f32 %v3095_v41, %v2150_v28  ;;  %vm2210_vm3 = vweird.f32 %v3095_v41  ;;  %v2659_v43 = vld [vmem:[%s4591_s15 + $0x48] sm:$0xff] }
 0x93c   : > { %3096 = vrsqrt.f32 %v2151_v4  ;;  %2921 = vmatmul.msk.f32.gmra.mxu2 %vm605_vm0, %v2252_v18  ;;  %vm2211_vm13 = vmor %vm2209_vm12, %vm2210_vm3  ;;  %vm2219_vm15 = vweird.f32 %v2151_v4  ;;  %v2657_v18 = vld [vmem:[%s4591_s15 + $0x38] sm:$0xff] }
 0x93d   : > { %v2202_v15 = vsel %vm2201_vm11, %v3093_v31, %v2198_v6  ;;  %v2205_v35 = vmul.f32 %v3095_v41, %v2204_v11  ;;  %v2665_v31 = vld [vmem:[%s4591_s15 + $0x78] sm:$0xff]  ;;  %v2656_v11 = vld [vmem:[%s4591_s15 + $0x30] sm:$0xff] }
 0x93e   : > { %v2237_v16 = vmul.f32 %v2202_v15, %v4196_v42  ;;  %2670 = vmatpush.msrb.mxu0 %v2665_v31 }
 0x93f   : > { %v2206_v40 = vmul.f32 0.5, %v2205_v35 }
 0x940   : > { %v2245_v24 = vmul.f32 %v4226_v44, %v2237_v16  ;;  %2671 = vmatpush.msrb.mxu0 %v2664_v32 }
 0x941   : > { %v2207_v25 = vsub.f32 1.5, %v2206_v40 }
 0x942   : > { %v3097_v56 = vpop.eup %3096  ;;  %v2253_v58 = vadd.f32 %v4230_v46, %v2245_v24  ;;  %v2655_v24 = vld [vmem:[%s4591_s15 + $0x28] sm:$0xff] }
 0x943   : > { %v2208_v60 = vmul.f32 %v3095_v41, %v2207_v25  ;;  %v2214_v47 = vmul.f32 %v3097_v56, %v2151_v4  ;;  %vm2220_vm14 = vweird.f32 %v3097_v56 }
 0x944   : > { %2922 = vmatmul.msk.f32.gmra.mxu2 %vm605_vm0, %v2253_v58  ;;  %vm2221_vm1 = vmor %vm2219_vm15, %vm2220_vm14 }
 0x945   : > { %v2212_v7 = vsel %vm2211_vm13, %v3095_v41, %v2208_v60  ;;  %v2215_v59 = vmul.f32 %v3097_v56, %v2214_v47  ;;  %v2658_v41 = vld [vmem:[%s4591_s15 + $0x40] sm:$0xff] }
 0x946   : > { %v2238_v50 = vmul.f32 %v2212_v7, %v4203_v45  ;;  %v2654_v60 = vld [vmem:[%s4591_s15 + $0x20] sm:$0xff] }
 0x947   : > { %v2216_v34 = vmul.f32 0.5, %v2215_v59 }
 0x948   : > { %v2246_v42 = vmul.f32 %v4226_v44, %v2238_v50  ;;  %v2653_v50 = vld [vmem:[%s4591_s15 + $0x18] sm:$0xff] }
 0x949   : > { %v2217_v52 = vsub.f32 1.5, %v2216_v34 }
 0x94a   : > { %v2254_v53 = vadd.f32 %v4230_v46, %v2246_v42 }
 0x94b   : > { %v2218_v20 = vmul.f32 %v3097_v56, %v2217_v52 }
 0x94c   : > { %2923 = vmatmul.msk.f32.gmra.mxu2 %vm605_vm0, %v2254_v53 }
 0x94d   : > { %v2222_v3 = vsel %vm2221_vm1, %v3097_v56, %v2218_v20  ;;  %v2652_v20 = vld [vmem:[%s4591_s15 + $0x10] sm:$0xff] }
 0x94e   : > { %v2239_v8 = vmul.f32 %v2222_v3, %v4210_v1 }
 0x950   : > { %v2247_v13 = vmul.f32 %v4226_v44, %v2239_v8 }
 0x952   : > { %v2255_v57 = vadd.f32 %v4230_v46, %v2247_v13 }
 0x954   : > { %2924 = vmatmul.msk.f32.gmra.mxu2 %vm605_vm0, %v2255_v57 }
 0x98a   : > { %v2136_v45 = vpop.xlane.xlu2 %2135 }
 0x98b   : > { %v2144_v10 = vmul.f32 %v2136_v45, %v3413_v22  ;;  %v4267_v22 = vld [vmem:[%s4590_s14] ss:$0 sm:$0xff] }
 0x98d   : > { %v2152_v55 = vadd.f32 1e-05, %v2144_v10  ;;  %v2651_v10 = vld [vmem:[%s4591_s15 + $0x8] sm:$0xff] }
 0x98f   : > { %3098 = vrsqrt.f32 %v2152_v55  ;;  %vm2229_vm4 = vweird.f32 %v2152_v55 }
 0x995   : > { %v3099_v21 = vpop.eup %3098 }
 0x996   : > { %v2224_v49 = vmul.f32 %v3099_v21, %v2152_v55  ;;  %vm2230_vm2 = vweird.f32 %v3099_v21 }
 0x997   : > { %vm2231_vm5 = vmor %vm2229_vm4, %vm2230_vm2 }
 0x998   : > { %v2225_v51 = vmul.f32 %v3099_v21, %v2224_v49 }
 0x99a   : > { %v2226_v5 = vmul.f32 0.5, %v2225_v51 }
 0x99c   : > { %v2227_v14 = vsub.f32 1.5, %v2226_v5 }
 0x99e   : > { %v2228_v27 = vmul.f32 %v3099_v21, %v2227_v14  ;;  %v2650_v14 = vld [vmem:[%s4591_s15] sm:$0xff] }
 0x9a0   : > { %v2232_v1 = vsel %vm2231_vm5, %v3099_v21, %v2228_v27 }
 0x9a1   : > { %v2240_v30 = vmul.f32 %v2232_v1, %v4219_v26 }
 0x9a3   : > { %v2248_v39 = vmul.f32 %v4226_v44, %v2240_v30  ;;  %v2663_v44 = vld [vmem:[%s4591_s15 + $0x68] sm:$0xff]  ;;  %v3256_v30 = vmov -1.0  }
 0x9a4   : > { %2672 = vmatpush.msrb.mxu0 %v2663_v44 }
 0x9a5   : > { %v2256_v28 = vadd.f32 %v4230_v46, %v2248_v39  ;;  %v2662_v46 = vld [vmem:[%s4591_s15 + $0x60] sm:$0xff] }
 0x9a6   : > { %2673 = vmatpush.msrb.mxu0 %v2662_v46 }
 0x9a7   : > { %v2306_v36 = vpop.f32.mrf.mxu2  ;;  %2925 = vmatmul.msk.f32.gmra.mxu2 %vm605_vm0, %v2256_v28 }
 0x9a8   : > { %v4278_v26 = vadd.f32 %v4267_v22, %v2306_v36  ;;  %2674 = vmatpush.msrb.mxu0 %v2661_v37 }
 0x9aa   : > { %v4284_v61 = vmul.f32 0.70710677, %v4278_v26  ;;  %2675 = vmatpush.msrb.mxu0 %v2660_v23  ;;  %v4367_v31 = vmul.f32 0.5, %v4278_v26 }
 0x9ac   : > { %v2338_v12 = vand.u32 2147483647, %v4284_v61  ;;  %2676 = vmatpush.msrb.mxu0 %v2659_v43  ;;  %vm2346_vm9 = vcmp.ge.f32.partialorder %v4284_v61, 0.0 }
 0x9ad   : > { %v4364_v39 = vsel %vm2346_vm9, 1.0, %v3256_v30 }
 0x9ae   : > { %v2362_v33 = vmul.f32 0.3275911, %v2338_v12  ;;  %2677 = vmatpush.msrb.mxu0 %v2658_v41  ;;  %v2570_v52 = vsub.f32 0.0, %v2338_v12 }
 0x9af   : > { %v2309_v62 = vpop.f32.mrf.mxu2 }
 0x9b0   : > { %v2370_v38 = vadd.f32 1.0, %v2362_v33  ;;  %v4297_v54 = vadd.f32 %v4267_v22, %v2309_v62  ;;  %2678 = vmatpush.msrb.mxu0 %v2657_v18  ;;  %v2578_v49 = vmul.f32 %v2570_v52, %v2338_v12 }
 0x9b2   : > { %3100 = vrcp.f32 %v2370_v38  ;;  %v4306_v4 = vmul.f32 0.70710677, %v4297_v54  ;;  %2679 = vmatpush.msrb.mxu0 %v2656_v11  ;;  %v2389_v7 = vand.u32 2147483648, %v2370_v38  ;;  %v2387_v42 = vand.u32 2147483647, %v2370_v38 }
 0x9b3   : > { %vm2383_vm7 = vweird.f32 %v2370_v38  ;;  %v2586_v36 = vmul.f32 1.442695, %v2578_v49  ;;  %v4376_v33 = vmul.f32 0.5, %v4297_v54 }
 0x9b4   : > { %v4312_v6 = vand.u32 2147483647, %v4306_v4  ;;  %2680 = vmatpush.msrb.mxu0 %v2655_v24  ;;  %v2390_v13 = vor.u32 1.1754944e-38, %v2389_v7  ;;  %vm2388_vm10 = vcmp.eq.f32.partialorder %v2387_v42, 8.507059e+37  ;;  %vm2347_vm12 = vcmp.ge.f32.partialorder %v4306_v4, 0.0 }
 0x9b6   : > { %v2363_v15 = vmul.f32 0.3275911, %v4312_v6  ;;  %2681 = vmatpush.msrb.mxu0 %v2654_v60  ;;  %v2571_v61 = vsub.f32 0.0, %v4312_v6 }
 0x9b7   : > { %v2312_v35 = vpop.f32.mrf.mxu2 }
 0x9b8   : > { %v3101_v16 = vpop.eup %3100  ;;  %v4319_v40 = vadd.f32 %v4267_v22, %v2312_v35  ;;  %v4324_v56 = vadd.f32 1.0, %v2363_v15  ;;  %2682 = vmatpush.msrb.mxu0 %v2653_v50  ;;  %v2579_v35 = vmul.f32 %v2571_v61, %v4312_v6 }
 0x9b9   : > { %v2379_v25 = vmul.f32 %v3101_v16, %v2370_v38  ;;  %vm2384_vm6 = vweird.f32 %v3101_v16 }
 0x9ba   : > { %v4327_v58 = vmul.f32 0.70710677, %v4319_v40  ;;  %3102 = vrcp.f32 %v4324_v56  ;;  %2683 = vmatpush.msrb.mxu0 %v2652_v20  ;;  %vm2385_vm8 = vmor %vm2383_vm7, %vm2384_vm6  ;;  %v2404_v12 = vand.u32 2147483648, %v4324_v56  ;;  %v2402_v62 = vand.u32 2147483647, %v4324_v56 }
 0x9bb   : > { %v2380_v47 = vsub.f32 1.0, %v2379_v25  ;;  %vm2398_vm3 = vweird.f32 %v4324_v56  ;;  %v4408_v20 = vsel %vm2347_vm12, 1.0, %v3256_v30 }
 0x9bc   : > { %v4334_v59 = vand.u32 2147483647, %v4327_v58  ;;  %2684 = vmatpush.msrb.mxu0 %v2651_v10  ;;  %v2405_v25 = vor.u32 1.1754944e-38, %v2404_v12  ;;  %vm2403_vm14 = vcmp.eq.f32.partialorder %v2402_v62, 8.507059e+37 }
 0x9bd   : > { %v2381_v34 = vmul.f32 %v3101_v16, %v2380_v47 }
 0x9be   : > { %v2364_v53 = vmul.f32 0.3275911, %v4334_v59  ;;  %2685 = vmatpush.msrb.mxu0 %v2650_v14  ;;  %v2572_v43 = vsub.f32 0.0, %v4334_v59 }
 0x9bf   : > { %v2382_v3 = vadd.f32 %v3101_v16, %v2381_v34  ;;  %v2315_v8 = vpop.f32.mrf.mxu2 }
 0x9c0   : > { %v4343_v57 = vadd.f32 1.0, %v2364_v53  ;;  %v4346_v45 = vadd.f32 %v4267_v22, %v2315_v8  ;;  %v3103_v55 = vpop.eup %3102 }
 0x9c1   : > { %v2386_v21 = vsel %vm2385_vm8, %v3101_v16, %v2382_v3  ;;  %v2394_v5 = vmul.f32 %v3103_v55, %v4324_v56  ;;  %vm2399_vm11 = vweird.f32 %v3103_v55  ;;  %v2580_v56 = vmul.f32 %v2572_v43, %v4334_v59 }
 0x9c2   : > { %v4352_v51 = vsel %vm2388_vm10, %v2390_v13, %v2386_v21  ;;  %3104 = vrcp.f32 %v4343_v57  ;;  %v4361_v1 = vmul.f32 0.70710677, %v4346_v45  ;;  %vm2400_vm13 = vmor %vm2398_vm3, %vm2399_vm11  ;;  %v2419_v6 = vand.u32 2147483648, %v4343_v57 }
 0x9c3   : > { %v2498_v27 = vmul.f32 1.0614054, %v4352_v51  ;;  %v2395_v28 = vsub.f32 1.0, %v2394_v5  ;;  %v2417_v59 = vand.u32 2147483647, %v4343_v57  ;;  %vm2413_vm1 = vweird.f32 %v4343_v57 }
 0x9c4   : > { %v4370_v44 = vand.u32 2147483647, %v4361_v1  ;;  %v2590_v21 = vmul.f32 1.442695, %v2580_v56  ;;  %vm2348_vm11 = vcmp.ge.f32.partialorder %v4327_v58, 0.0 }
 0x9c5   : > { %v2506_v32 = vadd.f32 -1.4531521, %v2498_v27  ;;  %v2396_v46 = vmul.f32 %v3103_v55, %v2395_v28  ;;  %vm2418_vm4 = vcmp.eq.f32.partialorder %v2417_v59, 8.507059e+37 }
 0x9c6   : > { %v2365_v26 = vmul.f32 0.3275911, %v4370_v44 }
 0x9c7   : > { %v2514_v37 = vmul.f32 %v2506_v32, %v4352_v51  ;;  %v2318_v23 = vpop.f32.mrf.mxu2  ;;  %v2397_v18 = vadd.f32 %v3103_v55, %v2396_v46  ;;  %v2420_v32 = vor.u32 1.1754944e-38, %v2419_v6  ;;  %v2573_v46 = vsub.f32 0.0, %v4370_v44 }
 0x9c8   : > { %v3105_v38 = vpop.eup %3104  ;;  %v4382_v41 = vadd.f32 %v4267_v22, %v2318_v23  ;;  %v4387_v15 = vadd.f32 1.0, %v2365_v26  ;;  %v4429_v23 = vmul.f32 0.5, %v4319_v40 }
 0x9c9   : > { %v2522_v11 = vadd.f32 1.4214138, %v2514_v37  ;;  %v2409_v54 = vmul.f32 %v3105_v38, %v4343_v57  ;;  %v2401_v24 = vsel %vm2400_vm13, %v3103_v55, %v2397_v18  ;;  %vm2414_vm15 = vweird.f32 %v3105_v38 }
 0x9ca   : > { %v4392_v16 = vmul.f32 0.70710677, %v4382_v41  ;;  %3106 = vrcp.f32 %v4387_v15  ;;  %v4400_v50 = vsel %vm2403_vm14, %v2405_v25, %v2401_v24  ;;  %v2588_v55 = vmul.f32 1.442695, %v2579_v35  ;;  %vm2415_vm2 = vmor %vm2413_vm1, %vm2414_vm15 }
 0x9cb   : > { %v2530_v60 = vmul.f32 %v2522_v11, %v4352_v51  ;;  %v2410_v47 = vsub.f32 1.0, %v2409_v54  ;;  %v2499_v42 = vmul.f32 1.0614054, %v4400_v50  ;;  %3108 = vpow2.f32 %v2586_v36 }
 0x9cc   : > { %v4398_v7 = vand.u32 2147483647, %v4392_v16  ;;  %v2432_v35 = vand.u32 2147483647, %v4387_v15  ;;  %v2434_v24 = vand.u32 2147483648, %v4387_v15  ;;  %v2581_v40 = vmul.f32 %v2573_v46, %v4370_v44 }
 0x9cd   : > { %v2538_v34 = vadd.f32 -0.28449672, %v2530_v60  ;;  %v2411_v52 = vmul.f32 %v3105_v38, %v2410_v47  ;;  %v2507_v13 = vadd.f32 -1.4531521, %v2499_v42  ;;  %vm2428_vm6 = vweird.f32 %v4387_v15 }
 0x9ce   : > { %v2366_v53 = vmul.f32 0.3275911, %v4398_v7  ;;  %vm2433_vm8 = vcmp.eq.f32.partialorder %v2432_v35, 8.507059e+37 }
 0x9cf   : > { %v2546_v3 = vmul.f32 %v2538_v34, %v4352_v51  ;;  %v2321_v8 = vpop.f32.mrf.mxu2  ;;  %v2412_v10 = vadd.f32 %v3105_v38, %v2411_v52  ;;  %v2515_v27 = vmul.f32 %v2507_v13, %v4400_v50 }
 0x9d0   : > { %v4413_v49 = vadd.f32 1.0, %v2366_v53  ;;  %v4416_v5 = vadd.f32 %v4267_v22, %v2321_v8  ;;  %v3107_v4 = vpop.eup %3106 }
 0x9d1   : > { %v2554_v14 = vadd.f32 0.2548296, %v2546_v3  ;;  %v2416_v28 = vsel %vm2415_vm2, %v3105_v38, %v2412_v10  ;;  %v2424_v36 = vmul.f32 %v3107_v4, %v4387_v15  ;;  %v2523_v12 = vadd.f32 1.4214138, %v2515_v27  ;;  %v3109_v26 = vpop.eup %3108 }
 0x9d2   : > { %3110 = vrcp.f32 %v4413_v49  ;;  %v4422_v57 = vmul.f32 0.70710677, %v4416_v5  ;;  %v4426_v37 = vsel %vm2418_vm4, %v2420_v32, %v2416_v28  ;;  %vm2429_vm5 = vweird.f32 %v3107_v4 }
 0x9d3   : > { %v2562_v61 = vmul.f32 %v2554_v14, %v4352_v51  ;;  %3112 = vpow2.f32 %v2588_v55  ;;  %v2425_v62 = vsub.f32 1.0, %v2424_v36  ;;  %v2531_v18 = vmul.f32 %v2523_v12, %v4400_v50  ;;  %vm2430_vm7 = vmor %vm2428_vm6, %vm2429_vm5 }
 0x9d4   : > { %v4432_v38 = vand.u32 2147483647, %v4422_v57  ;;  %3114 = vpow2.f32 %v2590_v21  ;;  %v2500_v51 = vmul.f32 1.0614054, %v4426_v37  ;;  %v2435_v10 = vor.u32 1.1754944e-38, %v2434_v24 }
 0x9d5   : > { %v2602_v43 = vmul.f32 %v3109_v26, %v2562_v61  ;;  %v2426_v54 = vmul.f32 %v3107_v4, %v2425_v62  ;;  %v2539_v47 = vadd.f32 -0.28449672, %v2531_v18  ;;  %v2574_v28 = vsub.f32 0.0, %v4398_v7 }
 0x9d6   : > { %v2367_v11 = vmul.f32 0.3275911, %v4432_v38  ;;  %v2508_v56 = vadd.f32 -1.4531521, %v2500_v51  ;;  %vm2443_vm9 = vweird.f32 %v4413_v49  ;;  %v2447_v35 = vand.u32 2147483647, %v4413_v49 }
 0x9d7   : > { %v2610_v25 = vsub.f32 1.0, %v2602_v43  ;;  %v2324_v60 = vpop.f32.mrf.mxu2  ;;  %v2427_v52 = vadd.f32 %v3107_v4, %v2426_v54  ;;  %v2547_v3 = vmul.f32 %v2539_v47, %v4400_v50  ;;  %v2575_v58 = vsub.f32 0.0, %v4432_v38 }
 0x9d8   : > { %v4440_v6 = vpop.eup %3110  ;;  %v4442_v34 = vadd.f32 1.0, %v2367_v11  ;;  %v4445_v42 = vadd.f32 %v4267_v22, %v2324_v60  ;;  %v2516_v44 = vmul.f32 %v2508_v56, %v4426_v37  ;;  %v2592_v56 = vmul.f32 1.442695, %v2581_v40 }
 0x9d9   : > { %v2618_v53 = vmul.f32 %v2610_v25, %v4364_v39  ;;  %v2439_v59 = vmul.f32 %v4440_v6, %v4413_v49  ;;  %v3113_v8 = vpop.eup %3112  ;;  %v2555_v39 = vadd.f32 0.2548296, %v2547_v3  ;;  %v2431_v36 = vsel %vm2430_vm7, %v3107_v4, %v2427_v52 }
 0x9da   : > { %3116 = vrcp.f32 %v4442_v34  ;;  %v4454_v13 = vmul.f32 0.70710677, %v4445_v42  ;;  %v3115_v55 = vpop.eup %3114  ;;  %v2524_v27 = vadd.f32 1.4214138, %v2516_v44  ;;  %v4465_v12 = vsel %vm2433_vm8, %v2435_v10, %v2431_v36 }
 0x9db   : > { %v2634_v21 = vadd.f32 1.0, %v2618_v53  ;;  %v2440_v14 = vsub.f32 1.0, %v2439_v59  ;;  %v2563_v46 = vmul.f32 %v2555_v39, %v4400_v50  ;;  %v2501_v62 = vmul.f32 1.0614054, %v4465_v12 }
 0x9dc   : > { %v4460_v32 = vand.u32 2147483647, %v4454_v13  ;;  %v2532_v15 = vmul.f32 %v2524_v27, %v4426_v37  ;;  %vm2444_vm10 = vweird.f32 %v4440_v6  ;;  %vm2448_vm12 = vcmp.eq.f32.partialorder %v2447_v35, 8.507059e+37 }
 0x9dd   : > { %v2642_v61 = vmul.f32 %v2634_v21, %v4367_v31  ;;  %v2441_v43 = vmul.f32 %v4440_v6, %v2440_v14  ;;  %v2603_v18 = vmul.f32 %v3113_v8, %v2563_v46  ;;  %v2449_v31 = vand.u32 2147483648, %v4413_v49  ;;  %vm4482_vm3 = vmor %vm2443_vm9, %vm2444_vm10 }
 0x9de   : > { %v2368_v26 = vmul.f32 0.3275911, %v4460_v32  ;;  %v2540_v4 = vadd.f32 -0.28449672, %v2532_v15  ;;  %v2509_v11 = vadd.f32 -1.4531521, %v2501_v62  ;;  %v2582_v49 = vmul.f32 %v2574_v28, %v4398_v7 }
 0x9df   : > { %2686 = vmatmul.f32.vlgmr.msrb.gmra.mxu0 %v2642_v61  ;;  %v2442_v54 = vadd.f32 %v4440_v6, %v2441_v43  ;;  %v2611_v25 = vsub.f32 1.0, %v2603_v18  ;;  %v2450_v8 = vor.u32 1.1754944e-38, %v2449_v31  ;;  %vm2458_vm13 = vweird.f32 %v4442_v34 }
 0x9e0   : > { %v3117_v50 = vpop.eup %3116  ;;  %v4473_v51 = vadd.f32 1.0, %v2368_v26  ;;  %v2548_v60 = vmul.f32 %v2540_v4, %v4426_v37  ;;  %v2517_v52 = vmul.f32 %v2509_v11, %v4465_v12  ;;  %v2464_v61 = vand.u32 2147483648, %v4442_v34 }
 0x9e1   : > { %v2454_v24 = vmul.f32 %v3117_v50, %v4442_v34  ;;  %v2446_v53 = vsel %vm4482_vm3, %v4440_v6, %v2442_v54  ;;  %v2619_v3 = vmul.f32 %v2611_v25, %v4408_v20  ;;  %vm2459_vm14 = vweird.f32 %v3117_v50 }
 0x9e2   : > { %3118 = vrcp.f32 %v4473_v51  ;;  %v2556_v44 = vadd.f32 0.2548296, %v2548_v60  ;;  %v2525_v10 = vadd.f32 1.4214138, %v2517_v52  ;;  %v4495_v14 = vsel %vm2448_vm12, %v2450_v8, %v2446_v53  ;;  %vm2460_vm15 = vmor %vm2458_vm13, %vm2459_vm14 }
 0x9e3   : > { %v2455_v59 = vsub.f32 1.0, %v2454_v24  ;;  %v2635_v40 = vadd.f32 1.0, %v2619_v3  ;;  %v2502_v6 = vmul.f32 1.0614054, %v4495_v14  ;;  %v2462_v20 = vand.u32 2147483647, %v4442_v34 }
 0x9e4   : > { %v2564_v21 = vmul.f32 %v2556_v44, %v4426_v37  ;;  %v2533_v27 = vmul.f32 %v2525_v10, %v4465_v12  ;;  %3120 = vpow2.f32 %v2592_v56  ;;  %v2356_v37 = vsel %vm2348_vm11, 1.0, %v3256_v30 }
 0x9e5   : > { %v2456_v39 = vmul.f32 %v3117_v50, %v2455_v59  ;;  %v2643_v36 = vmul.f32 %v2635_v40, %v4376_v33  ;;  %v2510_v26 = vadd.f32 -1.4531521, %v2502_v6  ;;  %v2594_v18 = vmul.f32 1.442695, %v2582_v49 }
 0x9e6   : > { %v2604_v7 = vmul.f32 %v3115_v55, %v2564_v21  ;;  %v2541_v15 = vadd.f32 -0.28449672, %v2533_v27  ;;  %v2465_v55 = vor.u32 1.1754944e-38, %v2464_v61  ;;  %vm2463_vm1 = vcmp.eq.f32.partialorder %v2462_v20, 8.507059e+37 }
 0x9e7   : > { %v2457_v28 = vadd.f32 %v3117_v50, %v2456_v39  ;;  %2689 = vmatmul.f32.gmra.mxu0 %v2643_v36  ;;  %v2518_v31 = vmul.f32 %v2510_v26, %v4495_v14  ;;  %v2479_v56 = vand.u32 2147483648, %v4473_v51  ;;  %vm2349_vm4 = vcmp.ge.f32.partialorder %v4361_v1, 0.0 }
 0x9e8   : > { %v3119_v46 = vpop.eup %3118  ;;  %v2612_v43 = vsub.f32 1.0, %v2604_v7  ;;  %v2549_v4 = vmul.f32 %v2541_v15, %v4465_v12  ;;  %v2583_v44 = vmul.f32 %v2575_v58, %v4432_v38  ;;  %vm2473_vm5 = vweird.f32 %v4473_v51 }
 0x9e9   : > { %v2469_v62 = vmul.f32 %v3119_v46, %v4473_v51  ;;  %v2461_v33 = vsel %vm2460_vm15, %v3117_v50, %v2457_v28  ;;  %v2526_v34 = vadd.f32 1.4214138, %v2518_v31  ;;  %vm2474_vm2 = vweird.f32 %v3119_v46 }
 0x9ea   : > { %v2620_v54 = vmul.f32 %v2612_v43, %v2356_v37  ;;  %v2466_v35 = vsel %vm2463_vm1, %v2465_v55, %v2461_v33  ;;  %v2557_v24 = vadd.f32 0.2548296, %v2549_v4  ;;  %v2477_v50 = vand.u32 2147483647, %v4473_v51  ;;  %v3121_v52 = vpop.eup %3120  ;;  %vm2475_vm6 = vmor %vm2473_vm5, %vm2474_vm2 }
 0x9eb   : > { %v2470_v11 = vsub.f32 1.0, %v2469_v62  ;;  %v2503_v25 = vmul.f32 1.0614054, %v2466_v35  ;;  %v2534_v59 = vmul.f32 %v2526_v34, %v4495_v14  ;;  %v2480_v39 = vor.u32 1.1754944e-38, %v2479_v56 }
 0x9ec   : > { %v2636_v60 = vadd.f32 1.0, %v2620_v54  ;;  %v2565_v53 = vmul.f32 %v2557_v24, %v4465_v12  ;;  %3122 = vpow2.f32 %v2594_v18  ;;  %v2576_v27 = vsub.f32 0.0, %v4460_v32 }
 0x9ed   : > { %v2471_v47 = vmul.f32 %v3119_v46, %v2470_v11  ;;  %v2511_v3 = vadd.f32 -1.4531521, %v2503_v25  ;;  %v2542_v40 = vadd.f32 -0.28449672, %v2534_v59  ;;  %vm2478_vm7 = vcmp.eq.f32.partialorder %v2477_v50, 8.507059e+37 }
 0x9ee   : > { %v2644_v8 = vmul.f32 %v2636_v60, %v4429_v23  ;;  %v2605_v10 = vmul.f32 %v3121_v52, %v2565_v53  ;;  %v2596_v36 = vmul.f32 1.442695, %v2583_v44  ;;  %v2357_v51 = vsel %vm2349_vm4, 1.0, %v3256_v30 }
 0x9ef   : > { %v2472_v49 = vadd.f32 %v3119_v46, %v2471_v47  ;;  %v2519_v21 = vmul.f32 %v2511_v3, %v2466_v35  ;;  %v2550_v38 = vmul.f32 %v2542_v40, %v4495_v14  ;;  %v2629_v15 = vmul.f32 0.5, %v4346_v45 }
 0x9f0   : > { %2692 = vmatmul.f32.gmra.mxu0 %v2644_v8  ;;  %v2613_v6 = vsub.f32 1.0, %v2605_v10  ;;  %3124 = vpow2.f32 %v2596_v36  ;;  %vm2350_vm8 = vcmp.ge.f32.partialorder %v4392_v16, 0.0  ;;  %v2630_v60 = vmul.f32 0.5, %v4382_v41 }
 0x9f1   : > { %v2476_v12 = vsel %vm2475_vm6, %v3119_v46, %v2472_v49  ;;  %v2527_v20 = vadd.f32 1.4214138, %v2519_v21  ;;  %v2558_v61 = vadd.f32 0.2548296, %v2550_v38  ;;  %v2584_v46 = vmul.f32 %v2576_v27, %v4460_v32 }
 0x9f2   : > { %v2481_v23 = vsel %vm2478_vm7, %v2480_v39, %v2476_v12  ;;  %v2621_v28 = vmul.f32 %v2613_v6, %v2357_v51  ;;  %v3123_v55 = vpop.eup %3122  ;;  %v2358_v24 = vsel %vm2350_vm8, 1.0, %v3256_v30  ;;  %vm2351_vm9 = vcmp.ge.f32.partialorder %v4422_v57, 0.0 }
 0x9f3   : > { %v2504_v7 = vmul.f32 1.0614054, %v2481_v23  ;;  %v2535_v37 = vmul.f32 %v2527_v20, %v2466_v35  ;;  %v2566_v43 = vmul.f32 %v2558_v61, %v4495_v14  ;;  %v2598_v11 = vmul.f32 1.442695, %v2584_v46 }
 0x9f4   : > { %v2637_v62 = vadd.f32 1.0, %v2621_v28  ;;  %v2359_v59 = vsel %vm2351_vm9, 1.0, %v3256_v30  ;;  %vm2352_vm10 = vcmp.ge.f32.partialorder %v4454_v13, 0.0  ;;  %v2632_v12 = vmul.f32 0.5, %v4445_v42 }
 0x9f5   : > { %v2512_v26 = vadd.f32 -1.4531521, %v2504_v7  ;;  %v2543_v33 = vadd.f32 -0.28449672, %v2535_v37  ;;  %v2606_v4 = vmul.f32 %v3123_v55, %v2566_v43  ;;  %3126 = vpow2.f32 %v2598_v11 }
 0x9f6   : > { %v2645_v1 = vmul.f32 %v2637_v62, %v2629_v15  ;;  %v3125_v14 = vpop.eup %3124  ;;  %v2360_v21 = vsel %vm2352_vm10, 1.0, %v3256_v30 }
 0x9f7   : > { %v2520_v18 = vmul.f32 %v2512_v26, %v2481_v23  ;;  %v2551_v31 = vmul.f32 %v2543_v33, %v2466_v35  ;;  %v2614_v54 = vsub.f32 1.0, %v2606_v4 }
 0x9f8   : > { %2695 = vmatmul.f32.gmra.mxu0 %v2645_v1 }
 0x9f9   : > { %v2528_v58 = vadd.f32 1.4214138, %v2520_v18  ;;  %v2559_v45 = vadd.f32 0.2548296, %v2551_v31  ;;  %v2622_v34 = vmul.f32 %v2614_v54, %v2358_v24 }
 0x9fb   : > { %v2536_v32 = vmul.f32 %v2528_v58, %v2481_v23  ;;  %v2567_v25 = vmul.f32 %v2559_v45, %v2466_v35  ;;  %v2638_v16 = vadd.f32 1.0, %v2622_v34  ;;  %v3127_v49 = vpop.eup %3126  ;;  %v2631_v35 = vmul.f32 0.5, %v4416_v5  ;;  %v2997_v34 = vld [vmem:[%s4592_s16] ss:$0 sm:$0xff] }
 0x9fd   : > { %v2544_v47 = vadd.f32 -0.28449672, %v2536_v32  ;;  %v2607_v50 = vmul.f32 %v3125_v14, %v2567_v25  ;;  %v2646_v52 = vmul.f32 %v2638_v16, %v2630_v60 }
 0x9ff   : > { %v2552_v56 = vmul.f32 %v2544_v47, %v2481_v23  ;;  %v2615_v53 = vsub.f32 1.0, %v2607_v50 }
 0xa00   : > { %2698 = vmatmul.f32.gmra.mxu0 %v2646_v52 }
 0xa01   : > { %v2560_v3 = vadd.f32 0.2548296, %v2552_v56  ;;  %v2623_v44 = vmul.f32 %v2615_v53, %v2359_v59 }
 0xa03   : > { %v2568_v8 = vmul.f32 %v2560_v3, %v2481_v23  ;;  %v2639_v10 = vadd.f32 1.0, %v2623_v44 }
 0xa05   : > { %v2608_v41 = vmul.f32 %v3127_v49, %v2568_v8  ;;  %v2647_v57 = vmul.f32 %v2639_v10, %v2631_v35 }
 0xa07   : > { %v2616_v40 = vsub.f32 1.0, %v2608_v41 }
 0xa08   : > { %2701 = vmatmul.f32.gmra.mxu0 %v2647_v57 }
 0xa09   : > { %v2624_v39 = vmul.f32 %v2616_v40, %v2360_v21 }
 0xa0b   : > { %v2640_v27 = vadd.f32 1.0, %v2624_v39 }
 0xa0d   : > { %v2648_v6 = vmul.f32 %v2640_v27, %v2632_v12 }
 0xa10   : > { %2704 = vmatmul.f32.gmra.mxu0 %v2648_v6 }
 0xa2a   : > { %v2327_v38 = vpop.f32.mrf.mxu2 }
 0xa2b   : > { %v2328_v20 = vadd.f32 %v4267_v22, %v2327_v38 }
 0xa2d   : > { %v2337_v23 = vmul.f32 0.70710677, %v2328_v20  ;;  %v2633_v50 = vmul.f32 0.5, %v2328_v20 }
 0xa2f   : > { %v2345_v5 = vand.u32 2147483647, %v2337_v23  ;;  %vm2353_vm14 = vcmp.ge.f32.partialorder %v2337_v23, 0.0 }
 0xa30   : > { %v2361_v14 = vsel %vm2353_vm14, 1.0, %v3256_v30 }
 0xa31   : > { %v2369_v36 = vmul.f32 0.3275911, %v2345_v5  ;;  %v2577_v62 = vsub.f32 0.0, %v2345_v5 }
 0xa33   : > { %v2377_v51 = vadd.f32 1.0, %v2369_v36  ;;  %v2585_v55 = vmul.f32 %v2577_v62, %v2345_v5 }
 0xa35   : > { %3128 = vrcp.f32 %v2377_v51  ;;  %v2494_v61 = vand.u32 2147483648, %v2377_v51  ;;  %v2492_v15 = vand.u32 2147483647, %v2377_v51  ;;  %vm2488_vm3 = vweird.f32 %v2377_v51 }
 0xa36   : > { %v2600_v4 = vmul.f32 1.442695, %v2585_v55 }
 0xa37   : > { %v2495_v42 = vor.u32 1.1754944e-38, %v2494_v61  ;;  %vm2493_vm13 = vcmp.eq.f32.partialorder %v2492_v15, 8.507059e+37 }
 0xa38   : > { %3130 = vpow2.f32 %v2600_v4 }
 0xa3b   : > { %v3129_v13 = vpop.eup %3128 }
 0xa3c   : > { %v2484_v7 = vmul.f32 %v3129_v13, %v2377_v51  ;;  %vm2489_vm11 = vweird.f32 %v3129_v13 }
 0xa3d   : > { %vm2490_vm12 = vmor %vm2488_vm3, %vm2489_vm11 }
 0xa3e   : > { %v2485_v28 = vsub.f32 1.0, %v2484_v7  ;;  %v3131_v24 = vpop.eup %3130 }
 0xa40   : > { %v2486_v37 = vmul.f32 %v3129_v13, %v2485_v28 }
 0xa42   : > { %v2487_v26 = vadd.f32 %v3129_v13, %v2486_v37 }
 0xa44   : > { %v2491_v46 = vsel %vm2490_vm12, %v3129_v13, %v2487_v26 }
 0xa45   : > { %v2496_v22 = vsel %vm2493_vm13, %v2495_v42, %v2491_v46 }
 0xa46   : > { %v2505_v43 = vmul.f32 1.0614054, %v2496_v22 }
 0xa48   : > { %v2513_v33 = vadd.f32 -1.4531521, %v2505_v43 }
 0xa4a   : > { %v2521_v18 = vmul.f32 %v2513_v33, %v2496_v22 }
 0xa4c   : > { %v2529_v1 = vadd.f32 1.4214138, %v2521_v18 }
 0xa4e   : > { %v2537_v31 = vmul.f32 %v2529_v1, %v2496_v22 }
 0xa50   : > { %v2545_v58 = vadd.f32 -0.28449672, %v2537_v31 }
 0xa52   : > { %v2553_v11 = vmul.f32 %v2545_v58, %v2496_v22 }
 0xa54   : > { %v2561_v54 = vadd.f32 0.2548296, %v2553_v11 }
 0xa56   : > { %v2569_v45 = vmul.f32 %v2561_v54, %v2496_v22 }
 0xa58   : > { %v2609_v32 = vmul.f32 %v3131_v24, %v2569_v45 }
 0xa5a   : > { %v2617_v25 = vsub.f32 1.0, %v2609_v32 }
 0xa5c   : > { %v2687_v60 = vpop.f32.mrf.mxu0  ;;  %v2625_v47 = vmul.f32 %v2617_v25, %v2361_v14 }
 0xa5d   : > { %v2688_v16 = vadd.f32 %v2997_v34, %v2687_v60 }
 0xa5e   : > { %v2641_v56 = vadd.f32 1.0, %v2625_v47 }
 0xa5f   : > { %v2711_v52 = vadd.f32 %v2688_v16, %v4127_v0 }
 0xa60   : > { %v2649_v53 = vmul.f32 %v2641_v56, %v2633_v50 }
 0xa61   : > { %2719 = vst.msk [vmem:[%s4547_s0] sm:$0xff] %vm605_vm0, %v2711_v52 }
 0xa62   : > { %2707 = vmatmul.f32.gmra.mxu0 %v2649_v53 }
 0xa64   : > { %v2690_v30 = vpop.f32.mrf.mxu0 }
 0xa65   : > { %v2691_v59 = vadd.f32 %v2997_v34, %v2690_v30 }
 0xa67   : > { %v2712_v3 = vadd.f32 %v2691_v59, %v4132_v29 }
 0xa69   : > { %2720 = vst.msk [vmem:[%s4547_s0 + $0x8] sm:$0xff] %vm605_vm0, %v2712_v3 }
 0xa6d   : > { %v2693_v44 = vpop.f32.mrf.mxu0 }
 0xa6e   : > { %v2694_v8 = vadd.f32 %v2997_v34, %v2693_v44 }
 0xa70   : > { %v2713_v49 = vadd.f32 %v2694_v8, %v4137_v2 }
 0xa72   : > { %2721 = vst.msk [vmem:[%s4547_s0 + $0x10] sm:$0xff] %vm605_vm0, %v2713_v49 }
 0xa75   : > { %v2696_v0 = vpop.f32.mrf.mxu0 }
 0xa76   : > { %v2697_v35 = vadd.f32 %v2997_v34, %v2696_v0 }
 0xa78   : > { %v2714_v10 = vadd.f32 %v2697_v35, %v4142_v17 }
 0xa7a   : > { %2722 = vst.msk [vmem:[%s4547_s0 + $0x18] sm:$0xff] %vm605_vm0, %v2714_v10 }
 0xa7d   : > { %v2699_v41 = vpop.f32.mrf.mxu0 }
 0xa7e   : > { %v2700_v57 = vadd.f32 %v2997_v34, %v2699_v41 }
 0xa80   : > { %v2715_v29 = vadd.f32 %v2700_v57, %v4147_v19 }
 0xa82   : > { %2723 = vst.msk [vmem:[%s4547_s0 + $0x20] sm:$0xff] %vm605_vm0, %v2715_v29 }
 0xa85   : > { %v2702_v40 = vpop.f32.mrf.mxu0 }
 0xa86   : > { %v2703_v21 = vadd.f32 %v2997_v34, %v2702_v40 }
 0xa88   : > { %v2716_v2 = vadd.f32 %v2703_v21, %v4152_v63 }
 0xa8a   : > { %2724 = vst.msk [vmem:[%s4547_s0 + $0x28] sm:$0xff] %vm605_vm0, %v2716_v2 }
 0xa8d   : > { %v2705_v39 = vpop.f32.mrf.mxu0 }
 0xa8e   : > { %v2706_v27 = vadd.f32 %v2997_v34, %v2705_v39 }
 0xa90   : > { %v2717_v12 = vadd.f32 %v2706_v27, %v4157_v9 }
 0xa92   : > { %2725 = vst.msk [vmem:[%s4547_s0 + $0x30] sm:$0xff] %vm605_vm0, %v2717_v12 }
 0xadf   : > { %v2708_v17 = vpop.f32.mrf.mxu0 }
 0xae0   : > { %v2709_v6 = vadd.f32 %v2997_v34, %v2708_v17 }
 0xae2   : > { %v2718_v38 = vadd.f32 %v2709_v6, %v4170_v48 }
 0xae4   : > { %2726 = vst.msk [vmem:[%s4547_s0 + $0x38] sm:$0xff] %vm605_vm0, %v2718_v38 }
 0xae5 PF: > { %s29_s24 = sadd.s32 1, %s3246_s24  }
 0xae6   : > { %p26_p7 = scmp.ge.s32.totalorder %s29_s24, 4  }
 0xae8   :  { %28 = sbr.rel (!%p26_p7) target bundleno = 6 (0x6), region = 137 }
 0xaed   :  { %2748 = vsyncpa [#allocation3], 1 }
 0xaee   :  { %2750 = vsyncpa [#allocation3 + $0x1], 1 }
 0xaef   :  { %2751 = vsyncpa [#allocation5], 1 }

</bundles_post_ra>
